<compile_context>
chip_gen: v5e
topology: v5e:2x2
jax: 0.10.0
libtpu: 0.0.40
codegen_flags: <defaults>
</compile_context>

<pallas_src>
import functools

import jax
import jax.numpy as jnp
from jax.experimental import pallas as pl
from jax.experimental.pallas import tpu as pltpu

LN_EPS = 1e-5


def _round_up(x, m):
    return ((x + m - 1) // m) * m


def _lanenet_kernel(num_layers, matmul_dtype, x_ref, *refs):
    """x_ref: (P, tile_rows, C) points-outer. refs = (w0,b0,g0,beta0, w1,..., out_ref)."""
    o_ref = refs[-1]
    w_refs = refs[:-1]

    P = x_ref.shape[0]
    H = w_refs[0].shape[1]

    def linear(x2d, w):
        # MXU matmul; operands optionally bf16 (v6e/v7x), accumulate in f32.
        return jnp.dot(x2d.astype(matmul_dtype), w.astype(matmul_dtype),
                       preferred_element_type=jnp.float32)

    def ln_relu(h, g, beta):
        # LayerNorm over the feature (lane) axis + ReLU, all in f32.
        # (If the XLU ever becomes the binding slot, mu/var can be moved to the
        #  mostly-idle MXU via h @ ones((H,1)); not needed at these sizes.)
        mu = jnp.mean(h, axis=-1, keepdims=True)
        var = jnp.mean(jnp.square(h - mu), axis=-1, keepdims=True)
        h = (h - mu) * jax.lax.rsqrt(var + LN_EPS)
        return jnp.maximum(h * g + beta, 0.0)

    # ---- layer 0: raw lane vectors, one dense (tile_rows, C) slab per point ----
    w0 = w_refs[0][...]     # (C, H)
    b0 = w_refs[1][...]     # (1, H)
    g0 = w_refs[2][...]     # (1, H)
    be0 = w_refs[3][...]    # (1, H)
    hs = [ln_relu(linear(x_ref[p].astype(jnp.float32), w0) + b0, g0, be0)
          for p in range(P)]
    hmax = hs[0]
    for p in range(1, P):
        hmax = jnp.maximum(hmax, hs[p])            # VPU maximum tree

    # ---- layers 1..L-1: weight-split form, concat/broadcast never materialized ----
    for i in range(1, num_layers):
        w = w_refs[4 * i + 0][...]                 # (2H, H)
        b = w_refs[4 * i + 1][...]                 # (1, H)
        g = w_refs[4 * i + 2][...]                 # (1, H)
        be = w_refs[4 * i + 3][...]                # (1, H)
        w_top = w[:H, :]
        w_bot = w[H:, :]
        shared = linear(hmax, w_bot) + b           # (tile_rows, H), once per layer
        hs = [ln_relu(linear(h_p, w_top) + shared, g, be) for h_p in hs]
        hmax = hs[0]
        for p in range(1, P):
            hmax = jnp.maximum(hmax, hs[p])

    # ---- final: max_p(concat([h, bcast(hmax)])) == concat([hmax, hmax]) ----
    # Output width 64 (<128 lanes) -> masked stores; at these sizes the relayout cost
    # of re-packing two rows into a 128-wide slab is comparable, so keep it simple.
    o_ref[...] = jnp.concatenate([hmax, hmax], axis=-1).astype(o_ref.dtype)


def lanenet_forward(lane, params, *, tile_rows=1024, matmul_dtype=jnp.float32):
    """lane: (B, L, P, C) float32; params: list of (W(C_in,H), b(1,H), gamma(1,H), beta(1,H)).

    tile_rows: lanes per grid step.  The per-row f32 working set is a few KB, so
      1024-2048 fits comfortably in v7x's 64 MiB VMEM (v5e/v6e: 128 MiB); keep the
      resulting grid >= 2 on v7x so the parallel row axis shards across both TCs.
    matmul_dtype: jnp.bfloat16 recommended on v6e/v7x (bf16-native MXU); LayerNorm,
      ReLU and the points-max always run in f32 on the VPU (required on v5e).
    """
    B, L, P, C = lane.shape
    num_layers = len(params)
    hidden = params[0][0].shape[1]
    out_dim = 2 * hidden

    rows = B * L
    tile_rows = max(8, min(tile_rows, _round_up(rows, 8)))
    tile_rows = _round_up(tile_rows, 8)
    rows_padded = _round_up(rows, tile_rows)

    x = lane.reshape(rows, P, C).astype(jnp.float32)
    if rows_padded != rows:
        x = jnp.pad(x, ((0, rows_padded - rows), (0, 0), (0, 0)))
    # Points-outer layout: rows on sublanes, features on lanes inside the kernel.
    x = jnp.transpose(x, (1, 0, 2))                # (P, rows_padded, C)

    in_specs = [pl.BlockSpec((P, tile_rows, C), lambda r: (0, r, 0))]
    flat_params = []
    for (w, b, g, beta) in params:
        for prm in (w, b, g, beta):
            flat_params.append(prm)
            # every weight tensor is 2-D and tiny: load it whole each grid step
            in_specs.append(pl.BlockSpec(prm.shape, lambda r: (0, 0)))

    out_spec = pl.BlockSpec((tile_rows, out_dim), lambda r: (r, 0))

    kernel = functools.partial(_lanenet_kernel, num_layers, matmul_dtype)

    out = pl.pallas_call(
        kernel,
        out_shape=jax.ShapeDtypeStruct((rows_padded, out_dim), jnp.float32),
        grid=(rows_padded // tile_rows,),
        in_specs=in_specs,
        out_specs=out_spec,
        compiler_params=pltpu.CompilerParams(
            dimension_semantics=("parallel",),
            # Explicit cap with headroom: ~10-20 MB live at tile_rows=1024-2048,
            # well under v7x's 64 MiB physical VMEM (v5e/v6e have 128 MiB).
            vmem_limit_bytes=48 * 1024 * 1024,
        ),
    )(x, *flat_params)

    return out[:rows].reshape(B, L, out_dim)


def lanenet_ref(lane, params):
    """Pure-JAX reference mirroring the PyTorch forward."""
    x = lane.astype(jnp.float32)
    for (w, b, g, beta) in params:
        h = x @ w + b[0]
        mu = h.mean(-1, keepdims=True)
        var = ((h - mu) ** 2).mean(-1, keepdims=True)
        h = (h - mu) / jnp.sqrt(var + LN_EPS) * g[0] + beta[0]
        h = jnp.maximum(h, 0.0)
        hmax = jnp.max(h, axis=-2, keepdims=True)
        x = jnp.concatenate([h, jnp.broadcast_to(hmax, h.shape)], axis=-1)
    return jnp.max(x, axis=-2)


def init_params(key, in_channels, hidden_unit, num_subgraph_layers):
    params = []
    cin = in_channels
    for _ in range(num_subgraph_layers):
        key, kw, kb = jax.random.split(key, 3)
        w = jax.random.normal(kw, (cin, hidden_unit), jnp.float32) * 0.1
        b = jax.random.normal(kb, (1, hidden_unit), jnp.float32) * 0.1
        g = jnp.ones((1, hidden_unit), jnp.float32)      # LayerNorm gamma init
        beta = jnp.zeros((1, hidden_unit), jnp.float32)  # LayerNorm beta init
        params.append((w, b, g, beta))
        cin = hidden_unit * 2
    return params


if __name__ == "__main__":
    # Module config: in_channels=7 (lane vector dim), hidden_unit=32 -> output 64,
    # num_subgraph_layers=3.  rows = B*L = 22 exercises the row-padding path.
    IN_CHANNELS, HIDDEN, NUM_LAYERS = 7, 32, 3
    B, L, P = 2, 11, 9  # batch, max_lane_num, points per lane

    key = jax.random.PRNGKey(0)
    key, k_lane = jax.random.split(key)
    lane = jax.random.normal(k_lane, (B, L, P, IN_CHANNELS), jnp.float32)
    params = init_params(key, IN_CHANNELS, HIDDEN, NUM_LAYERS)

    out = lanenet_forward(lane, params)  # f32 matmuls for strict parity with the module
    out = jax.block_until_ready(out)

    ref = jax.block_until_ready(lanenet_ref(lane, params))
    assert out.shape == (B, L, 2 * HIDDEN), out.shape
    err = float(jnp.max(jnp.abs(out - ref)))
    assert jnp.allclose(out, ref, atol=1e-4, rtol=1e-4), err

    print("KERNEL_OK")
</pallas_src>

<mosaic_0001>
module attributes {stable_mosaic.version = 11 : i64} {
  func.func @_lanenet_kernel(%arg0: i32, %arg1: memref<9x24x7xf32, #tpu.memory_space<vmem>>, %arg2: memref<7x32xf32, #tpu.memory_space<vmem>>, %arg3: memref<1x32xf32, #tpu.memory_space<vmem>>, %arg4: memref<1x32xf32, #tpu.memory_space<vmem>>, %arg5: memref<1x32xf32, #tpu.memory_space<vmem>>, %arg6: memref<64x32xf32, #tpu.memory_space<vmem>>, %arg7: memref<1x32xf32, #tpu.memory_space<vmem>>, %arg8: memref<1x32xf32, #tpu.memory_space<vmem>>, %arg9: memref<1x32xf32, #tpu.memory_space<vmem>>, %arg10: memref<64x32xf32, #tpu.memory_space<vmem>>, %arg11: memref<1x32xf32, #tpu.memory_space<vmem>>, %arg12: memref<1x32xf32, #tpu.memory_space<vmem>>, %arg13: memref<1x32xf32, #tpu.memory_space<vmem>>, %arg14: memref<24x64xf32, #tpu.memory_space<vmem>>) attributes {dimension_semantics = [#tpu.dimension_semantics<parallel>], iteration_bounds = array<i64: 1>, scalar_prefetch = 0 : i64, scratch_operands = 0 : i64, tpu.core_type = #tpu.core_type<tc>, window_params = [{transform_indices = @transform_0, window_bounds = array<i64: 9, 24, 7>}, {pipeline_mode = #tpu.pipeline_mode<synchronous>, transform_indices = @transform_1, window_bounds = array<i64: 7, 32>}, {pipeline_mode = #tpu.pipeline_mode<synchronous>, transform_indices = @transform_2, window_bounds = array<i64: 1, 32>}, {pipeline_mode = #tpu.pipeline_mode<synchronous>, transform_indices = @transform_3, window_bounds = array<i64: 1, 32>}, {pipeline_mode = #tpu.pipeline_mode<synchronous>, transform_indices = @transform_4, window_bounds = array<i64: 1, 32>}, {pipeline_mode = #tpu.pipeline_mode<synchronous>, transform_indices = @transform_5, window_bounds = array<i64: 64, 32>}, {pipeline_mode = #tpu.pipeline_mode<synchronous>, transform_indices = @transform_6, window_bounds = array<i64: 1, 32>}, {pipeline_mode = #tpu.pipeline_mode<synchronous>, transform_indices = @transform_7, window_bounds = array<i64: 1, 32>}, {pipeline_mode = #tpu.pipeline_mode<synchronous>, transform_indices = @transform_8, window_bounds = array<i64: 1, 32>}, {pipeline_mode = #tpu.pipeline_mode<synchronous>, transform_indices = @transform_9, window_bounds = array<i64: 64, 32>}, {pipeline_mode = #tpu.pipeline_mode<synchronous>, transform_indices = @transform_10, window_bounds = array<i64: 1, 32>}, {pipeline_mode = #tpu.pipeline_mode<synchronous>, transform_indices = @transform_11, window_bounds = array<i64: 1, 32>}, {pipeline_mode = #tpu.pipeline_mode<synchronous>, transform_indices = @transform_12, window_bounds = array<i64: 1, 32>}, {transform_indices = @transform_13, window_bounds = array<i64: 24, 64>}]} {
    %c0 = arith.constant 0 : index
    %c0_0 = arith.constant 0 : index
    %0 = vector.load %arg2[%c0, %c0_0] : memref<7x32xf32, #tpu.memory_space<vmem>>, vector<7x32xf32>
    %c0_1 = arith.constant 0 : index
    %c0_2 = arith.constant 0 : index
    %1 = vector.load %arg3[%c0_1, %c0_2] : memref<1x32xf32, #tpu.memory_space<vmem>>, vector<1x32xf32>
    %c0_3 = arith.constant 0 : index
    %c0_4 = arith.constant 0 : index
    %2 = vector.load %arg4[%c0_3, %c0_4] : memref<1x32xf32, #tpu.memory_space<vmem>>, vector<1x32xf32>
    %c0_5 = arith.constant 0 : index
    %c0_6 = arith.constant 0 : index
    %3 = vector.load %arg5[%c0_5, %c0_6] : memref<1x32xf32, #tpu.memory_space<vmem>>, vector<1x32xf32>
    %c0_7 = arith.constant 0 : index
    %c0_8 = arith.constant 0 : index
    %c0_9 = arith.constant 0 : index
    %4 = vector.load %arg1[%c0_7, %c0_8, %c0_9] : memref<9x24x7xf32, #tpu.memory_space<vmem>>, vector<1x24x7xf32>
    %5 = vector.shape_cast %4 : vector<1x24x7xf32> to vector<24x7xf32>
    %cst = arith.constant dense<0.000000e+00> : vector<24x32xf32>
    %6 = tpu.matmul %5, %0, %cst {dimension_numbers = #tpu.dot_dimension_numbers<[1], [0], [0], [1], [0, 0, 1, 1], [], []>} : vector<24x7xf32>, vector<7x32xf32>, vector<24x32xf32> -> vector<24x32xf32>
    %7 = vector.broadcast %1 : vector<1x32xf32> to vector<24x32xf32>
    %8 = arith.addf %6, %7 : vector<24x32xf32>
    %cst_10 = arith.constant dense<0.000000e+00> : vector<24xf32>
    %9 = vector.multi_reduction <add>, %8, %cst_10 [1] : vector<24x32xf32> to vector<24xf32>
    %10 = vector.shape_cast %9 : vector<24xf32> to vector<24x1xf32>
    %cst_11 = arith.constant 3.200000e+01 : f32
    %11 = vector.broadcast %cst_11 : f32 to vector<24x1xf32>
    %12 = arith.divf %10, %11 : vector<24x1xf32>
    %13 = vector.broadcast %12 : vector<24x1xf32> to vector<24x32xf32>
    %14 = arith.subf %8, %13 : vector<24x32xf32>
    %15 = arith.mulf %14, %14 : vector<24x32xf32>
    %cst_12 = arith.constant dense<0.000000e+00> : vector<24xf32>
    %16 = vector.multi_reduction <add>, %15, %cst_12 [1] : vector<24x32xf32> to vector<24xf32>
    %17 = vector.shape_cast %16 : vector<24xf32> to vector<24x1xf32>
    %cst_13 = arith.constant 3.200000e+01 : f32
    %18 = vector.broadcast %cst_13 : f32 to vector<24x1xf32>
    %19 = arith.divf %17, %18 : vector<24x1xf32>
    %20 = vector.broadcast %12 : vector<24x1xf32> to vector<24x32xf32>
    %21 = arith.subf %8, %20 : vector<24x32xf32>
    %cst_14 = arith.constant 9.99999974E-6 : f32
    %22 = vector.broadcast %cst_14 : f32 to vector<24x1xf32>
    %23 = arith.addf %19, %22 : vector<24x1xf32>
    %24 = math.rsqrt %23 : vector<24x1xf32>
    %25 = vector.broadcast %24 : vector<24x1xf32> to vector<24x32xf32>
    %26 = arith.mulf %21, %25 : vector<24x32xf32>
    %27 = vector.broadcast %2 : vector<1x32xf32> to vector<24x32xf32>
    %28 = arith.mulf %26, %27 : vector<24x32xf32>
    %29 = vector.broadcast %3 : vector<1x32xf32> to vector<24x32xf32>
    %30 = arith.addf %28, %29 : vector<24x32xf32>
    %cst_15 = arith.constant 0.000000e+00 : f32
    %31 = vector.broadcast %cst_15 : f32 to vector<24x32xf32>
    %32 = arith.maximumf %30, %31 : vector<24x32xf32>
    %c1 = arith.constant 1 : index
    %c0_16 = arith.constant 0 : index
    %c0_17 = arith.constant 0 : index
    %33 = vector.load %arg1[%c1, %c0_16, %c0_17] : memref<9x24x7xf32, #tpu.memory_space<vmem>>, vector<1x24x7xf32>
    %34 = vector.shape_cast %33 : vector<1x24x7xf32> to vector<24x7xf32>
    %cst_18 = arith.constant dense<0.000000e+00> : vector<24x32xf32>
    %35 = tpu.matmul %34, %0, %cst_18 {dimension_numbers = #tpu.dot_dimension_numbers<[1], [0], [0], [1], [0, 0, 1, 1], [], []>} : vector<24x7xf32>, vector<7x32xf32>, vector<24x32xf32> -> vector<24x32xf32>
    %36 = vector.broadcast %1 : vector<1x32xf32> to vector<24x32xf32>
    %37 = arith.addf %35, %36 : vector<24x32xf32>
    %cst_19 = arith.constant dense<0.000000e+00> : vector<24xf32>
    %38 = vector.multi_reduction <add>, %37, %cst_19 [1] : vector<24x32xf32> to vector<24xf32>
    %39 = vector.shape_cast %38 : vector<24xf32> to vector<24x1xf32>
    %cst_20 = arith.constant 3.200000e+01 : f32
    %40 = vector.broadcast %cst_20 : f32 to vector<24x1xf32>
    %41 = arith.divf %39, %40 : vector<24x1xf32>
    %42 = vector.broadcast %41 : vector<24x1xf32> to vector<24x32xf32>
    %43 = arith.subf %37, %42 : vector<24x32xf32>
    %44 = arith.mulf %43, %43 : vector<24x32xf32>
    %cst_21 = arith.constant dense<0.000000e+00> : vector<24xf32>
    %45 = vector.multi_reduction <add>, %44, %cst_21 [1] : vector<24x32xf32> to vector<24xf32>
    %46 = vector.shape_cast %45 : vector<24xf32> to vector<24x1xf32>
    %cst_22 = arith.constant 3.200000e+01 : f32
    %47 = vector.broadcast %cst_22 : f32 to vector<24x1xf32>
    %48 = arith.divf %46, %47 : vector<24x1xf32>
    %49 = vector.broadcast %41 : vector<24x1xf32> to vector<24x32xf32>
    %50 = arith.subf %37, %49 : vector<24x32xf32>
    %cst_23 = arith.constant 9.99999974E-6 : f32
    %51 = vector.broadcast %cst_23 : f32 to vector<24x1xf32>
    %52 = arith.addf %48, %51 : vector<24x1xf32>
    %53 = math.rsqrt %52 : vector<24x1xf32>
    %54 = vector.broadcast %53 : vector<24x1xf32> to vector<24x32xf32>
    %55 = arith.mulf %50, %54 : vector<24x32xf32>
    %56 = vector.broadcast %2 : vector<1x32xf32> to vector<24x32xf32>
    %57 = arith.mulf %55, %56 : vector<24x32xf32>
    %58 = vector.broadcast %3 : vector<1x32xf32> to vector<24x32xf32>
    %59 = arith.addf %57, %58 : vector<24x32xf32>
    %cst_24 = arith.constant 0.000000e+00 : f32
    %60 = vector.broadcast %cst_24 : f32 to vector<24x32xf32>
    %61 = arith.maximumf %59, %60 : vector<24x32xf32>
    %c2 = arith.constant 2 : index
    %c0_25 = arith.constant 0 : index
    %c0_26 = arith.constant 0 : index
    %62 = vector.load %arg1[%c2, %c0_25, %c0_26] : memref<9x24x7xf32, #tpu.memory_space<vmem>>, vector<1x24x7xf32>
    %63 = vector.shape_cast %62 : vector<1x24x7xf32> to vector<24x7xf32>
    %cst_27 = arith.constant dense<0.000000e+00> : vector<24x32xf32>
    %64 = tpu.matmul %63, %0, %cst_27 {dimension_numbers = #tpu.dot_dimension_numbers<[1], [0], [0], [1], [0, 0, 1, 1], [], []>} : vector<24x7xf32>, vector<7x32xf32>, vector<24x32xf32> -> vector<24x32xf32>
    %65 = vector.broadcast %1 : vector<1x32xf32> to vector<24x32xf32>
    %66 = arith.addf %64, %65 : vector<24x32xf32>
    %cst_28 = arith.constant dense<0.000000e+00> : vector<24xf32>
    %67 = vector.multi_reduction <add>, %66, %cst_28 [1] : vector<24x32xf32> to vector<24xf32>
    %68 = vector.shape_cast %67 : vector<24xf32> to vector<24x1xf32>
    %cst_29 = arith.constant 3.200000e+01 : f32
    %69 = vector.broadcast %cst_29 : f32 to vector<24x1xf32>
    %70 = arith.divf %68, %69 : vector<24x1xf32>
    %71 = vector.broadcast %70 : vector<24x1xf32> to vector<24x32xf32>
    %72 = arith.subf %66, %71 : vector<24x32xf32>
    %73 = arith.mulf %72, %72 : vector<24x32xf32>
    %cst_30 = arith.constant dense<0.000000e+00> : vector<24xf32>
    %74 = vector.multi_reduction <add>, %73, %cst_30 [1] : vector<24x32xf32> to vector<24xf32>
    %75 = vector.shape_cast %74 : vector<24xf32> to vector<24x1xf32>
    %cst_31 = arith.constant 3.200000e+01 : f32
    %76 = vector.broadcast %cst_31 : f32 to vector<24x1xf32>
    %77 = arith.divf %75, %76 : vector<24x1xf32>
    %78 = vector.broadcast %70 : vector<24x1xf32> to vector<24x32xf32>
    %79 = arith.subf %66, %78 : vector<24x32xf32>
    %cst_32 = arith.constant 9.99999974E-6 : f32
    %80 = vector.broadcast %cst_32 : f32 to vector<24x1xf32>
    %81 = arith.addf %77, %80 : vector<24x1xf32>
    %82 = math.rsqrt %81 : vector<24x1xf32>
    %83 = vector.broadcast %82 : vector<24x1xf32> to vector<24x32xf32>
    %84 = arith.mulf %79, %83 : vector<24x32xf32>
    %85 = vector.broadcast %2 : vector<1x32xf32> to vector<24x32xf32>
    %86 = arith.mulf %84, %85 : vector<24x32xf32>
    %87 = vector.broadcast %3 : vector<1x32xf32> to vector<24x32xf32>
    %88 = arith.addf %86, %87 : vector<24x32xf32>
    %cst_33 = arith.constant 0.000000e+00 : f32
    %89 = vector.broadcast %cst_33 : f32 to vector<24x32xf32>
    %90 = arith.maximumf %88, %89 : vector<24x32xf32>
    %c3 = arith.constant 3 : index
    %c0_34 = arith.constant 0 : index
    %c0_35 = arith.constant 0 : index
    %91 = vector.load %arg1[%c3, %c0_34, %c0_35] : memref<9x24x7xf32, #tpu.memory_space<vmem>>, vector<1x24x7xf32>
    %92 = vector.shape_cast %91 : vector<1x24x7xf32> to vector<24x7xf32>
    %cst_36 = arith.constant dense<0.000000e+00> : vector<24x32xf32>
    %93 = tpu.matmul %92, %0, %cst_36 {dimension_numbers = #tpu.dot_dimension_numbers<[1], [0], [0], [1], [0, 0, 1, 1], [], []>} : vector<24x7xf32>, vector<7x32xf32>, vector<24x32xf32> -> vector<24x32xf32>
    %94 = vector.broadcast %1 : vector<1x32xf32> to vector<24x32xf32>
    %95 = arith.addf %93, %94 : vector<24x32xf32>
    %cst_37 = arith.constant dense<0.000000e+00> : vector<24xf32>
    %96 = vector.multi_reduction <add>, %95, %cst_37 [1] : vector<24x32xf32> to vector<24xf32>
    %97 = vector.shape_cast %96 : vector<24xf32> to vector<24x1xf32>
    %cst_38 = arith.constant 3.200000e+01 : f32
    %98 = vector.broadcast %cst_38 : f32 to vector<24x1xf32>
    %99 = arith.divf %97, %98 : vector<24x1xf32>
    %100 = vector.broadcast %99 : vector<24x1xf32> to vector<24x32xf32>
    %101 = arith.subf %95, %100 : vector<24x32xf32>
    %102 = arith.mulf %101, %101 : vector<24x32xf32>
    %cst_39 = arith.constant dense<0.000000e+00> : vector<24xf32>
    %103 = vector.multi_reduction <add>, %102, %cst_39 [1] : vector<24x32xf32> to vector<24xf32>
    %104 = vector.shape_cast %103 : vector<24xf32> to vector<24x1xf32>
    %cst_40 = arith.constant 3.200000e+01 : f32
    %105 = vector.broadcast %cst_40 : f32 to vector<24x1xf32>
    %106 = arith.divf %104, %105 : vector<24x1xf32>
    %107 = vector.broadcast %99 : vector<24x1xf32> to vector<24x32xf32>
    %108 = arith.subf %95, %107 : vector<24x32xf32>
    %cst_41 = arith.constant 9.99999974E-6 : f32
    %109 = vector.broadcast %cst_41 : f32 to vector<24x1xf32>
    %110 = arith.addf %106, %109 : vector<24x1xf32>
    %111 = math.rsqrt %110 : vector<24x1xf32>
    %112 = vector.broadcast %111 : vector<24x1xf32> to vector<24x32xf32>
    %113 = arith.mulf %108, %112 : vector<24x32xf32>
    %114 = vector.broadcast %2 : vector<1x32xf32> to vector<24x32xf32>
    %115 = arith.mulf %113, %114 : vector<24x32xf32>
    %116 = vector.broadcast %3 : vector<1x32xf32> to vector<24x32xf32>
    %117 = arith.addf %115, %116 : vector<24x32xf32>
    %cst_42 = arith.constant 0.000000e+00 : f32
    %118 = vector.broadcast %cst_42 : f32 to vector<24x32xf32>
    %119 = arith.maximumf %117, %118 : vector<24x32xf32>
    %c4 = arith.constant 4 : index
    %c0_43 = arith.constant 0 : index
    %c0_44 = arith.constant 0 : index
    %120 = vector.load %arg1[%c4, %c0_43, %c0_44] : memref<9x24x7xf32, #tpu.memory_space<vmem>>, vector<1x24x7xf32>
    %121 = vector.shape_cast %120 : vector<1x24x7xf32> to vector<24x7xf32>
    %cst_45 = arith.constant dense<0.000000e+00> : vector<24x32xf32>
    %122 = tpu.matmul %121, %0, %cst_45 {dimension_numbers = #tpu.dot_dimension_numbers<[1], [0], [0], [1], [0, 0, 1, 1], [], []>} : vector<24x7xf32>, vector<7x32xf32>, vector<24x32xf32> -> vector<24x32xf32>
    %123 = vector.broadcast %1 : vector<1x32xf32> to vector<24x32xf32>
    %124 = arith.addf %122, %123 : vector<24x32xf32>
    %cst_46 = arith.constant dense<0.000000e+00> : vector<24xf32>
    %125 = vector.multi_reduction <add>, %124, %cst_46 [1] : vector<24x32xf32> to vector<24xf32>
    %126 = vector.shape_cast %125 : vector<24xf32> to vector<24x1xf32>
    %cst_47 = arith.constant 3.200000e+01 : f32
    %127 = vector.broadcast %cst_47 : f32 to vector<24x1xf32>
    %128 = arith.divf %126, %127 : vector<24x1xf32>
    %129 = vector.broadcast %128 : vector<24x1xf32> to vector<24x32xf32>
    %130 = arith.subf %124, %129 : vector<24x32xf32>
    %131 = arith.mulf %130, %130 : vector<24x32xf32>
    %cst_48 = arith.constant dense<0.000000e+00> : vector<24xf32>
    %132 = vector.multi_reduction <add>, %131, %cst_48 [1] : vector<24x32xf32> to vector<24xf32>
    %133 = vector.shape_cast %132 : vector<24xf32> to vector<24x1xf32>
    %cst_49 = arith.constant 3.200000e+01 : f32
    %134 = vector.broadcast %cst_49 : f32 to vector<24x1xf32>
    %135 = arith.divf %133, %134 : vector<24x1xf32>
    %136 = vector.broadcast %128 : vector<24x1xf32> to vector<24x32xf32>
    %137 = arith.subf %124, %136 : vector<24x32xf32>
    %cst_50 = arith.constant 9.99999974E-6 : f32
    %138 = vector.broadcast %cst_50 : f32 to vector<24x1xf32>
    %139 = arith.addf %135, %138 : vector<24x1xf32>
    %140 = math.rsqrt %139 : vector<24x1xf32>
    %141 = vector.broadcast %140 : vector<24x1xf32> to vector<24x32xf32>
    %142 = arith.mulf %137, %141 : vector<24x32xf32>
    %143 = vector.broadcast %2 : vector<1x32xf32> to vector<24x32xf32>
    %144 = arith.mulf %142, %143 : vector<24x32xf32>
    %145 = vector.broadcast %3 : vector<1x32xf32> to vector<24x32xf32>
    %146 = arith.addf %144, %145 : vector<24x32xf32>
    %cst_51 = arith.constant 0.000000e+00 : f32
    %147 = vector.broadcast %cst_51 : f32 to vector<24x32xf32>
    %148 = arith.maximumf %146, %147 : vector<24x32xf32>
    %c5 = arith.constant 5 : index
    %c0_52 = arith.constant 0 : index
    %c0_53 = arith.constant 0 : index
    %149 = vector.load %arg1[%c5, %c0_52, %c0_53] : memref<9x24x7xf32, #tpu.memory_space<vmem>>, vector<1x24x7xf32>
    %150 = vector.shape_cast %149 : vector<1x24x7xf32> to vector<24x7xf32>
    %cst_54 = arith.constant dense<0.000000e+00> : vector<24x32xf32>
    %151 = tpu.matmul %150, %0, %cst_54 {dimension_numbers = #tpu.dot_dimension_numbers<[1], [0], [0], [1], [0, 0, 1, 1], [], []>} : vector<24x7xf32>, vector<7x32xf32>, vector<24x32xf32> -> vector<24x32xf32>
    %152 = vector.broadcast %1 : vector<1x32xf32> to vector<24x32xf32>
    %153 = arith.addf %151, %152 : vector<24x32xf32>
    %cst_55 = arith.constant dense<0.000000e+00> : vector<24xf32>
    %154 = vector.multi_reduction <add>, %153, %cst_55 [1] : vector<24x32xf32> to vector<24xf32>
    %155 = vector.shape_cast %154 : vector<24xf32> to vector<24x1xf32>
    %cst_56 = arith.constant 3.200000e+01 : f32
    %156 = vector.broadcast %cst_56 : f32 to vector<24x1xf32>
    %157 = arith.divf %155, %156 : vector<24x1xf32>
    %158 = vector.broadcast %157 : vector<24x1xf32> to vector<24x32xf32>
    %159 = arith.subf %153, %158 : vector<24x32xf32>
    %160 = arith.mulf %159, %159 : vector<24x32xf32>
    %cst_57 = arith.constant dense<0.000000e+00> : vector<24xf32>
    %161 = vector.multi_reduction <add>, %160, %cst_57 [1] : vector<24x32xf32> to vector<24xf32>
    %162 = vector.shape_cast %161 : vector<24xf32> to vector<24x1xf32>
    %cst_58 = arith.constant 3.200000e+01 : f32
    %163 = vector.broadcast %cst_58 : f32 to vector<24x1xf32>
    %164 = arith.divf %162, %163 : vector<24x1xf32>
    %165 = vector.broadcast %157 : vector<24x1xf32> to vector<24x32xf32>
    %166 = arith.subf %153, %165 : vector<24x32xf32>
    %cst_59 = arith.constant 9.99999974E-6 : f32
    %167 = vector.broadcast %cst_59 : f32 to vector<24x1xf32>
    %168 = arith.addf %164, %167 : vector<24x1xf32>
    %169 = math.rsqrt %168 : vector<24x1xf32>
    %170 = vector.broadcast %169 : vector<24x1xf32> to vector<24x32xf32>
    %171 = arith.mulf %166, %170 : vector<24x32xf32>
    %172 = vector.broadcast %2 : vector<1x32xf32> to vector<24x32xf32>
    %173 = arith.mulf %171, %172 : vector<24x32xf32>
    %174 = vector.broadcast %3 : vector<1x32xf32> to vector<24x32xf32>
    %175 = arith.addf %173, %174 : vector<24x32xf32>
    %cst_60 = arith.constant 0.000000e+00 : f32
    %176 = vector.broadcast %cst_60 : f32 to vector<24x32xf32>
    %177 = arith.maximumf %175, %176 : vector<24x32xf32>
    %c6 = arith.constant 6 : index
    %c0_61 = arith.constant 0 : index
    %c0_62 = arith.constant 0 : index
    %178 = vector.load %arg1[%c6, %c0_61, %c0_62] : memref<9x24x7xf32, #tpu.memory_space<vmem>>, vector<1x24x7xf32>
    %179 = vector.shape_cast %178 : vector<1x24x7xf32> to vector<24x7xf32>
    %cst_63 = arith.constant dense<0.000000e+00> : vector<24x32xf32>
    %180 = tpu.matmul %179, %0, %cst_63 {dimension_numbers = #tpu.dot_dimension_numbers<[1], [0], [0], [1], [0, 0, 1, 1], [], []>} : vector<24x7xf32>, vector<7x32xf32>, vector<24x32xf32> -> vector<24x32xf32>
    %181 = vector.broadcast %1 : vector<1x32xf32> to vector<24x32xf32>
    %182 = arith.addf %180, %181 : vector<24x32xf32>
    %cst_64 = arith.constant dense<0.000000e+00> : vector<24xf32>
    %183 = vector.multi_reduction <add>, %182, %cst_64 [1] : vector<24x32xf32> to vector<24xf32>
    %184 = vector.shape_cast %183 : vector<24xf32> to vector<24x1xf32>
    %cst_65 = arith.constant 3.200000e+01 : f32
    %185 = vector.broadcast %cst_65 : f32 to vector<24x1xf32>
    %186 = arith.divf %184, %185 : vector<24x1xf32>
    %187 = vector.broadcast %186 : vector<24x1xf32> to vector<24x32xf32>
    %188 = arith.subf %182, %187 : vector<24x32xf32>
    %189 = arith.mulf %188, %188 : vector<24x32xf32>
    %cst_66 = arith.constant dense<0.000000e+00> : vector<24xf32>
    %190 = vector.multi_reduction <add>, %189, %cst_66 [1] : vector<24x32xf32> to vector<24xf32>
    %191 = vector.shape_cast %190 : vector<24xf32> to vector<24x1xf32>
    %cst_67 = arith.constant 3.200000e+01 : f32
    %192 = vector.broadcast %cst_67 : f32 to vector<24x1xf32>
    %193 = arith.divf %191, %192 : vector<24x1xf32>
    %194 = vector.broadcast %186 : vector<24x1xf32> to vector<24x32xf32>
    %195 = arith.subf %182, %194 : vector<24x32xf32>
    %cst_68 = arith.constant 9.99999974E-6 : f32
    %196 = vector.broadcast %cst_68 : f32 to vector<24x1xf32>
    %197 = arith.addf %193, %196 : vector<24x1xf32>
    %198 = math.rsqrt %197 : vector<24x1xf32>
    %199 = vector.broadcast %198 : vector<24x1xf32> to vector<24x32xf32>
    %200 = arith.mulf %195, %199 : vector<24x32xf32>
    %201 = vector.broadcast %2 : vector<1x32xf32> to vector<24x32xf32>
    %202 = arith.mulf %200, %201 : vector<24x32xf32>
    %203 = vector.broadcast %3 : vector<1x32xf32> to vector<24x32xf32>
    %204 = arith.addf %202, %203 : vector<24x32xf32>
    %cst_69 = arith.constant 0.000000e+00 : f32
    %205 = vector.broadcast %cst_69 : f32 to vector<24x32xf32>
    %206 = arith.maximumf %204, %205 : vector<24x32xf32>
    %c7 = arith.constant 7 : index
    %c0_70 = arith.constant 0 : index
    %c0_71 = arith.constant 0 : index
    %207 = vector.load %arg1[%c7, %c0_70, %c0_71] : memref<9x24x7xf32, #tpu.memory_space<vmem>>, vector<1x24x7xf32>
    %208 = vector.shape_cast %207 : vector<1x24x7xf32> to vector<24x7xf32>
    %cst_72 = arith.constant dense<0.000000e+00> : vector<24x32xf32>
    %209 = tpu.matmul %208, %0, %cst_72 {dimension_numbers = #tpu.dot_dimension_numbers<[1], [0], [0], [1], [0, 0, 1, 1], [], []>} : vector<24x7xf32>, vector<7x32xf32>, vector<24x32xf32> -> vector<24x32xf32>
    %210 = vector.broadcast %1 : vector<1x32xf32> to vector<24x32xf32>
    %211 = arith.addf %209, %210 : vector<24x32xf32>
    %cst_73 = arith.constant dense<0.000000e+00> : vector<24xf32>
    %212 = vector.multi_reduction <add>, %211, %cst_73 [1] : vector<24x32xf32> to vector<24xf32>
    %213 = vector.shape_cast %212 : vector<24xf32> to vector<24x1xf32>
    %cst_74 = arith.constant 3.200000e+01 : f32
    %214 = vector.broadcast %cst_74 : f32 to vector<24x1xf32>
    %215 = arith.divf %213, %214 : vector<24x1xf32>
    %216 = vector.broadcast %215 : vector<24x1xf32> to vector<24x32xf32>
    %217 = arith.subf %211, %216 : vector<24x32xf32>
    %218 = arith.mulf %217, %217 : vector<24x32xf32>
    %cst_75 = arith.constant dense<0.000000e+00> : vector<24xf32>
    %219 = vector.multi_reduction <add>, %218, %cst_75 [1] : vector<24x32xf32> to vector<24xf32>
    %220 = vector.shape_cast %219 : vector<24xf32> to vector<24x1xf32>
    %cst_76 = arith.constant 3.200000e+01 : f32
    %221 = vector.broadcast %cst_76 : f32 to vector<24x1xf32>
    %222 = arith.divf %220, %221 : vector<24x1xf32>
    %223 = vector.broadcast %215 : vector<24x1xf32> to vector<24x32xf32>
    %224 = arith.subf %211, %223 : vector<24x32xf32>
    %cst_77 = arith.constant 9.99999974E-6 : f32
    %225 = vector.broadcast %cst_77 : f32 to vector<24x1xf32>
    %226 = arith.addf %222, %225 : vector<24x1xf32>
    %227 = math.rsqrt %226 : vector<24x1xf32>
    %228 = vector.broadcast %227 : vector<24x1xf32> to vector<24x32xf32>
    %229 = arith.mulf %224, %228 : vector<24x32xf32>
    %230 = vector.broadcast %2 : vector<1x32xf32> to vector<24x32xf32>
    %231 = arith.mulf %229, %230 : vector<24x32xf32>
    %232 = vector.broadcast %3 : vector<1x32xf32> to vector<24x32xf32>
    %233 = arith.addf %231, %232 : vector<24x32xf32>
    %cst_78 = arith.constant 0.000000e+00 : f32
    %234 = vector.broadcast %cst_78 : f32 to vector<24x32xf32>
    %235 = arith.maximumf %233, %234 : vector<24x32xf32>
    %c8 = arith.constant 8 : index
    %c0_79 = arith.constant 0 : index
    %c0_80 = arith.constant 0 : index
    %236 = vector.load %arg1[%c8, %c0_79, %c0_80] : memref<9x24x7xf32, #tpu.memory_space<vmem>>, vector<1x24x7xf32>
    %237 = vector.shape_cast %236 : vector<1x24x7xf32> to vector<24x7xf32>
    %cst_81 = arith.constant dense<0.000000e+00> : vector<24x32xf32>
    %238 = tpu.matmul %237, %0, %cst_81 {dimension_numbers = #tpu.dot_dimension_numbers<[1], [0], [0], [1], [0, 0, 1, 1], [], []>} : vector<24x7xf32>, vector<7x32xf32>, vector<24x32xf32> -> vector<24x32xf32>
    %239 = vector.broadcast %1 : vector<1x32xf32> to vector<24x32xf32>
    %240 = arith.addf %238, %239 : vector<24x32xf32>
    %cst_82 = arith.constant dense<0.000000e+00> : vector<24xf32>
    %241 = vector.multi_reduction <add>, %240, %cst_82 [1] : vector<24x32xf32> to vector<24xf32>
    %242 = vector.shape_cast %241 : vector<24xf32> to vector<24x1xf32>
    %cst_83 = arith.constant 3.200000e+01 : f32
    %243 = vector.broadcast %cst_83 : f32 to vector<24x1xf32>
    %244 = arith.divf %242, %243 : vector<24x1xf32>
    %245 = vector.broadcast %244 : vector<24x1xf32> to vector<24x32xf32>
    %246 = arith.subf %240, %245 : vector<24x32xf32>
    %247 = arith.mulf %246, %246 : vector<24x32xf32>
    %cst_84 = arith.constant dense<0.000000e+00> : vector<24xf32>
    %248 = vector.multi_reduction <add>, %247, %cst_84 [1] : vector<24x32xf32> to vector<24xf32>
    %249 = vector.shape_cast %248 : vector<24xf32> to vector<24x1xf32>
    %cst_85 = arith.constant 3.200000e+01 : f32
    %250 = vector.broadcast %cst_85 : f32 to vector<24x1xf32>
    %251 = arith.divf %249, %250 : vector<24x1xf32>
    %252 = vector.broadcast %244 : vector<24x1xf32> to vector<24x32xf32>
    %253 = arith.subf %240, %252 : vector<24x32xf32>
    %cst_86 = arith.constant 9.99999974E-6 : f32
    %254 = vector.broadcast %cst_86 : f32 to vector<24x1xf32>
    %255 = arith.addf %251, %254 : vector<24x1xf32>
    %256 = math.rsqrt %255 : vector<24x1xf32>
    %257 = vector.broadcast %256 : vector<24x1xf32> to vector<24x32xf32>
    %258 = arith.mulf %253, %257 : vector<24x32xf32>
    %259 = vector.broadcast %2 : vector<1x32xf32> to vector<24x32xf32>
    %260 = arith.mulf %258, %259 : vector<24x32xf32>
    %261 = vector.broadcast %3 : vector<1x32xf32> to vector<24x32xf32>
    %262 = arith.addf %260, %261 : vector<24x32xf32>
    %cst_87 = arith.constant 0.000000e+00 : f32
    %263 = vector.broadcast %cst_87 : f32 to vector<24x32xf32>
    %264 = arith.maximumf %262, %263 : vector<24x32xf32>
    %265 = arith.maximumf %32, %61 : vector<24x32xf32>
    %266 = arith.maximumf %265, %90 : vector<24x32xf32>
    %267 = arith.maximumf %266, %119 : vector<24x32xf32>
    %268 = arith.maximumf %267, %148 : vector<24x32xf32>
    %269 = arith.maximumf %268, %177 : vector<24x32xf32>
    %270 = arith.maximumf %269, %206 : vector<24x32xf32>
    %271 = arith.maximumf %270, %235 : vector<24x32xf32>
    %272 = arith.maximumf %271, %264 : vector<24x32xf32>
    %c0_88 = arith.constant 0 : index
    %c0_89 = arith.constant 0 : index
    %273 = vector.load %arg6[%c0_88, %c0_89] : memref<64x32xf32, #tpu.memory_space<vmem>>, vector<64x32xf32>
    %c0_90 = arith.constant 0 : index
    %c0_91 = arith.constant 0 : index
    %274 = vector.load %arg7[%c0_90, %c0_91] : memref<1x32xf32, #tpu.memory_space<vmem>>, vector<1x32xf32>
    %c0_92 = arith.constant 0 : index
    %c0_93 = arith.constant 0 : index
    %275 = vector.load %arg8[%c0_92, %c0_93] : memref<1x32xf32, #tpu.memory_space<vmem>>, vector<1x32xf32>
    %c0_94 = arith.constant 0 : index
    %c0_95 = arith.constant 0 : index
    %276 = vector.load %arg9[%c0_94, %c0_95] : memref<1x32xf32, #tpu.memory_space<vmem>>, vector<1x32xf32>
    %277 = vector.extract_strided_slice %273 {offsets = [0, 0], sizes = [32, 32], strides = [1, 1]} : vector<64x32xf32> to vector<32x32xf32>
    %278 = vector.extract_strided_slice %273 {offsets = [32, 0], sizes = [32, 32], strides = [1, 1]} : vector<64x32xf32> to vector<32x32xf32>
    %cst_96 = arith.constant dense<0.000000e+00> : vector<24x32xf32>
    %279 = tpu.matmul %272, %278, %cst_96 {dimension_numbers = #tpu.dot_dimension_numbers<[1], [0], [0], [1], [0, 0, 1, 1], [], []>} : vector<24x32xf32>, vector<32x32xf32>, vector<24x32xf32> -> vector<24x32xf32>
    %280 = vector.broadcast %274 : vector<1x32xf32> to vector<24x32xf32>
    %281 = arith.addf %279, %280 : vector<24x32xf32>
    %cst_97 = arith.constant dense<0.000000e+00> : vector<24x32xf32>
    %282 = tpu.matmul %32, %277, %cst_97 {dimension_numbers = #tpu.dot_dimension_numbers<[1], [0], [0], [1], [0, 0, 1, 1], [], []>} : vector<24x32xf32>, vector<32x32xf32>, vector<24x32xf32> -> vector<24x32xf32>
    %283 = arith.addf %282, %281 : vector<24x32xf32>
    %cst_98 = arith.constant dense<0.000000e+00> : vector<24xf32>
    %284 = vector.multi_reduction <add>, %283, %cst_98 [1] : vector<24x32xf32> to vector<24xf32>
    %285 = vector.shape_cast %284 : vector<24xf32> to vector<24x1xf32>
    %cst_99 = arith.constant 3.200000e+01 : f32
    %286 = vector.broadcast %cst_99 : f32 to vector<24x1xf32>
    %287 = arith.divf %285, %286 : vector<24x1xf32>
    %288 = vector.broadcast %287 : vector<24x1xf32> to vector<24x32xf32>
    %289 = arith.subf %283, %288 : vector<24x32xf32>
    %290 = arith.mulf %289, %289 : vector<24x32xf32>
    %cst_100 = arith.constant dense<0.000000e+00> : vector<24xf32>
    %291 = vector.multi_reduction <add>, %290, %cst_100 [1] : vector<24x32xf32> to vector<24xf32>
    %292 = vector.shape_cast %291 : vector<24xf32> to vector<24x1xf32>
    %cst_101 = arith.constant 3.200000e+01 : f32
    %293 = vector.broadcast %cst_101 : f32 to vector<24x1xf32>
    %294 = arith.divf %292, %293 : vector<24x1xf32>
    %295 = vector.broadcast %287 : vector<24x1xf32> to vector<24x32xf32>
    %296 = arith.subf %283, %295 : vector<24x32xf32>
    %cst_102 = arith.constant 9.99999974E-6 : f32
    %297 = vector.broadcast %cst_102 : f32 to vector<24x1xf32>
    %298 = arith.addf %294, %297 : vector<24x1xf32>
    %299 = math.rsqrt %298 : vector<24x1xf32>
    %300 = vector.broadcast %299 : vector<24x1xf32> to vector<24x32xf32>
    %301 = arith.mulf %296, %300 : vector<24x32xf32>
    %302 = vector.broadcast %275 : vector<1x32xf32> to vector<24x32xf32>
    %303 = arith.mulf %301, %302 : vector<24x32xf32>
    %304 = vector.broadcast %276 : vector<1x32xf32> to vector<24x32xf32>
    %305 = arith.addf %303, %304 : vector<24x32xf32>
    %cst_103 = arith.constant 0.000000e+00 : f32
    %306 = vector.broadcast %cst_103 : f32 to vector<24x32xf32>
    %307 = arith.maximumf %305, %306 : vector<24x32xf32>
    %cst_104 = arith.constant dense<0.000000e+00> : vector<24x32xf32>
    %308 = tpu.matmul %61, %277, %cst_104 {dimension_numbers = #tpu.dot_dimension_numbers<[1], [0], [0], [1], [0, 0, 1, 1], [], []>} : vector<24x32xf32>, vector<32x32xf32>, vector<24x32xf32> -> vector<24x32xf32>
    %309 = arith.addf %308, %281 : vector<24x32xf32>
    %cst_105 = arith.constant dense<0.000000e+00> : vector<24xf32>
    %310 = vector.multi_reduction <add>, %309, %cst_105 [1] : vector<24x32xf32> to vector<24xf32>
    %311 = vector.shape_cast %310 : vector<24xf32> to vector<24x1xf32>
    %cst_106 = arith.constant 3.200000e+01 : f32
    %312 = vector.broadcast %cst_106 : f32 to vector<24x1xf32>
    %313 = arith.divf %311, %312 : vector<24x1xf32>
    %314 = vector.broadcast %313 : vector<24x1xf32> to vector<24x32xf32>
    %315 = arith.subf %309, %314 : vector<24x32xf32>
    %316 = arith.mulf %315, %315 : vector<24x32xf32>
    %cst_107 = arith.constant dense<0.000000e+00> : vector<24xf32>
    %317 = vector.multi_reduction <add>, %316, %cst_107 [1] : vector<24x32xf32> to vector<24xf32>
    %318 = vector.shape_cast %317 : vector<24xf32> to vector<24x1xf32>
    %cst_108 = arith.constant 3.200000e+01 : f32
    %319 = vector.broadcast %cst_108 : f32 to vector<24x1xf32>
    %320 = arith.divf %318, %319 : vector<24x1xf32>
    %321 = vector.broadcast %313 : vector<24x1xf32> to vector<24x32xf32>
    %322 = arith.subf %309, %321 : vector<24x32xf32>
    %cst_109 = arith.constant 9.99999974E-6 : f32
    %323 = vector.broadcast %cst_109 : f32 to vector<24x1xf32>
    %324 = arith.addf %320, %323 : vector<24x1xf32>
    %325 = math.rsqrt %324 : vector<24x1xf32>
    %326 = vector.broadcast %325 : vector<24x1xf32> to vector<24x32xf32>
    %327 = arith.mulf %322, %326 : vector<24x32xf32>
    %328 = vector.broadcast %275 : vector<1x32xf32> to vector<24x32xf32>
    %329 = arith.mulf %327, %328 : vector<24x32xf32>
    %330 = vector.broadcast %276 : vector<1x32xf32> to vector<24x32xf32>
    %331 = arith.addf %329, %330 : vector<24x32xf32>
    %cst_110 = arith.constant 0.000000e+00 : f32
    %332 = vector.broadcast %cst_110 : f32 to vector<24x32xf32>
    %333 = arith.maximumf %331, %332 : vector<24x32xf32>
    %cst_111 = arith.constant dense<0.000000e+00> : vector<24x32xf32>
    %334 = tpu.matmul %90, %277, %cst_111 {dimension_numbers = #tpu.dot_dimension_numbers<[1], [0], [0], [1], [0, 0, 1, 1], [], []>} : vector<24x32xf32>, vector<32x32xf32>, vector<24x32xf32> -> vector<24x32xf32>
    %335 = arith.addf %334, %281 : vector<24x32xf32>
    %cst_112 = arith.constant dense<0.000000e+00> : vector<24xf32>
    %336 = vector.multi_reduction <add>, %335, %cst_112 [1] : vector<24x32xf32> to vector<24xf32>
    %337 = vector.shape_cast %336 : vector<24xf32> to vector<24x1xf32>
    %cst_113 = arith.constant 3.200000e+01 : f32
    %338 = vector.broadcast %cst_113 : f32 to vector<24x1xf32>
    %339 = arith.divf %337, %338 : vector<24x1xf32>
    %340 = vector.broadcast %339 : vector<24x1xf32> to vector<24x32xf32>
    %341 = arith.subf %335, %340 : vector<24x32xf32>
    %342 = arith.mulf %341, %341 : vector<24x32xf32>
    %cst_114 = arith.constant dense<0.000000e+00> : vector<24xf32>
    %343 = vector.multi_reduction <add>, %342, %cst_114 [1] : vector<24x32xf32> to vector<24xf32>
    %344 = vector.shape_cast %343 : vector<24xf32> to vector<24x1xf32>
    %cst_115 = arith.constant 3.200000e+01 : f32
    %345 = vector.broadcast %cst_115 : f32 to vector<24x1xf32>
    %346 = arith.divf %344, %345 : vector<24x1xf32>
    %347 = vector.broadcast %339 : vector<24x1xf32> to vector<24x32xf32>
    %348 = arith.subf %335, %347 : vector<24x32xf32>
    %cst_116 = arith.constant 9.99999974E-6 : f32
    %349 = vector.broadcast %cst_116 : f32 to vector<24x1xf32>
    %350 = arith.addf %346, %349 : vector<24x1xf32>
    %351 = math.rsqrt %350 : vector<24x1xf32>
    %352 = vector.broadcast %351 : vector<24x1xf32> to vector<24x32xf32>
    %353 = arith.mulf %348, %352 : vector<24x32xf32>
    %354 = vector.broadcast %275 : vector<1x32xf32> to vector<24x32xf32>
    %355 = arith.mulf %353, %354 : vector<24x32xf32>
    %356 = vector.broadcast %276 : vector<1x32xf32> to vector<24x32xf32>
    %357 = arith.addf %355, %356 : vector<24x32xf32>
    %cst_117 = arith.constant 0.000000e+00 : f32
    %358 = vector.broadcast %cst_117 : f32 to vector<24x32xf32>
    %359 = arith.maximumf %357, %358 : vector<24x32xf32>
    %cst_118 = arith.constant dense<0.000000e+00> : vector<24x32xf32>
    %360 = tpu.matmul %119, %277, %cst_118 {dimension_numbers = #tpu.dot_dimension_numbers<[1], [0], [0], [1], [0, 0, 1, 1], [], []>} : vector<24x32xf32>, vector<32x32xf32>, vector<24x32xf32> -> vector<24x32xf32>
    %361 = arith.addf %360, %281 : vector<24x32xf32>
    %cst_119 = arith.constant dense<0.000000e+00> : vector<24xf32>
    %362 = vector.multi_reduction <add>, %361, %cst_119 [1] : vector<24x32xf32> to vector<24xf32>
    %363 = vector.shape_cast %362 : vector<24xf32> to vector<24x1xf32>
    %cst_120 = arith.constant 3.200000e+01 : f32
    %364 = vector.broadcast %cst_120 : f32 to vector<24x1xf32>
    %365 = arith.divf %363, %364 : vector<24x1xf32>
    %366 = vector.broadcast %365 : vector<24x1xf32> to vector<24x32xf32>
    %367 = arith.subf %361, %366 : vector<24x32xf32>
    %368 = arith.mulf %367, %367 : vector<24x32xf32>
    %cst_121 = arith.constant dense<0.000000e+00> : vector<24xf32>
    %369 = vector.multi_reduction <add>, %368, %cst_121 [1] : vector<24x32xf32> to vector<24xf32>
    %370 = vector.shape_cast %369 : vector<24xf32> to vector<24x1xf32>
    %cst_122 = arith.constant 3.200000e+01 : f32
    %371 = vector.broadcast %cst_122 : f32 to vector<24x1xf32>
    %372 = arith.divf %370, %371 : vector<24x1xf32>
    %373 = vector.broadcast %365 : vector<24x1xf32> to vector<24x32xf32>
    %374 = arith.subf %361, %373 : vector<24x32xf32>
    %cst_123 = arith.constant 9.99999974E-6 : f32
    %375 = vector.broadcast %cst_123 : f32 to vector<24x1xf32>
    %376 = arith.addf %372, %375 : vector<24x1xf32>
    %377 = math.rsqrt %376 : vector<24x1xf32>
    %378 = vector.broadcast %377 : vector<24x1xf32> to vector<24x32xf32>
    %379 = arith.mulf %374, %378 : vector<24x32xf32>
    %380 = vector.broadcast %275 : vector<1x32xf32> to vector<24x32xf32>
    %381 = arith.mulf %379, %380 : vector<24x32xf32>
    %382 = vector.broadcast %276 : vector<1x32xf32> to vector<24x32xf32>
    %383 = arith.addf %381, %382 : vector<24x32xf32>
    %cst_124 = arith.constant 0.000000e+00 : f32
    %384 = vector.broadcast %cst_124 : f32 to vector<24x32xf32>
    %385 = arith.maximumf %383, %384 : vector<24x32xf32>
    %cst_125 = arith.constant dense<0.000000e+00> : vector<24x32xf32>
    %386 = tpu.matmul %148, %277, %cst_125 {dimension_numbers = #tpu.dot_dimension_numbers<[1], [0], [0], [1], [0, 0, 1, 1], [], []>} : vector<24x32xf32>, vector<32x32xf32>, vector<24x32xf32> -> vector<24x32xf32>
    %387 = arith.addf %386, %281 : vector<24x32xf32>
    %cst_126 = arith.constant dense<0.000000e+00> : vector<24xf32>
    %388 = vector.multi_reduction <add>, %387, %cst_126 [1] : vector<24x32xf32> to vector<24xf32>
    %389 = vector.shape_cast %388 : vector<24xf32> to vector<24x1xf32>
    %cst_127 = arith.constant 3.200000e+01 : f32
    %390 = vector.broadcast %cst_127 : f32 to vector<24x1xf32>
    %391 = arith.divf %389, %390 : vector<24x1xf32>
    %392 = vector.broadcast %391 : vector<24x1xf32> to vector<24x32xf32>
    %393 = arith.subf %387, %392 : vector<24x32xf32>
    %394 = arith.mulf %393, %393 : vector<24x32xf32>
    %cst_128 = arith.constant dense<0.000000e+00> : vector<24xf32>
    %395 = vector.multi_reduction <add>, %394, %cst_128 [1] : vector<24x32xf32> to vector<24xf32>
    %396 = vector.shape_cast %395 : vector<24xf32> to vector<24x1xf32>
    %cst_129 = arith.constant 3.200000e+01 : f32
    %397 = vector.broadcast %cst_129 : f32 to vector<24x1xf32>
    %398 = arith.divf %396, %397 : vector<24x1xf32>
    %399 = vector.broadcast %391 : vector<24x1xf32> to vector<24x32xf32>
    %400 = arith.subf %387, %399 : vector<24x32xf32>
    %cst_130 = arith.constant 9.99999974E-6 : f32
    %401 = vector.broadcast %cst_130 : f32 to vector<24x1xf32>
    %402 = arith.addf %398, %401 : vector<24x1xf32>
    %403 = math.rsqrt %402 : vector<24x1xf32>
    %404 = vector.broadcast %403 : vector<24x1xf32> to vector<24x32xf32>
    %405 = arith.mulf %400, %404 : vector<24x32xf32>
    %406 = vector.broadcast %275 : vector<1x32xf32> to vector<24x32xf32>
    %407 = arith.mulf %405, %406 : vector<24x32xf32>
    %408 = vector.broadcast %276 : vector<1x32xf32> to vector<24x32xf32>
    %409 = arith.addf %407, %408 : vector<24x32xf32>
    %cst_131 = arith.constant 0.000000e+00 : f32
    %410 = vector.broadcast %cst_131 : f32 to vector<24x32xf32>
    %411 = arith.maximumf %409, %410 : vector<24x32xf32>
    %cst_132 = arith.constant dense<0.000000e+00> : vector<24x32xf32>
    %412 = tpu.matmul %177, %277, %cst_132 {dimension_numbers = #tpu.dot_dimension_numbers<[1], [0], [0], [1], [0, 0, 1, 1], [], []>} : vector<24x32xf32>, vector<32x32xf32>, vector<24x32xf32> -> vector<24x32xf32>
    %413 = arith.addf %412, %281 : vector<24x32xf32>
    %cst_133 = arith.constant dense<0.000000e+00> : vector<24xf32>
    %414 = vector.multi_reduction <add>, %413, %cst_133 [1] : vector<24x32xf32> to vector<24xf32>
    %415 = vector.shape_cast %414 : vector<24xf32> to vector<24x1xf32>
    %cst_134 = arith.constant 3.200000e+01 : f32
    %416 = vector.broadcast %cst_134 : f32 to vector<24x1xf32>
    %417 = arith.divf %415, %416 : vector<24x1xf32>
    %418 = vector.broadcast %417 : vector<24x1xf32> to vector<24x32xf32>
    %419 = arith.subf %413, %418 : vector<24x32xf32>
    %420 = arith.mulf %419, %419 : vector<24x32xf32>
    %cst_135 = arith.constant dense<0.000000e+00> : vector<24xf32>
    %421 = vector.multi_reduction <add>, %420, %cst_135 [1] : vector<24x32xf32> to vector<24xf32>
    %422 = vector.shape_cast %421 : vector<24xf32> to vector<24x1xf32>
    %cst_136 = arith.constant 3.200000e+01 : f32
    %423 = vector.broadcast %cst_136 : f32 to vector<24x1xf32>
    %424 = arith.divf %422, %423 : vector<24x1xf32>
    %425 = vector.broadcast %417 : vector<24x1xf32> to vector<24x32xf32>
    %426 = arith.subf %413, %425 : vector<24x32xf32>
    %cst_137 = arith.constant 9.99999974E-6 : f32
    %427 = vector.broadcast %cst_137 : f32 to vector<24x1xf32>
    %428 = arith.addf %424, %427 : vector<24x1xf32>
    %429 = math.rsqrt %428 : vector<24x1xf32>
    %430 = vector.broadcast %429 : vector<24x1xf32> to vector<24x32xf32>
    %431 = arith.mulf %426, %430 : vector<24x32xf32>
    %432 = vector.broadcast %275 : vector<1x32xf32> to vector<24x32xf32>
    %433 = arith.mulf %431, %432 : vector<24x32xf32>
    %434 = vector.broadcast %276 : vector<1x32xf32> to vector<24x32xf32>
    %435 = arith.addf %433, %434 : vector<24x32xf32>
    %cst_138 = arith.constant 0.000000e+00 : f32
    %436 = vector.broadcast %cst_138 : f32 to vector<24x32xf32>
    %437 = arith.maximumf %435, %436 : vector<24x32xf32>
    %cst_139 = arith.constant dense<0.000000e+00> : vector<24x32xf32>
    %438 = tpu.matmul %206, %277, %cst_139 {dimension_numbers = #tpu.dot_dimension_numbers<[1], [0], [0], [1], [0, 0, 1, 1], [], []>} : vector<24x32xf32>, vector<32x32xf32>, vector<24x32xf32> -> vector<24x32xf32>
    %439 = arith.addf %438, %281 : vector<24x32xf32>
    %cst_140 = arith.constant dense<0.000000e+00> : vector<24xf32>
    %440 = vector.multi_reduction <add>, %439, %cst_140 [1] : vector<24x32xf32> to vector<24xf32>
    %441 = vector.shape_cast %440 : vector<24xf32> to vector<24x1xf32>
    %cst_141 = arith.constant 3.200000e+01 : f32
    %442 = vector.broadcast %cst_141 : f32 to vector<24x1xf32>
    %443 = arith.divf %441, %442 : vector<24x1xf32>
    %444 = vector.broadcast %443 : vector<24x1xf32> to vector<24x32xf32>
    %445 = arith.subf %439, %444 : vector<24x32xf32>
    %446 = arith.mulf %445, %445 : vector<24x32xf32>
    %cst_142 = arith.constant dense<0.000000e+00> : vector<24xf32>
    %447 = vector.multi_reduction <add>, %446, %cst_142 [1] : vector<24x32xf32> to vector<24xf32>
    %448 = vector.shape_cast %447 : vector<24xf32> to vector<24x1xf32>
    %cst_143 = arith.constant 3.200000e+01 : f32
    %449 = vector.broadcast %cst_143 : f32 to vector<24x1xf32>
    %450 = arith.divf %448, %449 : vector<24x1xf32>
    %451 = vector.broadcast %443 : vector<24x1xf32> to vector<24x32xf32>
    %452 = arith.subf %439, %451 : vector<24x32xf32>
    %cst_144 = arith.constant 9.99999974E-6 : f32
    %453 = vector.broadcast %cst_144 : f32 to vector<24x1xf32>
    %454 = arith.addf %450, %453 : vector<24x1xf32>
    %455 = math.rsqrt %454 : vector<24x1xf32>
    %456 = vector.broadcast %455 : vector<24x1xf32> to vector<24x32xf32>
    %457 = arith.mulf %452, %456 : vector<24x32xf32>
    %458 = vector.broadcast %275 : vector<1x32xf32> to vector<24x32xf32>
    %459 = arith.mulf %457, %458 : vector<24x32xf32>
    %460 = vector.broadcast %276 : vector<1x32xf32> to vector<24x32xf32>
    %461 = arith.addf %459, %460 : vector<24x32xf32>
    %cst_145 = arith.constant 0.000000e+00 : f32
    %462 = vector.broadcast %cst_145 : f32 to vector<24x32xf32>
    %463 = arith.maximumf %461, %462 : vector<24x32xf32>
    %cst_146 = arith.constant dense<0.000000e+00> : vector<24x32xf32>
    %464 = tpu.matmul %235, %277, %cst_146 {dimension_numbers = #tpu.dot_dimension_numbers<[1], [0], [0], [1], [0, 0, 1, 1], [], []>} : vector<24x32xf32>, vector<32x32xf32>, vector<24x32xf32> -> vector<24x32xf32>
    %465 = arith.addf %464, %281 : vector<24x32xf32>
    %cst_147 = arith.constant dense<0.000000e+00> : vector<24xf32>
    %466 = vector.multi_reduction <add>, %465, %cst_147 [1] : vector<24x32xf32> to vector<24xf32>
    %467 = vector.shape_cast %466 : vector<24xf32> to vector<24x1xf32>
    %cst_148 = arith.constant 3.200000e+01 : f32
    %468 = vector.broadcast %cst_148 : f32 to vector<24x1xf32>
    %469 = arith.divf %467, %468 : vector<24x1xf32>
    %470 = vector.broadcast %469 : vector<24x1xf32> to vector<24x32xf32>
    %471 = arith.subf %465, %470 : vector<24x32xf32>
    %472 = arith.mulf %471, %471 : vector<24x32xf32>
    %cst_149 = arith.constant dense<0.000000e+00> : vector<24xf32>
    %473 = vector.multi_reduction <add>, %472, %cst_149 [1] : vector<24x32xf32> to vector<24xf32>
    %474 = vector.shape_cast %473 : vector<24xf32> to vector<24x1xf32>
    %cst_150 = arith.constant 3.200000e+01 : f32
    %475 = vector.broadcast %cst_150 : f32 to vector<24x1xf32>
    %476 = arith.divf %474, %475 : vector<24x1xf32>
    %477 = vector.broadcast %469 : vector<24x1xf32> to vector<24x32xf32>
    %478 = arith.subf %465, %477 : vector<24x32xf32>
    %cst_151 = arith.constant 9.99999974E-6 : f32
    %479 = vector.broadcast %cst_151 : f32 to vector<24x1xf32>
    %480 = arith.addf %476, %479 : vector<24x1xf32>
    %481 = math.rsqrt %480 : vector<24x1xf32>
    %482 = vector.broadcast %481 : vector<24x1xf32> to vector<24x32xf32>
    %483 = arith.mulf %478, %482 : vector<24x32xf32>
    %484 = vector.broadcast %275 : vector<1x32xf32> to vector<24x32xf32>
    %485 = arith.mulf %483, %484 : vector<24x32xf32>
    %486 = vector.broadcast %276 : vector<1x32xf32> to vector<24x32xf32>
    %487 = arith.addf %485, %486 : vector<24x32xf32>
    %cst_152 = arith.constant 0.000000e+00 : f32
    %488 = vector.broadcast %cst_152 : f32 to vector<24x32xf32>
    %489 = arith.maximumf %487, %488 : vector<24x32xf32>
    %cst_153 = arith.constant dense<0.000000e+00> : vector<24x32xf32>
    %490 = tpu.matmul %264, %277, %cst_153 {dimension_numbers = #tpu.dot_dimension_numbers<[1], [0], [0], [1], [0, 0, 1, 1], [], []>} : vector<24x32xf32>, vector<32x32xf32>, vector<24x32xf32> -> vector<24x32xf32>
    %491 = arith.addf %490, %281 : vector<24x32xf32>
    %cst_154 = arith.constant dense<0.000000e+00> : vector<24xf32>
    %492 = vector.multi_reduction <add>, %491, %cst_154 [1] : vector<24x32xf32> to vector<24xf32>
    %493 = vector.shape_cast %492 : vector<24xf32> to vector<24x1xf32>
    %cst_155 = arith.constant 3.200000e+01 : f32
    %494 = vector.broadcast %cst_155 : f32 to vector<24x1xf32>
    %495 = arith.divf %493, %494 : vector<24x1xf32>
    %496 = vector.broadcast %495 : vector<24x1xf32> to vector<24x32xf32>
    %497 = arith.subf %491, %496 : vector<24x32xf32>
    %498 = arith.mulf %497, %497 : vector<24x32xf32>
    %cst_156 = arith.constant dense<0.000000e+00> : vector<24xf32>
    %499 = vector.multi_reduction <add>, %498, %cst_156 [1] : vector<24x32xf32> to vector<24xf32>
    %500 = vector.shape_cast %499 : vector<24xf32> to vector<24x1xf32>
    %cst_157 = arith.constant 3.200000e+01 : f32
    %501 = vector.broadcast %cst_157 : f32 to vector<24x1xf32>
    %502 = arith.divf %500, %501 : vector<24x1xf32>
    %503 = vector.broadcast %495 : vector<24x1xf32> to vector<24x32xf32>
    %504 = arith.subf %491, %503 : vector<24x32xf32>
    %cst_158 = arith.constant 9.99999974E-6 : f32
    %505 = vector.broadcast %cst_158 : f32 to vector<24x1xf32>
    %506 = arith.addf %502, %505 : vector<24x1xf32>
    %507 = math.rsqrt %506 : vector<24x1xf32>
    %508 = vector.broadcast %507 : vector<24x1xf32> to vector<24x32xf32>
    %509 = arith.mulf %504, %508 : vector<24x32xf32>
    %510 = vector.broadcast %275 : vector<1x32xf32> to vector<24x32xf32>
    %511 = arith.mulf %509, %510 : vector<24x32xf32>
    %512 = vector.broadcast %276 : vector<1x32xf32> to vector<24x32xf32>
    %513 = arith.addf %511, %512 : vector<24x32xf32>
    %cst_159 = arith.constant 0.000000e+00 : f32
    %514 = vector.broadcast %cst_159 : f32 to vector<24x32xf32>
    %515 = arith.maximumf %513, %514 : vector<24x32xf32>
    %516 = arith.maximumf %307, %333 : vector<24x32xf32>
    %517 = arith.maximumf %516, %359 : vector<24x32xf32>
    %518 = arith.maximumf %517, %385 : vector<24x32xf32>
    %519 = arith.maximumf %518, %411 : vector<24x32xf32>
    %520 = arith.maximumf %519, %437 : vector<24x32xf32>
    %521 = arith.maximumf %520, %463 : vector<24x32xf32>
    %522 = arith.maximumf %521, %489 : vector<24x32xf32>
    %523 = arith.maximumf %522, %515 : vector<24x32xf32>
    %c0_160 = arith.constant 0 : index
    %c0_161 = arith.constant 0 : index
    %524 = vector.load %arg10[%c0_160, %c0_161] : memref<64x32xf32, #tpu.memory_space<vmem>>, vector<64x32xf32>
    %c0_162 = arith.constant 0 : index
    %c0_163 = arith.constant 0 : index
    %525 = vector.load %arg11[%c0_162, %c0_163] : memref<1x32xf32, #tpu.memory_space<vmem>>, vector<1x32xf32>
    %c0_164 = arith.constant 0 : index
    %c0_165 = arith.constant 0 : index
    %526 = vector.load %arg12[%c0_164, %c0_165] : memref<1x32xf32, #tpu.memory_space<vmem>>, vector<1x32xf32>
    %c0_166 = arith.constant 0 : index
    %c0_167 = arith.constant 0 : index
    %527 = vector.load %arg13[%c0_166, %c0_167] : memref<1x32xf32, #tpu.memory_space<vmem>>, vector<1x32xf32>
    %528 = vector.extract_strided_slice %524 {offsets = [0, 0], sizes = [32, 32], strides = [1, 1]} : vector<64x32xf32> to vector<32x32xf32>
    %529 = vector.extract_strided_slice %524 {offsets = [32, 0], sizes = [32, 32], strides = [1, 1]} : vector<64x32xf32> to vector<32x32xf32>
    %cst_168 = arith.constant dense<0.000000e+00> : vector<24x32xf32>
    %530 = tpu.matmul %523, %529, %cst_168 {dimension_numbers = #tpu.dot_dimension_numbers<[1], [0], [0], [1], [0, 0, 1, 1], [], []>} : vector<24x32xf32>, vector<32x32xf32>, vector<24x32xf32> -> vector<24x32xf32>
    %531 = vector.broadcast %525 : vector<1x32xf32> to vector<24x32xf32>
    %532 = arith.addf %530, %531 : vector<24x32xf32>
    %cst_169 = arith.constant dense<0.000000e+00> : vector<24x32xf32>
    %533 = tpu.matmul %307, %528, %cst_169 {dimension_numbers = #tpu.dot_dimension_numbers<[1], [0], [0], [1], [0, 0, 1, 1], [], []>} : vector<24x32xf32>, vector<32x32xf32>, vector<24x32xf32> -> vector<24x32xf32>
    %534 = arith.addf %533, %532 : vector<24x32xf32>
    %cst_170 = arith.constant dense<0.000000e+00> : vector<24xf32>
    %535 = vector.multi_reduction <add>, %534, %cst_170 [1] : vector<24x32xf32> to vector<24xf32>
    %536 = vector.shape_cast %535 : vector<24xf32> to vector<24x1xf32>
    %cst_171 = arith.constant 3.200000e+01 : f32
    %537 = vector.broadcast %cst_171 : f32 to vector<24x1xf32>
    %538 = arith.divf %536, %537 : vector<24x1xf32>
    %539 = vector.broadcast %538 : vector<24x1xf32> to vector<24x32xf32>
    %540 = arith.subf %534, %539 : vector<24x32xf32>
    %541 = arith.mulf %540, %540 : vector<24x32xf32>
    %cst_172 = arith.constant dense<0.000000e+00> : vector<24xf32>
    %542 = vector.multi_reduction <add>, %541, %cst_172 [1] : vector<24x32xf32> to vector<24xf32>
    %543 = vector.shape_cast %542 : vector<24xf32> to vector<24x1xf32>
    %cst_173 = arith.constant 3.200000e+01 : f32
    %544 = vector.broadcast %cst_173 : f32 to vector<24x1xf32>
    %545 = arith.divf %543, %544 : vector<24x1xf32>
    %546 = vector.broadcast %538 : vector<24x1xf32> to vector<24x32xf32>
    %547 = arith.subf %534, %546 : vector<24x32xf32>
    %cst_174 = arith.constant 9.99999974E-6 : f32
    %548 = vector.broadcast %cst_174 : f32 to vector<24x1xf32>
    %549 = arith.addf %545, %548 : vector<24x1xf32>
    %550 = math.rsqrt %549 : vector<24x1xf32>
    %551 = vector.broadcast %550 : vector<24x1xf32> to vector<24x32xf32>
    %552 = arith.mulf %547, %551 : vector<24x32xf32>
    %553 = vector.broadcast %526 : vector<1x32xf32> to vector<24x32xf32>
    %554 = arith.mulf %552, %553 : vector<24x32xf32>
    %555 = vector.broadcast %527 : vector<1x32xf32> to vector<24x32xf32>
    %556 = arith.addf %554, %555 : vector<24x32xf32>
    %cst_175 = arith.constant 0.000000e+00 : f32
    %557 = vector.broadcast %cst_175 : f32 to vector<24x32xf32>
    %558 = arith.maximumf %556, %557 : vector<24x32xf32>
    %cst_176 = arith.constant dense<0.000000e+00> : vector<24x32xf32>
    %559 = tpu.matmul %333, %528, %cst_176 {dimension_numbers = #tpu.dot_dimension_numbers<[1], [0], [0], [1], [0, 0, 1, 1], [], []>} : vector<24x32xf32>, vector<32x32xf32>, vector<24x32xf32> -> vector<24x32xf32>
    %560 = arith.addf %559, %532 : vector<24x32xf32>
    %cst_177 = arith.constant dense<0.000000e+00> : vector<24xf32>
    %561 = vector.multi_reduction <add>, %560, %cst_177 [1] : vector<24x32xf32> to vector<24xf32>
    %562 = vector.shape_cast %561 : vector<24xf32> to vector<24x1xf32>
    %cst_178 = arith.constant 3.200000e+01 : f32
    %563 = vector.broadcast %cst_178 : f32 to vector<24x1xf32>
    %564 = arith.divf %562, %563 : vector<24x1xf32>
    %565 = vector.broadcast %564 : vector<24x1xf32> to vector<24x32xf32>
    %566 = arith.subf %560, %565 : vector<24x32xf32>
    %567 = arith.mulf %566, %566 : vector<24x32xf32>
    %cst_179 = arith.constant dense<0.000000e+00> : vector<24xf32>
    %568 = vector.multi_reduction <add>, %567, %cst_179 [1] : vector<24x32xf32> to vector<24xf32>
    %569 = vector.shape_cast %568 : vector<24xf32> to vector<24x1xf32>
    %cst_180 = arith.constant 3.200000e+01 : f32
    %570 = vector.broadcast %cst_180 : f32 to vector<24x1xf32>
    %571 = arith.divf %569, %570 : vector<24x1xf32>
    %572 = vector.broadcast %564 : vector<24x1xf32> to vector<24x32xf32>
    %573 = arith.subf %560, %572 : vector<24x32xf32>
    %cst_181 = arith.constant 9.99999974E-6 : f32
    %574 = vector.broadcast %cst_181 : f32 to vector<24x1xf32>
    %575 = arith.addf %571, %574 : vector<24x1xf32>
    %576 = math.rsqrt %575 : vector<24x1xf32>
    %577 = vector.broadcast %576 : vector<24x1xf32> to vector<24x32xf32>
    %578 = arith.mulf %573, %577 : vector<24x32xf32>
    %579 = vector.broadcast %526 : vector<1x32xf32> to vector<24x32xf32>
    %580 = arith.mulf %578, %579 : vector<24x32xf32>
    %581 = vector.broadcast %527 : vector<1x32xf32> to vector<24x32xf32>
    %582 = arith.addf %580, %581 : vector<24x32xf32>
    %cst_182 = arith.constant 0.000000e+00 : f32
    %583 = vector.broadcast %cst_182 : f32 to vector<24x32xf32>
    %584 = arith.maximumf %582, %583 : vector<24x32xf32>
    %cst_183 = arith.constant dense<0.000000e+00> : vector<24x32xf32>
    %585 = tpu.matmul %359, %528, %cst_183 {dimension_numbers = #tpu.dot_dimension_numbers<[1], [0], [0], [1], [0, 0, 1, 1], [], []>} : vector<24x32xf32>, vector<32x32xf32>, vector<24x32xf32> -> vector<24x32xf32>
    %586 = arith.addf %585, %532 : vector<24x32xf32>
    %cst_184 = arith.constant dense<0.000000e+00> : vector<24xf32>
    %587 = vector.multi_reduction <add>, %586, %cst_184 [1] : vector<24x32xf32> to vector<24xf32>
    %588 = vector.shape_cast %587 : vector<24xf32> to vector<24x1xf32>
    %cst_185 = arith.constant 3.200000e+01 : f32
    %589 = vector.broadcast %cst_185 : f32 to vector<24x1xf32>
    %590 = arith.divf %588, %589 : vector<24x1xf32>
    %591 = vector.broadcast %590 : vector<24x1xf32> to vector<24x32xf32>
    %592 = arith.subf %586, %591 : vector<24x32xf32>
    %593 = arith.mulf %592, %592 : vector<24x32xf32>
    %cst_186 = arith.constant dense<0.000000e+00> : vector<24xf32>
    %594 = vector.multi_reduction <add>, %593, %cst_186 [1] : vector<24x32xf32> to vector<24xf32>
    %595 = vector.shape_cast %594 : vector<24xf32> to vector<24x1xf32>
    %cst_187 = arith.constant 3.200000e+01 : f32
    %596 = vector.broadcast %cst_187 : f32 to vector<24x1xf32>
    %597 = arith.divf %595, %596 : vector<24x1xf32>
    %598 = vector.broadcast %590 : vector<24x1xf32> to vector<24x32xf32>
    %599 = arith.subf %586, %598 : vector<24x32xf32>
    %cst_188 = arith.constant 9.99999974E-6 : f32
    %600 = vector.broadcast %cst_188 : f32 to vector<24x1xf32>
    %601 = arith.addf %597, %600 : vector<24x1xf32>
    %602 = math.rsqrt %601 : vector<24x1xf32>
    %603 = vector.broadcast %602 : vector<24x1xf32> to vector<24x32xf32>
    %604 = arith.mulf %599, %603 : vector<24x32xf32>
    %605 = vector.broadcast %526 : vector<1x32xf32> to vector<24x32xf32>
    %606 = arith.mulf %604, %605 : vector<24x32xf32>
    %607 = vector.broadcast %527 : vector<1x32xf32> to vector<24x32xf32>
    %608 = arith.addf %606, %607 : vector<24x32xf32>
    %cst_189 = arith.constant 0.000000e+00 : f32
    %609 = vector.broadcast %cst_189 : f32 to vector<24x32xf32>
    %610 = arith.maximumf %608, %609 : vector<24x32xf32>
    %cst_190 = arith.constant dense<0.000000e+00> : vector<24x32xf32>
    %611 = tpu.matmul %385, %528, %cst_190 {dimension_numbers = #tpu.dot_dimension_numbers<[1], [0], [0], [1], [0, 0, 1, 1], [], []>} : vector<24x32xf32>, vector<32x32xf32>, vector<24x32xf32> -> vector<24x32xf32>
    %612 = arith.addf %611, %532 : vector<24x32xf32>
    %cst_191 = arith.constant dense<0.000000e+00> : vector<24xf32>
    %613 = vector.multi_reduction <add>, %612, %cst_191 [1] : vector<24x32xf32> to vector<24xf32>
    %614 = vector.shape_cast %613 : vector<24xf32> to vector<24x1xf32>
    %cst_192 = arith.constant 3.200000e+01 : f32
    %615 = vector.broadcast %cst_192 : f32 to vector<24x1xf32>
    %616 = arith.divf %614, %615 : vector<24x1xf32>
    %617 = vector.broadcast %616 : vector<24x1xf32> to vector<24x32xf32>
    %618 = arith.subf %612, %617 : vector<24x32xf32>
    %619 = arith.mulf %618, %618 : vector<24x32xf32>
    %cst_193 = arith.constant dense<0.000000e+00> : vector<24xf32>
    %620 = vector.multi_reduction <add>, %619, %cst_193 [1] : vector<24x32xf32> to vector<24xf32>
    %621 = vector.shape_cast %620 : vector<24xf32> to vector<24x1xf32>
    %cst_194 = arith.constant 3.200000e+01 : f32
    %622 = vector.broadcast %cst_194 : f32 to vector<24x1xf32>
    %623 = arith.divf %621, %622 : vector<24x1xf32>
    %624 = vector.broadcast %616 : vector<24x1xf32> to vector<24x32xf32>
    %625 = arith.subf %612, %624 : vector<24x32xf32>
    %cst_195 = arith.constant 9.99999974E-6 : f32
    %626 = vector.broadcast %cst_195 : f32 to vector<24x1xf32>
    %627 = arith.addf %623, %626 : vector<24x1xf32>
    %628 = math.rsqrt %627 : vector<24x1xf32>
    %629 = vector.broadcast %628 : vector<24x1xf32> to vector<24x32xf32>
    %630 = arith.mulf %625, %629 : vector<24x32xf32>
    %631 = vector.broadcast %526 : vector<1x32xf32> to vector<24x32xf32>
    %632 = arith.mulf %630, %631 : vector<24x32xf32>
    %633 = vector.broadcast %527 : vector<1x32xf32> to vector<24x32xf32>
    %634 = arith.addf %632, %633 : vector<24x32xf32>
    %cst_196 = arith.constant 0.000000e+00 : f32
    %635 = vector.broadcast %cst_196 : f32 to vector<24x32xf32>
    %636 = arith.maximumf %634, %635 : vector<24x32xf32>
    %cst_197 = arith.constant dense<0.000000e+00> : vector<24x32xf32>
    %637 = tpu.matmul %411, %528, %cst_197 {dimension_numbers = #tpu.dot_dimension_numbers<[1], [0], [0], [1], [0, 0, 1, 1], [], []>} : vector<24x32xf32>, vector<32x32xf32>, vector<24x32xf32> -> vector<24x32xf32>
    %638 = arith.addf %637, %532 : vector<24x32xf32>
    %cst_198 = arith.constant dense<0.000000e+00> : vector<24xf32>
    %639 = vector.multi_reduction <add>, %638, %cst_198 [1] : vector<24x32xf32> to vector<24xf32>
    %640 = vector.shape_cast %639 : vector<24xf32> to vector<24x1xf32>
    %cst_199 = arith.constant 3.200000e+01 : f32
    %641 = vector.broadcast %cst_199 : f32 to vector<24x1xf32>
    %642 = arith.divf %640, %641 : vector<24x1xf32>
    %643 = vector.broadcast %642 : vector<24x1xf32> to vector<24x32xf32>
    %644 = arith.subf %638, %643 : vector<24x32xf32>
    %645 = arith.mulf %644, %644 : vector<24x32xf32>
    %cst_200 = arith.constant dense<0.000000e+00> : vector<24xf32>
    %646 = vector.multi_reduction <add>, %645, %cst_200 [1] : vector<24x32xf32> to vector<24xf32>
    %647 = vector.shape_cast %646 : vector<24xf32> to vector<24x1xf32>
    %cst_201 = arith.constant 3.200000e+01 : f32
    %648 = vector.broadcast %cst_201 : f32 to vector<24x1xf32>
    %649 = arith.divf %647, %648 : vector<24x1xf32>
    %650 = vector.broadcast %642 : vector<24x1xf32> to vector<24x32xf32>
    %651 = arith.subf %638, %650 : vector<24x32xf32>
    %cst_202 = arith.constant 9.99999974E-6 : f32
    %652 = vector.broadcast %cst_202 : f32 to vector<24x1xf32>
    %653 = arith.addf %649, %652 : vector<24x1xf32>
    %654 = math.rsqrt %653 : vector<24x1xf32>
    %655 = vector.broadcast %654 : vector<24x1xf32> to vector<24x32xf32>
    %656 = arith.mulf %651, %655 : vector<24x32xf32>
    %657 = vector.broadcast %526 : vector<1x32xf32> to vector<24x32xf32>
    %658 = arith.mulf %656, %657 : vector<24x32xf32>
    %659 = vector.broadcast %527 : vector<1x32xf32> to vector<24x32xf32>
    %660 = arith.addf %658, %659 : vector<24x32xf32>
    %cst_203 = arith.constant 0.000000e+00 : f32
    %661 = vector.broadcast %cst_203 : f32 to vector<24x32xf32>
    %662 = arith.maximumf %660, %661 : vector<24x32xf32>
    %cst_204 = arith.constant dense<0.000000e+00> : vector<24x32xf32>
    %663 = tpu.matmul %437, %528, %cst_204 {dimension_numbers = #tpu.dot_dimension_numbers<[1], [0], [0], [1], [0, 0, 1, 1], [], []>} : vector<24x32xf32>, vector<32x32xf32>, vector<24x32xf32> -> vector<24x32xf32>
    %664 = arith.addf %663, %532 : vector<24x32xf32>
    %cst_205 = arith.constant dense<0.000000e+00> : vector<24xf32>
    %665 = vector.multi_reduction <add>, %664, %cst_205 [1] : vector<24x32xf32> to vector<24xf32>
    %666 = vector.shape_cast %665 : vector<24xf32> to vector<24x1xf32>
    %cst_206 = arith.constant 3.200000e+01 : f32
    %667 = vector.broadcast %cst_206 : f32 to vector<24x1xf32>
    %668 = arith.divf %666, %667 : vector<24x1xf32>
    %669 = vector.broadcast %668 : vector<24x1xf32> to vector<24x32xf32>
    %670 = arith.subf %664, %669 : vector<24x32xf32>
    %671 = arith.mulf %670, %670 : vector<24x32xf32>
    %cst_207 = arith.constant dense<0.000000e+00> : vector<24xf32>
    %672 = vector.multi_reduction <add>, %671, %cst_207 [1] : vector<24x32xf32> to vector<24xf32>
    %673 = vector.shape_cast %672 : vector<24xf32> to vector<24x1xf32>
    %cst_208 = arith.constant 3.200000e+01 : f32
    %674 = vector.broadcast %cst_208 : f32 to vector<24x1xf32>
    %675 = arith.divf %673, %674 : vector<24x1xf32>
    %676 = vector.broadcast %668 : vector<24x1xf32> to vector<24x32xf32>
    %677 = arith.subf %664, %676 : vector<24x32xf32>
    %cst_209 = arith.constant 9.99999974E-6 : f32
    %678 = vector.broadcast %cst_209 : f32 to vector<24x1xf32>
    %679 = arith.addf %675, %678 : vector<24x1xf32>
    %680 = math.rsqrt %679 : vector<24x1xf32>
    %681 = vector.broadcast %680 : vector<24x1xf32> to vector<24x32xf32>
    %682 = arith.mulf %677, %681 : vector<24x32xf32>
    %683 = vector.broadcast %526 : vector<1x32xf32> to vector<24x32xf32>
    %684 = arith.mulf %682, %683 : vector<24x32xf32>
    %685 = vector.broadcast %527 : vector<1x32xf32> to vector<24x32xf32>
    %686 = arith.addf %684, %685 : vector<24x32xf32>
    %cst_210 = arith.constant 0.000000e+00 : f32
    %687 = vector.broadcast %cst_210 : f32 to vector<24x32xf32>
    %688 = arith.maximumf %686, %687 : vector<24x32xf32>
    %cst_211 = arith.constant dense<0.000000e+00> : vector<24x32xf32>
    %689 = tpu.matmul %463, %528, %cst_211 {dimension_numbers = #tpu.dot_dimension_numbers<[1], [0], [0], [1], [0, 0, 1, 1], [], []>} : vector<24x32xf32>, vector<32x32xf32>, vector<24x32xf32> -> vector<24x32xf32>
    %690 = arith.addf %689, %532 : vector<24x32xf32>
    %cst_212 = arith.constant dense<0.000000e+00> : vector<24xf32>
    %691 = vector.multi_reduction <add>, %690, %cst_212 [1] : vector<24x32xf32> to vector<24xf32>
    %692 = vector.shape_cast %691 : vector<24xf32> to vector<24x1xf32>
    %cst_213 = arith.constant 3.200000e+01 : f32
    %693 = vector.broadcast %cst_213 : f32 to vector<24x1xf32>
    %694 = arith.divf %692, %693 : vector<24x1xf32>
    %695 = vector.broadcast %694 : vector<24x1xf32> to vector<24x32xf32>
    %696 = arith.subf %690, %695 : vector<24x32xf32>
    %697 = arith.mulf %696, %696 : vector<24x32xf32>
    %cst_214 = arith.constant dense<0.000000e+00> : vector<24xf32>
    %698 = vector.multi_reduction <add>, %697, %cst_214 [1] : vector<24x32xf32> to vector<24xf32>
    %699 = vector.shape_cast %698 : vector<24xf32> to vector<24x1xf32>
    %cst_215 = arith.constant 3.200000e+01 : f32
    %700 = vector.broadcast %cst_215 : f32 to vector<24x1xf32>
    %701 = arith.divf %699, %700 : vector<24x1xf32>
    %702 = vector.broadcast %694 : vector<24x1xf32> to vector<24x32xf32>
    %703 = arith.subf %690, %702 : vector<24x32xf32>
    %cst_216 = arith.constant 9.99999974E-6 : f32
    %704 = vector.broadcast %cst_216 : f32 to vector<24x1xf32>
    %705 = arith.addf %701, %704 : vector<24x1xf32>
    %706 = math.rsqrt %705 : vector<24x1xf32>
    %707 = vector.broadcast %706 : vector<24x1xf32> to vector<24x32xf32>
    %708 = arith.mulf %703, %707 : vector<24x32xf32>
    %709 = vector.broadcast %526 : vector<1x32xf32> to vector<24x32xf32>
    %710 = arith.mulf %708, %709 : vector<24x32xf32>
    %711 = vector.broadcast %527 : vector<1x32xf32> to vector<24x32xf32>
    %712 = arith.addf %710, %711 : vector<24x32xf32>
    %cst_217 = arith.constant 0.000000e+00 : f32
    %713 = vector.broadcast %cst_217 : f32 to vector<24x32xf32>
    %714 = arith.maximumf %712, %713 : vector<24x32xf32>
    %cst_218 = arith.constant dense<0.000000e+00> : vector<24x32xf32>
    %715 = tpu.matmul %489, %528, %cst_218 {dimension_numbers = #tpu.dot_dimension_numbers<[1], [0], [0], [1], [0, 0, 1, 1], [], []>} : vector<24x32xf32>, vector<32x32xf32>, vector<24x32xf32> -> vector<24x32xf32>
    %716 = arith.addf %715, %532 : vector<24x32xf32>
    %cst_219 = arith.constant dense<0.000000e+00> : vector<24xf32>
    %717 = vector.multi_reduction <add>, %716, %cst_219 [1] : vector<24x32xf32> to vector<24xf32>
    %718 = vector.shape_cast %717 : vector<24xf32> to vector<24x1xf32>
    %cst_220 = arith.constant 3.200000e+01 : f32
    %719 = vector.broadcast %cst_220 : f32 to vector<24x1xf32>
    %720 = arith.divf %718, %719 : vector<24x1xf32>
    %721 = vector.broadcast %720 : vector<24x1xf32> to vector<24x32xf32>
    %722 = arith.subf %716, %721 : vector<24x32xf32>
    %723 = arith.mulf %722, %722 : vector<24x32xf32>
    %cst_221 = arith.constant dense<0.000000e+00> : vector<24xf32>
    %724 = vector.multi_reduction <add>, %723, %cst_221 [1] : vector<24x32xf32> to vector<24xf32>
    %725 = vector.shape_cast %724 : vector<24xf32> to vector<24x1xf32>
    %cst_222 = arith.constant 3.200000e+01 : f32
    %726 = vector.broadcast %cst_222 : f32 to vector<24x1xf32>
    %727 = arith.divf %725, %726 : vector<24x1xf32>
    %728 = vector.broadcast %720 : vector<24x1xf32> to vector<24x32xf32>
    %729 = arith.subf %716, %728 : vector<24x32xf32>
    %cst_223 = arith.constant 9.99999974E-6 : f32
    %730 = vector.broadcast %cst_223 : f32 to vector<24x1xf32>
    %731 = arith.addf %727, %730 : vector<24x1xf32>
    %732 = math.rsqrt %731 : vector<24x1xf32>
    %733 = vector.broadcast %732 : vector<24x1xf32> to vector<24x32xf32>
    %734 = arith.mulf %729, %733 : vector<24x32xf32>
    %735 = vector.broadcast %526 : vector<1x32xf32> to vector<24x32xf32>
    %736 = arith.mulf %734, %735 : vector<24x32xf32>
    %737 = vector.broadcast %527 : vector<1x32xf32> to vector<24x32xf32>
    %738 = arith.addf %736, %737 : vector<24x32xf32>
    %cst_224 = arith.constant 0.000000e+00 : f32
    %739 = vector.broadcast %cst_224 : f32 to vector<24x32xf32>
    %740 = arith.maximumf %738, %739 : vector<24x32xf32>
    %cst_225 = arith.constant dense<0.000000e+00> : vector<24x32xf32>
    %741 = tpu.matmul %515, %528, %cst_225 {dimension_numbers = #tpu.dot_dimension_numbers<[1], [0], [0], [1], [0, 0, 1, 1], [], []>} : vector<24x32xf32>, vector<32x32xf32>, vector<24x32xf32> -> vector<24x32xf32>
    %742 = arith.addf %741, %532 : vector<24x32xf32>
    %cst_226 = arith.constant dense<0.000000e+00> : vector<24xf32>
    %743 = vector.multi_reduction <add>, %742, %cst_226 [1] : vector<24x32xf32> to vector<24xf32>
    %744 = vector.shape_cast %743 : vector<24xf32> to vector<24x1xf32>
    %cst_227 = arith.constant 3.200000e+01 : f32
    %745 = vector.broadcast %cst_227 : f32 to vector<24x1xf32>
    %746 = arith.divf %744, %745 : vector<24x1xf32>
    %747 = vector.broadcast %746 : vector<24x1xf32> to vector<24x32xf32>
    %748 = arith.subf %742, %747 : vector<24x32xf32>
    %749 = arith.mulf %748, %748 : vector<24x32xf32>
    %cst_228 = arith.constant dense<0.000000e+00> : vector<24xf32>
    %750 = vector.multi_reduction <add>, %749, %cst_228 [1] : vector<24x32xf32> to vector<24xf32>
    %751 = vector.shape_cast %750 : vector<24xf32> to vector<24x1xf32>
    %cst_229 = arith.constant 3.200000e+01 : f32
    %752 = vector.broadcast %cst_229 : f32 to vector<24x1xf32>
    %753 = arith.divf %751, %752 : vector<24x1xf32>
    %754 = vector.broadcast %746 : vector<24x1xf32> to vector<24x32xf32>
    %755 = arith.subf %742, %754 : vector<24x32xf32>
    %cst_230 = arith.constant 9.99999974E-6 : f32
    %756 = vector.broadcast %cst_230 : f32 to vector<24x1xf32>
    %757 = arith.addf %753, %756 : vector<24x1xf32>
    %758 = math.rsqrt %757 : vector<24x1xf32>
    %759 = vector.broadcast %758 : vector<24x1xf32> to vector<24x32xf32>
    %760 = arith.mulf %755, %759 : vector<24x32xf32>
    %761 = vector.broadcast %526 : vector<1x32xf32> to vector<24x32xf32>
    %762 = arith.mulf %760, %761 : vector<24x32xf32>
    %763 = vector.broadcast %527 : vector<1x32xf32> to vector<24x32xf32>
    %764 = arith.addf %762, %763 : vector<24x32xf32>
    %cst_231 = arith.constant 0.000000e+00 : f32
    %765 = vector.broadcast %cst_231 : f32 to vector<24x32xf32>
    %766 = arith.maximumf %764, %765 : vector<24x32xf32>
    %767 = arith.maximumf %558, %584 : vector<24x32xf32>
    %768 = arith.maximumf %767, %610 : vector<24x32xf32>
    %769 = arith.maximumf %768, %636 : vector<24x32xf32>
    %770 = arith.maximumf %769, %662 : vector<24x32xf32>
    %771 = arith.maximumf %770, %688 : vector<24x32xf32>
    %772 = arith.maximumf %771, %714 : vector<24x32xf32>
    %773 = arith.maximumf %772, %740 : vector<24x32xf32>
    %774 = arith.maximumf %773, %766 : vector<24x32xf32>
    %775 = tpu.concatenate %774, %774 in 1 : vector<24x32xf32>, vector<24x32xf32> -> vector<24x64xf32>
    %c0_232 = arith.constant 0 : index
    %c0_233 = arith.constant 0 : index
    %776 = vector.load %arg14[%c0_232, %c0_233] : memref<24x64xf32, #tpu.memory_space<vmem>>, vector<24x64xf32>
    tpu.vector_store %arg14[%c0_232, %c0_233], %775 {strides = array<i32>} : memref<24x64xf32, #tpu.memory_space<vmem>>, vector<24x64xf32>,
    return
  }
  func.func @transform_0(%arg0: i32) -> (i32, i32, i32) {
    %c0_i32 = arith.constant 0 : i32
    %c0_i32_0 = arith.constant 0 : i32
    %c0_i32_1 = arith.constant 0 : i32
    return %c0_i32, %arg0, %c0_i32_0 : i32, i32, i32
  }
  func.func @transform_1(%arg0: i32) -> (i32, i32) {
    %c0_i32 = arith.constant 0 : i32
    %c0_i32_0 = arith.constant 0 : i32
    %c0_i32_1 = arith.constant 0 : i32
    return %c0_i32, %c0_i32_0 : i32, i32
  }
  func.func @transform_2(%arg0: i32) -> (i32, i32) {
    %c0_i32 = arith.constant 0 : i32
    %c0_i32_0 = arith.constant 0 : i32
    %c0_i32_1 = arith.constant 0 : i32
    return %c0_i32, %c0_i32_0 : i32, i32
  }
  func.func @transform_3(%arg0: i32) -> (i32, i32) {
    %c0_i32 = arith.constant 0 : i32
    %c0_i32_0 = arith.constant 0 : i32
    %c0_i32_1 = arith.constant 0 : i32
    return %c0_i32, %c0_i32_0 : i32, i32
  }
  func.func @transform_4(%arg0: i32) -> (i32, i32) {
    %c0_i32 = arith.constant 0 : i32
    %c0_i32_0 = arith.constant 0 : i32
    %c0_i32_1 = arith.constant 0 : i32
    return %c0_i32, %c0_i32_0 : i32, i32
  }
  func.func @transform_5(%arg0: i32) -> (i32, i32) {
    %c0_i32 = arith.constant 0 : i32
    %c0_i32_0 = arith.constant 0 : i32
    %c0_i32_1 = arith.constant 0 : i32
    return %c0_i32, %c0_i32_0 : i32, i32
  }
  func.func @transform_6(%arg0: i32) -> (i32, i32) {
    %c0_i32 = arith.constant 0 : i32
    %c0_i32_0 = arith.constant 0 : i32
    %c0_i32_1 = arith.constant 0 : i32
    return %c0_i32, %c0_i32_0 : i32, i32
  }
  func.func @transform_7(%arg0: i32) -> (i32, i32) {
    %c0_i32 = arith.constant 0 : i32
    %c0_i32_0 = arith.constant 0 : i32
    %c0_i32_1 = arith.constant 0 : i32
    return %c0_i32, %c0_i32_0 : i32, i32
  }
  func.func @transform_8(%arg0: i32) -> (i32, i32) {
    %c0_i32 = arith.constant 0 : i32
    %c0_i32_0 = arith.constant 0 : i32
    %c0_i32_1 = arith.constant 0 : i32
    return %c0_i32, %c0_i32_0 : i32, i32
  }
  func.func @transform_9(%arg0: i32) -> (i32, i32) {
    %c0_i32 = arith.constant 0 : i32
    %c0_i32_0 = arith.constant 0 : i32
    %c0_i32_1 = arith.constant 0 : i32
    return %c0_i32, %c0_i32_0 : i32, i32
  }
  func.func @transform_10(%arg0: i32) -> (i32, i32) {
    %c0_i32 = arith.constant 0 : i32
    %c0_i32_0 = arith.constant 0 : i32
    %c0_i32_1 = arith.constant 0 : i32
    return %c0_i32, %c0_i32_0 : i32, i32
  }
  func.func @transform_11(%arg0: i32) -> (i32, i32) {
    %c0_i32 = arith.constant 0 : i32
    %c0_i32_0 = arith.constant 0 : i32
    %c0_i32_1 = arith.constant 0 : i32
    return %c0_i32, %c0_i32_0 : i32, i32
  }
  func.func @transform_12(%arg0: i32) -> (i32, i32) {
    %c0_i32 = arith.constant 0 : i32
    %c0_i32_0 = arith.constant 0 : i32
    %c0_i32_1 = arith.constant 0 : i32
    return %c0_i32, %c0_i32_0 : i32, i32
  }
  func.func @transform_13(%arg0: i32) -> (i32, i32) {
    %c0_i32 = arith.constant 0 : i32
    %c0_i32_0 = arith.constant 0 : i32
    return %arg0, %c0_i32 : i32, i32
  }
}

</mosaic_0001>

<bundles_post_ra>
// kernel: tpu_custom_call.1
= control target key start
LH: loop header
LB: loop body
LE: loop exit
PB: predicated region body
PF: predicated region fallthrough
CT: control target
= control target key end

     0   :  { %vm65_vm0 = vcmask 1046528   ;;  %vm55_vm1 = vcmask 56320   ;;  %s7115_s0 = inlined_call_operand.vmem [shape: f32[9,24,7], index: 0, kind: input, shape index: {}]   ;;  %s7116_s1 = inlined_call_operand.vmem [shape: f32[7,32], index: 1, kind: input, shape index: {}]   ;;  %s7117_s2 = inlined_call_operand.vmem [shape: f32[1,32], index: 2, kind: input, shape index: {}]   ;;  %s7118_s3 = inlined_call_operand.vmem [shape: f32[1,32], index: 3, kind: input, shape index: {}]   ;;  %s7119_s4 = inlined_call_operand.vmem [shape: f32[1,32], index: 4, kind: input, shape index: {}]   ;;  %s7120_s5 = inlined_call_operand.vmem [shape: f32[64,32], index: 5, kind: input, shape index: {}]   ;;  %s7121_s6 = inlined_call_operand.vmem [shape: f32[1,32], index: 6, kind: input, shape index: {}]   ;;  %s7122_s7 = inlined_call_operand.vmem [shape: f32[1,32], index: 7, kind: input, shape index: {}]   ;;  %s7123_s8 = inlined_call_operand.vmem [shape: f32[1,32], index: 8, kind: input, shape index: {}]   ;;  %s7124_s9 = inlined_call_operand.vmem [shape: f32[64,32], index: 9, kind: input, shape index: {}]   ;;  %s7125_s10 = inlined_call_operand.vmem [shape: f32[1,32], index: 10, kind: input, shape index: {}]   ;;  %s7126_s11 = inlined_call_operand.vmem [shape: f32[1,32], index: 11, kind: input, shape index: {}]   ;;  %s7127_s12 = inlined_call_operand.vmem [shape: f32[1,32], index: 12, kind: input, shape index: {}]   ;;  %s7128_s13 = inlined_call_operand.hbm [shape: f32[24,64], index: 13, kind: output, shape index: {}]  }
   0x1   :  { %v45_v0 = vld [vmem:[%s7116_s1] sm:$0x7f]  ;;  %v50_v2 = vld [vmem:[%s7115_s0 + $0x8] sm:$0xff]  ;;  %v51_v3 = vld [vmem:[%s7115_s0 + $0x10] sm:$0xff] }
   0x2   :  { %v49_v1 = vld [vmem:[%s7115_s0] sm:$0xff]  ;;  %3295 = vmatpush.msk.msra.mxu0 %vm65_vm0, %v45_v0  ;;  %3415 = vmatpush.msk.msra.mxu1 %vm65_vm0, %v45_v0  ;;  %v3313_v4 = vld [vmem:[%s7115_s0 + $0x48] sm:$0xff]  ;;  %v3299_v5 = vld [vmem:[%s7115_s0 + $0x18] sm:$0xff] }
   0x3   :  { %3416 = vmatpush.msk.msra.mxu2 %vm65_vm0, %v45_v0  ;;  %3316 = vmatpush.msk.msra.mxu3 %vm65_vm0, %v45_v0  ;;  %v3306_v6 = vld [vmem:[%s7115_s0 + $0x30] sm:$0xff]  ;;  %v3320_v7 = vld [vmem:[%s7115_s0 + $0x60] sm:$0xff] }
   0x4   :  { %3296 = vmatmul.msk.f32.vlgmr.msra.gmra.mxu0 %vm55_vm1, %v49_v1  ;;  %3297 = vmatmul.msk.f32.vlgmr.msra.gmra.mxu1 %vm55_vm1, %v50_v2  ;;  %v3314_v8 = vld [vmem:[%s7115_s0 + $0x50] sm:$0xff] }
   0x5   :  { %3298 = vmatmul.msk.f32.vlgmr.msra.gmra.mxu2 %vm55_vm1, %v51_v3  ;;  %3302 = vmatpush.msk.msrb.mxu1 %vm65_vm0, %v45_v0 }
   0x6   :  { %3317 = vmatmul.msk.f32.vlgmr.msra.gmra.mxu3 %vm55_vm1, %v3313_v4  ;;  %3309 = vmatpush.msk.msrb.mxu2 %vm65_vm0, %v45_v0 }
   0x7   :  { %3323 = vmatpush.msk.msrb.mxu0 %vm65_vm0, %v45_v0  ;;  %3344 = vmatpush.msk.msrb.mxu3 %vm65_vm0, %v45_v0 }
   0x8   :  { %3337 = vmatpush.msk.msra.mxu2 %vm65_vm0, %v45_v0  ;;  %3330 = vmatpush.msk.msra.mxu1 %vm65_vm0, %v45_v0 }
   0x9   :  { %3351 = vmatpush.msk.msra.mxu0 %vm65_vm0, %v45_v0 }
   0xa   :  { %18 = vsyncpa [#allocation3], 0  ;;  %v3300_v9 = vld [vmem:[%s7115_s0 + $0x20] sm:$0xff]  ;;  %v3321_v10 = vld [vmem:[%s7115_s0 + $0x68] sm:$0xff]  ;;  %vm95_vm2 = vcmask 261120   ;;  %s3631_s19 = smov [#allocation2]  }
   0xb   :  { %v3307_v11 = vld [vmem:[%s7115_s0 + $0x38] sm:$0xff]  ;;  %v3301_v13 = vld [vmem:[%s7115_s0 + $0x28] sm:$0xff]  ;;  %v3322_v14 = vld [vmem:[%s7115_s0 + $0x70] sm:$0xff]  ;;  %s3283_s22 = sshll.u32 %s7128_s13, 4  ;;  %s3633_s23 = smov 8   ;;  %s3284_s22 = int_to_ptr.hbm [resolvable:$true] %s3283_s22 }
   0xc   :  { %3303 = vmatmul.msk.f32.vlgmr.msrb.gmra.mxu1 %vm55_vm1, %v3299_v5  ;;  %3324 = vmatmul.msk.f32.vlgmr.msrb.gmra.mxu0 %vm55_vm1, %v3320_v7  ;;  %v3315_v12 = vld [vmem:[%s7115_s0 + $0x58] sm:$0xff]  ;;  %v3308_v15 = vld [vmem:[%s7115_s0 + $0x40] sm:$0xff]  ;;  %v3341_v16 = vld [vmem:[%s7115_s0 + $0xa8] sm:$0xff] }
   0xd   :  { %3310 = vmatmul.msk.f32.vlgmr.msrb.gmra.mxu2 %vm55_vm1, %v3306_v6  ;;  %v3327_v17 = vld [vmem:[%s7115_s0 + $0x78] sm:$0xff]  ;;  %v3348_v18 = vld [vmem:[%s7115_s0 + $0xc0] sm:$0xff]  ;;  %v3334_v19 = vld [vmem:[%s7115_s0 + $0x90] sm:$0xff] }
   0xe   :  { %3318 = vmatmul.msk.f32.gmra.mxu3 %vm55_vm1, %v3314_v8  ;;  %v3342_v20 = vld [vmem:[%s7115_s0 + $0xb0] sm:$0xff]  ;;  %v3328_v21 = vld [vmem:[%s7115_s0 + $0x80] sm:$0xff]  ;;  %v3349_v22 = vld [vmem:[%s7115_s0 + $0xc8] sm:$0xff] }
   0xf   :  { %v3335_v23 = vld [vmem:[%s7115_s0 + $0x98] sm:$0xff]  ;;  %v3329_v25 = vld [vmem:[%s7115_s0 + $0x88] sm:$0xff]  ;;  %v3350_v26 = vld [vmem:[%s7115_s0 + $0xd0] sm:$0xff] }
  0x10   :  { %v3343_v24 = vld [vmem:[%s7115_s0 + $0xb8] sm:$0xff]  ;;  %v3336_v27 = vld [vmem:[%s7115_s0 + $0xa0] sm:$0xff] }
  0x11   :  { %v3829_v28 = vld [vmem:[%s7117_s2] ss:$0 sm:$0xff] }
  0x14   :  { %3304 = vmatmul.msk.f32.gmra.mxu1 %vm55_vm1, %v3300_v9  ;;  %3325 = vmatmul.msk.f32.gmra.mxu0 %vm55_vm1, %v3321_v10 }
  0x15   :  { %3311 = vmatmul.msk.f32.gmra.mxu2 %vm55_vm1, %v3307_v11 }
  0x16   :  { %3319 = vmatmul.msk.f32.gmra.mxu3 %vm55_vm1, %v3315_v12 }
  0x1c   :  { %3305 = vmatmul.msk.f32.gmra.mxu1 %vm55_vm1, %v3301_v13  ;;  %3326 = vmatmul.msk.f32.gmra.mxu0 %vm55_vm1, %v3322_v14 }
  0x1d   :  { %3312 = vmatmul.msk.f32.gmra.mxu2 %vm55_vm1, %v3308_v15 }
  0x1e   :  { %3345 = vmatmul.msk.f32.vlgmr.msrb.gmra.mxu3 %vm55_vm1, %v3341_v16 }
  0x24   :  { %3331 = vmatmul.msk.f32.vlgmr.msra.gmra.mxu1 %vm55_vm1, %v3327_v17  ;;  %3352 = vmatmul.msk.f32.vlgmr.msra.gmra.mxu0 %vm55_vm1, %v3348_v18 }
  0x25   :  { %3338 = vmatmul.msk.f32.vlgmr.msra.gmra.mxu2 %vm55_vm1, %v3334_v19 }
  0x26   :  { %3346 = vmatmul.msk.f32.gmra.mxu3 %vm55_vm1, %v3342_v20 }
  0x2c   :  { %3332 = vmatmul.msk.f32.gmra.mxu1 %vm55_vm1, %v3328_v21  ;;  %3353 = vmatmul.msk.f32.gmra.mxu0 %vm55_vm1, %v3349_v22 }
  0x2d   :  { %3339 = vmatmul.msk.f32.gmra.mxu2 %vm55_vm1, %v3335_v23 }
  0x2e   :  { %3347 = vmatmul.msk.f32.gmra.mxu3 %vm55_vm1, %v3343_v24 }
  0x34   :  { %3333 = vmatmul.msk.f32.gmra.mxu1 %vm55_vm1, %v3329_v25  ;;  %3354 = vmatmul.msk.f32.gmra.mxu0 %vm55_vm1, %v3350_v26 }
  0x35   :  { %3340 = vmatmul.msk.f32.gmra.mxu2 %vm55_vm1, %v3336_v27 }
  0x81   :  { %v86_v29 = vpop.f32.mrf.mxu0  ;;  %v89_v30 = vpop.f32.mrf.mxu1 }
  0x82   :  { %v3832_v31 = vadd.f32 %v3829_v28, %v86_v29  ;;  %v3835_v32 = vadd.f32 %v3829_v28, %v89_v30 }
  0x84   :  { %v99_v33 = vsel %vm95_vm2, %v3835_v32, 0.0  ;;  %v96_v34 = vsel %vm95_vm2, %v3832_v31, 0.0 }
  0x85   :  { %100 = vadd.xlane.f32.xlu2 %v99_v33  ;;  %97 = vadd.xlane.f32.xlu0 %v96_v34 }
  0x88   :  { %v92_v35 = vpop.f32.mrf.mxu2 }
  0x89   :  { %v3842_v36 = vadd.f32 %v3829_v28, %v92_v35  ;;  %v442_v37 = vpop.f32.mrf.mxu3  ;;  %v214_v38 = vpop.f32.mrf.mxu1 }
  0x8a   :  { %v3845_v39 = vadd.f32 %v3829_v28, %v442_v37  ;;  %v3848_v40 = vadd.f32 %v3829_v28, %v214_v38  ;;  %v556_v41 = vpop.f32.mrf.mxu0 }
  0x8b   :  { %v102_v42 = vsel %vm95_vm2, %v3842_v36, 0.0  ;;  %v3857_v45 = vadd.f32 %v3829_v28, %v556_v41 }
  0x8c   :  { %v451_v43 = vsel %vm95_vm2, %v3845_v39, 0.0  ;;  %v223_v44 = vsel %vm95_vm2, %v3848_v40, 0.0 }
  0x8d   :  { %452 = vadd.xlane.f32.xlu1 %v451_v43  ;;  %103 = vadd.xlane.f32.xlu2 %v102_v42  ;;  %v565_v51 = vsel %vm95_vm2, %v3857_v45, 0.0 }
  0x8e   :  { %224 = vadd.xlane.f32.xlu0 %v223_v44 }
  0x90   :  { %v328_v46 = vpop.f32.mrf.mxu2 }
  0x91   :  { %v3860_v47 = vadd.f32 %v3829_v28, %v328_v46  ;;  %v217_v48 = vpop.f32.mrf.mxu1  ;;  %v445_v49 = vpop.f32.mrf.mxu3 }
  0x92   :  { %v3863_v50 = vadd.f32 %v3829_v28, %v217_v48  ;;  %v559_v54 = vpop.f32.mrf.mxu0  ;;  %v3872_v55 = vadd.f32 %v3829_v28, %v445_v49 }
  0x93   :  { %v337_v52 = vsel %vm95_vm2, %v3860_v47, 0.0  ;;  %v3875_v56 = vadd.f32 %v3829_v28, %v559_v54 }
  0x94   :  { %v226_v53 = vsel %vm95_vm2, %v3863_v50, 0.0  ;;  %v454_v61 = vsel %vm95_vm2, %v3872_v55, 0.0 }
  0x95   :  { %338 = vadd.xlane.f32.xlu1 %v337_v52  ;;  %566 = vadd.xlane.f32.xlu2 %v565_v51  ;;  %v568_v63 = vsel %vm95_vm2, %v3875_v56, 0.0 }
  0x96   :  { %227 = vadd.xlane.f32.xlu0 %v226_v53 }
  0x98   :  { %v331_v57 = vpop.f32.mrf.mxu2 }
  0x99   :  { %v3878_v58 = vadd.f32 %v3829_v28, %v331_v57  ;;  %v448_v59 = vpop.f32.mrf.mxu3  ;;  %v220_v60 = vpop.f32.mrf.mxu1  ;;  %v3629_v57 = vmov 32.0  }
  0x9a   :  { %v3887_v0 = vadd.f32 %v3829_v28, %v448_v59  ;;  %v3890_v1 = vadd.f32 %v3829_v28, %v220_v60  ;;  %v562_v2 = vpop.f32.mrf.mxu0  ;;  %3431 = vrcp.f32 %v3629_v57 }
  0x9b   :  { %v340_v62 = vsel %vm95_vm2, %v3878_v58, 0.0  ;;  %v3908_v12 = vadd.f32 %v3829_v28, %v562_v2 }
  0x9c   :  { %v457_v7 = vsel %vm95_vm2, %v3887_v0, 0.0  ;;  %v229_v8 = vsel %vm95_vm2, %v3890_v1, 0.0 }
  0x9d   :  { %455 = vadd.xlane.f32.xlu1 %v454_v61  ;;  %341 = vadd.xlane.f32.xlu2 %v340_v62  ;;  %v571_v18 = vsel %vm95_vm2, %v3908_v12, 0.0 }
  0x9e   :  { %569 = vadd.xlane.f32.xlu0 %v568_v63 }
  0xa0   :  { %v334_v3 = vpop.f32.mrf.mxu2  ;;  %v3432_v59 = vpop.eup %3431 }
  0xa1   :  { %v898_v4 = vpop.f32.mrf.mxu3  ;;  %v670_v5 = vpop.f32.mrf.mxu1  ;;  %v3905_v11 = vadd.f32 %v3829_v28, %v334_v3  ;;  %v106_v60 = vmul.f32 32.0, %v3432_v59  ;;  %vm110_vm3 = vweird.f32 %v3432_v59 }
  0xa2   :  { %v3893_v6 = vadd.f32 %v3829_v28, %v898_v4  ;;  %v3902_v10 = vadd.f32 %v3829_v28, %v670_v5  ;;  %v1012_v14 = vpop.f32.mrf.mxu0 }
  0xa3   :  { %v343_v17 = vsel %vm95_vm2, %v3905_v11, 0.0  ;;  %v3917_v20 = vadd.f32 %v3829_v28, %v1012_v14  ;;  %v107_v61 = vsub.f32 1.0, %v106_v60 }
  0xa4   :  { %v907_v9 = vsel %vm95_vm2, %v3893_v6, 0.0  ;;  %v679_v16 = vsel %vm95_vm2, %v3902_v10, 0.0 }
  0xa5   :  { %458 = vadd.xlane.f32.xlu1 %v457_v7  ;;  %908 = vadd.xlane.f32.xlu2 %v907_v9  ;;  %v1021_v24 = vsel %vm95_vm2, %v3917_v20, 0.0  ;;  %v108_v62 = vmul.f32 %v3432_v59, %v107_v61 }
  0xa6   :  { %230 = vadd.xlane.f32.xlu0 %v229_v8 }
  0xa7   :  { %v109_v63 = vadd.f32 %v3432_v59, %v108_v62 }
  0xa8   :  { %v784_v13 = vpop.f32.mrf.mxu2 }
  0xa9   :  { %v673_v15 = vpop.f32.mrf.mxu1  ;;  %v901_v19 = vpop.f32.mrf.mxu3  ;;  %v3923_v22 = vadd.f32 %v3829_v28, %v784_v13  ;;  %v3966_v2 = vsel %vm110_vm3, %v3432_v59, %v109_v63 }
  0xaa   :  { %v3920_v21 = vadd.f32 %v3829_v28, %v901_v19  ;;  %v1015_v23 = vpop.f32.mrf.mxu0  ;;  %v3932_v30 = vadd.f32 %v3829_v28, %v673_v15 }
  0xab   :  { %v793_v27 = vsel %vm95_vm2, %v3923_v22, 0.0  ;;  %v3947_v43 = vadd.f32 %v3829_v28, %v1015_v23 }
  0xac   :  { %v910_v25 = vsel %vm95_vm2, %v3920_v21, 0.0  ;;  %v682_v35 = vsel %vm95_vm2, %v3932_v30, 0.0 }
  0xad   :  { %680 = vadd.xlane.f32.xlu1 %v679_v16  ;;  %344 = vadd.xlane.f32.xlu2 %v343_v17  ;;  %v1024_v48 = vsel %vm95_vm2, %v3947_v43, 0.0 }
  0xae   :  { %572 = vadd.xlane.f32.xlu0 %v571_v18 }
  0xb0   :  { %v787_v26 = vpop.f32.mrf.mxu2 }
  0xb1   :  { %v676_v29 = vpop.f32.mrf.mxu1  ;;  %v3938_v34 = vadd.f32 %v3829_v28, %v787_v26  ;;  %v904_v52 = vpop.f32.mrf.mxu3 }
  0xb2   :  { %v3935_v33 = vadd.f32 %v3829_v28, %v676_v29  ;;  %v1018_v41 = vpop.f32.mrf.mxu0  ;;  %v3962_v53 = vadd.f32 %v3829_v28, %v904_v52 }
  0xb3   :  { %v796_v38 = vsel %vm95_vm2, %v3938_v34, 0.0  ;;  %v3950_v44 = vadd.f32 %v3829_v28, %v1018_v41 }
  0xb4   :  { %v685_v37 = vsel %vm95_vm2, %v3935_v33, 0.0  ;;  %v913_v54 = vsel %vm95_vm2, %v3962_v53, 0.0 }
  0xb5   :  { %1022 = vadd.xlane.f32.xlu1 %v1021_v24  ;;  %911 = vadd.xlane.f32.xlu2 %v910_v25  ;;  %v1027_v49 = vsel %vm95_vm2, %v3950_v44, 0.0 }
  0xb6   :  { %794 = vadd.xlane.f32.xlu0 %v793_v27 }
  0xb8   :  { %v790_v42 = vpop.f32.mrf.mxu2 }
  0xb9   :  { %v3953_v46 = vadd.f32 %v3829_v28, %v790_v42 }
  0xbb   :  { %v799_v51 = vsel %vm95_vm2, %v3953_v46, 0.0 }
  0xbd   :  { %683 = vadd.xlane.f32.xlu1 %v682_v35  ;;  %686 = vadd.xlane.f32.xlu2 %v685_v37 }
  0xbe   :  { %797 = vadd.xlane.f32.xlu0 %v796_v38 }
  0xc5   :  { %1025 = vadd.xlane.f32.xlu1 %v1024_v48  ;;  %1028 = vadd.xlane.f32.xlu2 %v1027_v49 }
  0xc6   :  { %800 = vadd.xlane.f32.xlu0 %v799_v51 }
  0xcd   :  { %914 = vadd.xlane.f32.xlu1 %v913_v54 }
  0xf8   :  { %v101_v3 = vpop.xlane.xlu2 %100  ;;  %v98_v4 = vpop.xlane.xlu0 %97 }
  0xf9   :  { %v113_v5 = vmul.f32 %v3966_v2, %v101_v3  ;;  %v112_v28 = vmul.f32 %v3966_v2, %v98_v4 }
  0xfb   :  { %v3971_v7 = vsub.f32 %v3835_v32, %v113_v5  ;;  %v3974_v8 = vsub.f32 %v3832_v31, %v112_v28 }
  0xfd   :  { %v119_v9 = vmul.f32 %v3971_v7, %v3971_v7  ;;  %v118_v13 = vmul.f32 %v3974_v8, %v3974_v8 }
  0xff   :  { %v124_v14 = vsel %vm95_vm2, %v119_v9, 0.0  ;;  %v121_v15 = vsel %vm95_vm2, %v118_v13, 0.0 }
 0x100   :  { %v453_v16 = vpop.xlane.xlu1 %452  ;;  %v104_v17 = vpop.xlane.xlu2 %103  ;;  %125 = vadd.xlane.f32.xlu2 %v124_v14  ;;  %122 = vadd.xlane.f32.xlu0 %v121_v15 }
 0x101   :  { %v460_v32 = vmul.f32 %v453_v16, %v3966_v2  ;;  %v114_v18 = vmul.f32 %v3966_v2, %v104_v17  ;;  %v225_v31 = vpop.xlane.xlu0 %224 }
 0x102   :  { %v232_v19 = vmul.f32 %v225_v31, %v3966_v2 }
 0x103   :  { %v3986_v23 = vsub.f32 %v3845_v39, %v460_v32  ;;  %v3989_v24 = vsub.f32 %v3842_v36, %v114_v18 }
 0x104   :  { %v3992_v25 = vsub.f32 %v3848_v40, %v232_v19 }
 0x105   :  { %v120_v26 = vmul.f32 %v3989_v24, %v3989_v24  ;;  %v466_v27 = vmul.f32 %v3986_v23, %v3986_v23 }
 0x106   :  { %v238_v29 = vmul.f32 %v3992_v25, %v3992_v25 }
 0x107   :  { %v127_v35 = vsel %vm95_vm2, %v120_v26, 0.0  ;;  %v469_v39 = vsel %vm95_vm2, %v466_v27, 0.0 }
 0x108   :  { %v339_v37 = vpop.xlane.xlu1 %338  ;;  %128 = vadd.xlane.f32.xlu2 %v127_v35  ;;  %v567_v36 = vpop.xlane.xlu2 %566  ;;  %470 = vadd.xlane.f32.xlu0 %v469_v39  ;;  %v241_v40 = vsel %vm95_vm2, %v238_v29, 0.0 }
 0x109   :  { %v346_v38 = vmul.f32 %v339_v37, %v3966_v2  ;;  %v574_v41 = vmul.f32 %v567_v36, %v3966_v2  ;;  %242 = vadd.xlane.f32.xlu1 %v241_v40  ;;  %v228_v42 = vpop.xlane.xlu0 %227 }
 0x10a   :  { %v233_v48 = vmul.f32 %v228_v42, %v3966_v2 }
 0x10b   :  { %v4007_v49 = vsub.f32 %v3860_v47, %v346_v38  ;;  %v4010_v51 = vsub.f32 %v3857_v45, %v574_v41 }
 0x10c   :  { %v4013_v52 = vsub.f32 %v3863_v50, %v233_v48 }
 0x10d   :  { %v352_v54 = vmul.f32 %v4007_v49, %v4007_v49  ;;  %v580_v57 = vmul.f32 %v4010_v51, %v4010_v51 }
 0x10e   :  { %v239_v59 = vmul.f32 %v4013_v52, %v4013_v52 }
 0x10f   :  { %v355_v60 = vsel %vm95_vm2, %v352_v54, 0.0  ;;  %v583_v47 = vsel %vm95_vm2, %v580_v57, 0.0 }
 0x110   :  { %v456_v61 = vpop.xlane.xlu1 %455  ;;  %356 = vadd.xlane.f32.xlu2 %v355_v60  ;;  %v342_v45 = vpop.xlane.xlu2 %341  ;;  %v244_v62 = vsel %vm95_vm2, %v239_v59, 0.0 }
 0x111   :  { %v461_v50 = vmul.f32 %v456_v61, %v3966_v2  ;;  %v347_v63 = vmul.f32 %v342_v45, %v3966_v2  ;;  %584 = vadd.xlane.f32.xlu1 %v583_v47  ;;  %245 = vadd.xlane.f32.xlu0 %v244_v62  ;;  %v570_v3 = vpop.xlane.xlu0 %569 }
 0x112   :  { %v575_v4 = vmul.f32 %v570_v3, %v3966_v2 }
 0x113   :  { %v4028_v5 = vsub.f32 %v3872_v55, %v461_v50  ;;  %v4031_v28 = vsub.f32 %v3878_v58, %v347_v63 }
 0x114   :  { %v4034_v9 = vsub.f32 %v3875_v56, %v575_v4 }
 0x115   :  { %v353_v13 = vmul.f32 %v4031_v28, %v4031_v28  ;;  %v467_v14 = vmul.f32 %v4028_v5, %v4028_v5 }
 0x116   :  { %v581_v15 = vmul.f32 %v4034_v9, %v4034_v9 }
 0x117   :  { %v358_v16 = vsel %vm95_vm2, %v353_v13, 0.0  ;;  %v472_v58 = vsel %vm95_vm2, %v467_v14, 0.0 }
 0x118   :  { %v459_v17 = vpop.xlane.xlu1 %458  ;;  %359 = vadd.xlane.f32.xlu2 %v358_v16  ;;  %v909_v55 = vpop.xlane.xlu2 %908  ;;  %v586_v32 = vsel %vm95_vm2, %v581_v15, 0.0 }
 0x119   :  { %v462_v56 = vmul.f32 %v459_v17, %v3966_v2  ;;  %v916_v18 = vmul.f32 %v909_v55, %v3966_v2  ;;  %473 = vadd.xlane.f32.xlu1 %v472_v58  ;;  %587 = vadd.xlane.f32.xlu0 %v586_v32  ;;  %v231_v31 = vpop.xlane.xlu0 %230 }
 0x11a   :  { %v234_v19 = vmul.f32 %v231_v31, %v3966_v2 }
 0x11b   :  { %v4049_v26 = vsub.f32 %v3887_v0, %v462_v56  ;;  %v4052_v27 = vsub.f32 %v3893_v6, %v916_v18 }
 0x11c   :  { %v4055_v29 = vsub.f32 %v3890_v1, %v234_v19 }
 0x11d   :  { %v922_v35 = vmul.f32 %v4052_v27, %v4052_v27  ;;  %v468_v39 = vmul.f32 %v4049_v26, %v4049_v26 }
 0x11e   :  { %v240_v37 = vmul.f32 %v4055_v29, %v4055_v29 }
 0x11f   :  { %v925_v36 = vsel %vm95_vm2, %v922_v35, 0.0  ;;  %v475_v6 = vsel %vm95_vm2, %v468_v39, 0.0 }
 0x120   :  { %v681_v40 = vpop.xlane.xlu1 %680  ;;  %926 = vadd.xlane.f32.xlu2 %v925_v36  ;;  %v345_v0 = vpop.xlane.xlu2 %344  ;;  %v247_v38 = vsel %vm95_vm2, %v240_v37, 0.0 }
 0x121   :  { %v688_v1 = vmul.f32 %v681_v40, %v3966_v2  ;;  %v348_v41 = vmul.f32 %v345_v0, %v3966_v2  ;;  %476 = vadd.xlane.f32.xlu1 %v475_v6  ;;  %248 = vadd.xlane.f32.xlu0 %v247_v38  ;;  %v573_v42 = vpop.xlane.xlu0 %572 }
 0x122   :  { %v576_v48 = vmul.f32 %v573_v42, %v3966_v2 }
 0x123   :  { %v4070_v54 = vsub.f32 %v3902_v10, %v688_v1  ;;  %v4073_v57 = vsub.f32 %v3905_v11, %v348_v41 }
 0x124   :  { %v4076_v59 = vsub.f32 %v3908_v12, %v576_v48 }
 0x125   :  { %v354_v60 = vmul.f32 %v4073_v57, %v4073_v57  ;;  %v694_v47 = vmul.f32 %v4070_v54, %v4070_v54 }
 0x126   :  { %v582_v61 = vmul.f32 %v4076_v59, %v4076_v59 }
 0x127   :  { %v361_v45 = vsel %vm95_vm2, %v354_v60, 0.0  ;;  %v697_v11 = vsel %vm95_vm2, %v694_v47, 0.0 }
 0x128   :  { %v1023_v62 = vpop.xlane.xlu1 %1022  ;;  %362 = vadd.xlane.f32.xlu2 %v361_v45  ;;  %v912_v10 = vpop.xlane.xlu2 %911  ;;  %v589_v50 = vsel %vm95_vm2, %v582_v61, 0.0 }
 0x129   :  { %v1030_v12 = vmul.f32 %v1023_v62, %v3966_v2  ;;  %v917_v63 = vmul.f32 %v912_v10, %v3966_v2  ;;  %698 = vadd.xlane.f32.xlu1 %v697_v11  ;;  %590 = vadd.xlane.f32.xlu0 %v589_v50  ;;  %v795_v3 = vpop.xlane.xlu0 %794 }
 0x12a   :  { %v802_v4 = vmul.f32 %v795_v3, %v3966_v2 }
 0x12b   :  { %v4091_v13 = vsub.f32 %v3917_v20, %v1030_v12  ;;  %v4094_v14 = vsub.f32 %v3920_v21, %v917_v63 }
 0x12c   :  { %v4097_v15 = vsub.f32 %v3923_v22, %v802_v4  ;;  %v4160_v4 = vld [vmem:[%s7120_s5 + $0x18] sm:$0xff] }
 0x12d   :  { %v923_v16 = vmul.f32 %v4094_v14, %v4094_v14  ;;  %v1036_v17 = vmul.f32 %v4091_v13, %v4091_v13  ;;  %1190 = vmatpush.msrb.mxu2 %v4160_v4  ;;  %1306 = vmatpush.msra.mxu3 %v4160_v4 }
 0x12e   :  { %v808_v55 = vmul.f32 %v4097_v15, %v4097_v15  ;;  %1416 = vmatpush.msrb.mxu0 %v4160_v4 }
 0x12f   :  { %v928_v58 = vsel %vm95_vm2, %v923_v16, 0.0  ;;  %v1039_v21 = vsel %vm95_vm2, %v1036_v17, 0.0 }
 0x130   :  { %v684_v32 = vpop.xlane.xlu1 %683  ;;  %929 = vadd.xlane.f32.xlu2 %v928_v58  ;;  %v687_v20 = vpop.xlane.xlu2 %686  ;;  %v811_v56 = vsel %vm95_vm2, %v808_v55, 0.0  ;;  %v4170_v58 = vld [vmem:[%s7120_s5 + $0x10] sm:$0xff] }
 0x131   :  { %v689_v22 = vmul.f32 %v684_v32, %v3966_v2  ;;  %v690_v18 = vmul.f32 %v687_v20, %v3966_v2  ;;  %1040 = vadd.xlane.f32.xlu1 %v1039_v21  ;;  %812 = vadd.xlane.f32.xlu0 %v811_v56  ;;  %v798_v31 = vpop.xlane.xlu0 %797  ;;  %v4177_v20 = vld [vmem:[%s7120_s5 + $0x8] sm:$0xff]  ;;  %v4187_v56 = vld [vmem:[%s7120_s5] sm:$0xff] }
 0x132   :  { %v803_v19 = vmul.f32 %v798_v31, %v3966_v2  ;;  %1191 = vmatpush.msrb.mxu2 %v4170_v58  ;;  %1307 = vmatpush.msra.mxu3 %v4170_v58 }
 0x133   :  { %v4112_v35 = vsub.f32 %v3932_v30, %v689_v22  ;;  %v4115_v39 = vsub.f32 %v3935_v33, %v690_v18  ;;  %1417 = vmatpush.msrb.mxu0 %v4170_v58 }
 0x134   :  { %v4118_v37 = vsub.f32 %v3938_v34, %v803_v19  ;;  %1192 = vmatpush.msrb.mxu2 %v4177_v20  ;;  %1308 = vmatpush.msra.mxu3 %v4177_v20 }
 0x135   :  { %v696_v36 = vmul.f32 %v4115_v39, %v4115_v39  ;;  %v695_v40 = vmul.f32 %v4112_v35, %v4112_v35  ;;  %1418 = vmatpush.msrb.mxu0 %v4177_v20 }
 0x136   :  { %v809_v0 = vmul.f32 %v4118_v37, %v4118_v37  ;;  %1193 = vmatpush.msrb.mxu2 %v4187_v56  ;;  %1309 = vmatpush.msra.mxu3 %v4187_v56 }
 0x137   :  { %v703_v6 = vsel %vm95_vm2, %v696_v36, 0.0  ;;  %v700_v33 = vsel %vm95_vm2, %v695_v40, 0.0  ;;  %1419 = vmatpush.msrb.mxu0 %v4187_v56 }
 0x138   :  { %v1026_v38 = vpop.xlane.xlu1 %1025  ;;  %704 = vadd.xlane.f32.xlu2 %v703_v6  ;;  %v1029_v30 = vpop.xlane.xlu2 %1028  ;;  %v814_v1 = vsel %vm95_vm2, %v809_v0, 0.0  ;;  %1636 = vmatpush.msra.mxu2 %v4160_v4 }
 0x139   :  { %v1031_v34 = vmul.f32 %v1026_v38, %v3966_v2  ;;  %v1032_v41 = vmul.f32 %v1029_v30, %v3966_v2  ;;  %701 = vadd.xlane.f32.xlu1 %v700_v33  ;;  %815 = vadd.xlane.f32.xlu0 %v814_v1  ;;  %v801_v42 = vpop.xlane.xlu0 %800 }
 0x13a   :  { %v804_v48 = vmul.f32 %v801_v42, %v3966_v2  ;;  %1746 = vmatpush.msrb.mxu3 %v4160_v4  ;;  %1856 = vmatpush.msra.mxu0 %v4160_v4 }
 0x13b   :  { %v4133_v60 = vsub.f32 %v3947_v43, %v1031_v34  ;;  %v4136_v47 = vsub.f32 %v3950_v44, %v1032_v41  ;;  %1637 = vmatpush.msra.mxu2 %v4170_v58 }
 0x13c   :  { %v4139_v61 = vsub.f32 %v3953_v46, %v804_v48  ;;  %1747 = vmatpush.msrb.mxu3 %v4170_v58  ;;  %1857 = vmatpush.msra.mxu0 %v4170_v58 }
 0x13d   :  { %7143 = vst [vmem:[#allocation5_spill] sm:$0xff] %v4136_v47  ;;  %v1038_v45 = vmul.f32 %v4136_v47, %v4136_v47  ;;  %v1037_v62 = vmul.f32 %v4133_v60, %v4133_v60  ;;  %1638 = vmatpush.msra.mxu2 %v4177_v20 }
 0x13e   :  { %7144 = vst [vmem:[#allocation6_spill] sm:$0xff] %v4139_v61  ;;  %v810_v10 = vmul.f32 %v4139_v61, %v4139_v61  ;;  %1748 = vmatpush.msrb.mxu3 %v4177_v20  ;;  %1858 = vmatpush.msra.mxu0 %v4177_v20 }
 0x13f   :  { %v1045_v11 = vsel %vm95_vm2, %v1038_v45, 0.0  ;;  %v1042_v43 = vsel %vm95_vm2, %v1037_v62, 0.0  ;;  %1639 = vmatpush.msra.mxu2 %v4187_v56 }
 0x140   :  { %v915_v50 = vpop.xlane.xlu1 %914  ;;  %1046 = vadd.xlane.f32.xlu2 %v1045_v11  ;;  %v817_v44 = vsel %vm95_vm2, %v810_v10, 0.0  ;;  %1749 = vmatpush.msrb.mxu3 %v4187_v56 }
 0x141   :  { %v918_v46 = vmul.f32 %v915_v50, %v3966_v2  ;;  %1043 = vadd.xlane.f32.xlu1 %v1042_v43  ;;  %818 = vadd.xlane.f32.xlu0 %v817_v44 }
 0x142   :  { %1859 = vmatpush.msra.mxu0 %v4187_v56 }
 0x143   :  { %v4152_v12 = vsub.f32 %v3962_v53, %v918_v46 }
 0x145   :  { %7145 = vst [vmem:[#allocation7_spill] sm:$0xff] %v4152_v12  ;;  %v924_v63 = vmul.f32 %v4152_v12, %v4152_v12 }
 0x147   :  { %v931_v3 = vsel %vm95_vm2, %v924_v63, 0.0 }
 0x149   :  { %932 = vadd.xlane.f32.xlu1 %v931_v3 }
 0x173   :  { %v126_v16 = vpop.xlane.xlu2 %125  ;;  %v123_v17 = vpop.xlane.xlu0 %122 }
 0x174   :  { %v131_v53 = vmul.f32 %v126_v16, %v3966_v2  ;;  %v130_v55 = vmul.f32 %v123_v17, %v3966_v2 }
 0x176   :  { %v133_v32 = vadd.f32 1e-05, %v130_v55  ;;  %v4182_v21 = vadd.f32 1e-05, %v131_v53 }
 0x178   :  { %3433 = vrsqrt.f32 %v133_v32  ;;  %vm142_vm5 = vweird.f32 %v133_v32  ;;  %vm152_vm13 = vweird.f32 %v4182_v21 }
 0x179   :  { %3435 = vrsqrt.f32 %v4182_v21 }
 0x17b   :  { %v129_v22 = vpop.xlane.xlu2 %128  ;;  %v471_v18 = vpop.xlane.xlu0 %470 }
 0x17c   :  { %v132_v31 = vmul.f32 %v129_v22, %v3966_v2  ;;  %v243_v19 = vpop.xlane.xlu1 %242  ;;  %v478_v36 = vmul.f32 %v471_v18, %v3966_v2 }
 0x17d   :  { %v250_v40 = vmul.f32 %v243_v19, %v3966_v2 }
 0x17e   :  { %v4203_v0 = vadd.f32 1e-05, %v132_v31  ;;  %v4205_v6 = vadd.f32 1e-05, %v478_v36  ;;  %v3434_v38 = vpop.eup %3433 }
 0x17f   :  { %v4208_v30 = vadd.f32 1e-05, %v250_v40  ;;  %v137_v33 = vmul.f32 %v3434_v38, %v133_v32  ;;  %v4217_v1 = vpop.eup %3435  ;;  %vm143_vm4 = vweird.f32 %v3434_v38  ;;  %v4249_v40 = vld [vmem:[%s7118_s3] ss:$0 sm:$0xff] }
 0x180   :  { %3437 = vrsqrt.f32 %v4203_v0  ;;  %v147_v62 = vmul.f32 %v4217_v1, %v4182_v21  ;;  %vm144_vm6 = vmor %vm142_vm5, %vm143_vm4  ;;  %vm153_vm8 = vweird.f32 %v4217_v1  ;;  %vm490_vm12 = vweird.f32 %v4205_v6 }
 0x181   :  { %3439 = vrsqrt.f32 %v4208_v30  ;;  %v138_v34 = vmul.f32 %v3434_v38, %v137_v33  ;;  %vm262_vm9 = vweird.f32 %v4208_v30  ;;  %vm4319_vm15 = vmor %vm152_vm13, %vm153_vm8  ;;  %vm162_vm0 = vweird.f32 %v4203_v0 }
 0x182   :  { %3441 = vrsqrt.f32 %v4205_v6  ;;  %v148_v55 = vmul.f32 %v4217_v1, %v147_v62 }
 0x183   :  { %v357_v41 = vpop.xlane.xlu2 %356  ;;  %v139_v42 = vmul.f32 0.5, %v138_v34 }
 0x184   :  { %v364_v48 = vmul.f32 %v357_v41, %v3966_v2  ;;  %v585_v45 = vpop.xlane.xlu1 %584  ;;  %v246_v11 = vpop.xlane.xlu0 %245 }
 0x185   :  { %v592_v10 = vmul.f32 %v585_v45, %v3966_v2  ;;  %v140_v43 = vsub.f32 1.5, %v139_v42  ;;  %v251_v53 = vmul.f32 %v246_v11, %v3966_v2 }
 0x186   :  { %v4224_v50 = vpop.eup %3437  ;;  %v4226_v44 = vadd.f32 1e-05, %v364_v48  ;;  %v149_v48 = vmul.f32 0.5, %v148_v55 }
 0x187   :  { %v4228_v46 = vpop.eup %3439  ;;  %v4230_v63 = vadd.f32 1e-05, %v592_v10  ;;  %v141_v16 = vmul.f32 %v3434_v38, %v140_v43  ;;  %v157_v32 = vmul.f32 %v4224_v50, %v4203_v0  ;;  %v4252_v41 = vadd.f32 1e-05, %v251_v53 }
 0x188   :  { %v4232_v3 = vpop.eup %3441  ;;  %v257_v17 = vmul.f32 %v4228_v46, %v4208_v30  ;;  %3443 = vrsqrt.f32 %v4226_v44  ;;  %vm263_vm7 = vweird.f32 %v4228_v46  ;;  %vm163_vm1 = vweird.f32 %v4224_v50 }
 0x189   :  { %v485_v22 = vmul.f32 %v4232_v3, %v4205_v6  ;;  %v145_v18 = vsel %vm144_vm6, %v3434_v38, %v141_v16  ;;  %3445 = vrsqrt.f32 %v4230_v63  ;;  %v158_v11 = vmul.f32 %v4224_v50, %v157_v32  ;;  %vm4292_vm11 = vmor %vm262_vm9, %vm263_vm7 }
 0x18a   :  { %v258_v31 = vmul.f32 %v4228_v46, %v257_v17  ;;  %v166_v33 = vmul.f32 %v145_v18, %v3974_v8  ;;  %3447 = vrsqrt.f32 %v4252_v41  ;;  %v4263_v8 = vld [vmem:[%s7119_s4] ss:$0 sm:$0xff]  ;;  %v150_v32 = vsub.f32 1.5, %v149_v48  ;;  %vm4359_vm6 = vmor %vm162_vm0, %vm163_vm1  ;;  %s3281_s4 = sshll.u32 %s3631_s19, 4  ;;  %s3282_s4 = int_to_ptr.vmem [resolvable:$true] %s3281_s4 }
 0x18b   :  { %v486_v19 = vmul.f32 %v4232_v3, %v485_v22  ;;  %v360_v36 = vpop.xlane.xlu2 %359  ;;  %vm491_vm10 = vweird.f32 %v4232_v3  ;;  %vm376_vm3 = vweird.f32 %v4226_v44  ;;  %vm604_vm5 = vweird.f32 %v4230_v63 }
 0x18c   :  { %v259_v34 = vmul.f32 0.5, %v258_v31  ;;  %v365_v38 = vmul.f32 %v360_v36, %v3966_v2  ;;  %v474_v42 = vpop.xlane.xlu1 %473  ;;  %v172_v53 = vmul.f32 %v4249_v40, %v166_v33  ;;  %v588_v36 = vpop.xlane.xlu0 %587  ;;  %vm4309_vm14 = vmor %vm490_vm12, %vm491_vm10  ;;  %vm272_vm8 = vweird.f32 %v4252_v41 }
 0x18d   :  { %v487_v45 = vmul.f32 0.5, %v486_v19  ;;  %v479_v62 = vmul.f32 %v474_v42, %v3966_v2 }
 0x18e   :  { %v4256_v10 = vpop.eup %3443  ;;  %v260_v43 = vsub.f32 1.5, %v259_v34  ;;  %v4270_v22 = vadd.f32 1e-05, %v365_v38  ;;  %v159_v34 = vmul.f32 0.5, %v158_v11 }
 0x18f   :  { %v371_v16 = vmul.f32 %v4256_v10, %v4226_v44  ;;  %v4267_v17 = vpop.eup %3445  ;;  %v488_v55 = vsub.f32 1.5, %v487_v45  ;;  %v4272_v18 = vadd.f32 1e-05, %v479_v62  ;;  %v593_v45 = vmul.f32 %v588_v36, %v3966_v2 }
 0x190   :  { %v599_v19 = vmul.f32 %v4267_v17, %v4230_v63  ;;  %v261_v42 = vmul.f32 %v4228_v46, %v260_v43  ;;  %v4283_v38 = vpop.eup %3447  ;;  %v4289_v62 = vadd.f32 %v4263_v8, %v172_v53  ;;  %v151_v43 = vmul.f32 %v4217_v1, %v150_v32 }
 0x191   :  { %v372_v31 = vmul.f32 %v4256_v10, %v371_v16  ;;  %3449 = vrsqrt.f32 %v4272_v18  ;;  %v489_v48 = vmul.f32 %v4232_v3, %v488_v55  ;;  %v267_v55 = vmul.f32 %v4283_v38, %v4252_v41 }
 0x192   :  { %3451 = vrsqrt.f32 %v4270_v22  ;;  %v600_v30 = vmul.f32 %v4267_v17, %v599_v19  ;;  %v265_v53 = vsel %vm4292_vm11, %v4228_v46, %v261_v42  ;;  %v4303_v36 = vadd.f32 1e-05, %v593_v45 }
 0x193   :  { %v373_v33 = vmul.f32 0.5, %v372_v31  ;;  %v927_v11 = vpop.xlane.xlu2 %926  ;;  %v160_v31 = vsub.f32 1.5, %v159_v34  ;;  %v7131_v32 = vmax.f32 %v4289_v62, 0.0  ;;  %v268_v34 = vmul.f32 %v4283_v38, %v267_v55 }
 0x194   :  { %v477_v12 = vpop.xlane.xlu1 %476  ;;  %v934_v47 = vmul.f32 %v927_v11, %v3966_v2  ;;  %v493_v21 = vsel %vm4309_vm14, %v4232_v3, %v489_v48  ;;  %v155_v42 = vsel %vm4319_vm15, %v4217_v1, %v151_v43  ;;  %v601_v45 = vmul.f32 0.5, %v600_v30  ;;  %v249_v30 = vpop.xlane.xlu0 %248 }
 0x195   :  { %v374_v19 = vsub.f32 1.5, %v373_v33  ;;  %3358 = vmatmul.msk.f32.vlgmr.msrb.gmra.mxu2 %vm95_vm2, %v7131_v32  ;;  %v286_v33 = vmul.f32 %v265_v53, %v3992_v25  ;;  %v4340_v55 = vmul.f32 %v4224_v50, %v160_v31  ;;  %v269_v3 = vmul.f32 0.5, %v268_v34 }
 0x196   :  { %2076 = vmatpush.msrb.mxu2 %v4160_v4  ;;  %3453 = vrsqrt.f32 %v4303_v36  ;;  %v514_v1 = vmul.f32 %v493_v21, %v3986_v23  ;;  %vm377_vm4 = vweird.f32 %v4256_v10  ;;  %v4348_v43 = vadd.f32 1e-05, %v934_v47 }
 0x197   :  { %v4315_v16 = vpop.eup %3449  ;;  %v375_v25 = vmul.f32 %v4256_v10, %v374_v19  ;;  %v480_v53 = vmul.f32 %v477_v12, %v3966_v2  ;;  %v167_v6 = vmul.f32 %v155_v42, %v3971_v7  ;;  %v289_v47 = vmul.f32 %v4249_v40, %v286_v33  ;;  %vm4370_vm7 = vmor %vm376_vm3, %vm377_vm4 }
 0x198   :  { %v4337_v11 = vpop.eup %3451  ;;  %v495_v48 = vmul.f32 %v4315_v16, %v4272_v18  ;;  %2077 = vmatpush.msrb.mxu2 %v4170_v58  ;;  %v602_v19 = vsub.f32 1.5, %v601_v45  ;;  %3455 = vrsqrt.f32 %v4348_v43  ;;  %v270_v12 = vsub.f32 1.5, %v269_v3 }
 0x199   :  { %v381_v34 = vmul.f32 %v4337_v11, %v4270_v22  ;;  %v4375_v0 = vadd.f32 1e-05, %v480_v53  ;;  %v252_v46 = vmul.f32 %v249_v30, %v3966_v2  ;;  %v165_v21 = vsel %vm4359_vm6, %v4224_v50, %v4340_v55 }
 0x19a   :  { %v496_v31 = vmul.f32 %v4315_v16, %v495_v48  ;;  %2078 = vmatpush.msrb.mxu2 %v4177_v20  ;;  %v517_v42 = vmul.f32 %v4249_v40, %v514_v1  ;;  %v379_v44 = vsel %vm4370_vm7, %v4256_v10, %v375_v25  ;;  %vm605_vm9 = vweird.f32 %v4267_v17 }
 0x19b   :  { %v363_v33 = vpop.xlane.xlu2 %362  ;;  %vm273_vm10 = vweird.f32 %v4283_v38  ;;  %3457 = vrsqrt.f32 %v4375_v0  ;;  %v4392_v48 = vadd.f32 1e-05, %v252_v46  ;;  %v603_v55 = vmul.f32 %v4267_v17, %v602_v19  ;;  %vm4425_vm12 = vmor %vm604_vm5, %vm605_vm9 }
 0x19c   :  { %2079 = vmatpush.msrb.mxu2 %v4187_v56  ;;  %v4388_v45 = vpop.eup %3453  ;;  %v497_v3 = vmul.f32 0.5, %v496_v31  ;;  %v699_v50 = vpop.xlane.xlu1 %698  ;;  %v382_v1 = vmul.f32 %v4337_v11, %v381_v34  ;;  %v173_v10 = vmul.f32 %v4249_v40, %v167_v6  ;;  %v4398_v25 = vadd.f32 %v4263_v8, %v289_v47  ;;  %vm4444_vm15 = vmor %vm272_vm8, %vm273_vm10 }
 0x19d   :  { %v400_v30 = vmul.f32 %v379_v44, %v4007_v49  ;;  %v271_v53 = vmul.f32 %v4283_v38, %v270_v12  ;;  %vm500_vm11 = vweird.f32 %v4272_v18  ;;  %3459 = vrsqrt.f32 %v4392_v48 }
 0x19e   :  { %v366_v31 = vmul.f32 %v363_v33, %v3966_v2  ;;  %v4405_v23 = vpop.eup %3455  ;;  %v609_v19 = vmul.f32 %v4388_v45, %v4303_v36  ;;  %v4410_v6 = vadd.f32 %v4263_v8, %v173_v10  ;;  %v7132_v47 = vmax.f32 %v4398_v25, 0.0 }
 0x19f   :  { %v706_v49 = vmul.f32 %v699_v50, %v3966_v2  ;;  %v4415_v34 = vadd.f32 %v4263_v8, %v517_v42  ;;  %v498_v7 = vsub.f32 1.5, %v497_v3  ;;  %v941_v12 = vmul.f32 %v4405_v23, %v4348_v43  ;;  %v591_v3 = vpop.xlane.xlu0 %590 }
 0x1a0   :  { %v4419_v46 = vadd.f32 1e-05, %v366_v31  ;;  %v383_v33 = vmul.f32 0.5, %v382_v1  ;;  %vm387_vm13 = vweird.f32 %v4337_v11  ;;  %vm501_vm14 = vweird.f32 %v4315_v16  ;;  %3361 = vmatmul.msk.f32.vlgmr.msra.gmra.mxu3 %vm95_vm2, %v7132_v47 }
 0x1a1   :  { %v7134_v42 = vmax.f32 %v4410_v6, 0.0  ;;  %v4435_v50 = vpop.eup %3457  ;;  %v607_v63 = vsel %vm4425_vm12, %v4267_v17, %v603_v55  ;;  %v942_v10 = vmul.f32 %v4405_v23, %v941_v12  ;;  %v4450_v31 = vadd.f32 1e-05, %v706_v49  ;;  %vm4481_vm1 = vmor %vm500_vm11, %vm501_vm14 }
 0x1a2   :  { %3461 = vrsqrt.f32 %v4419_v46  ;;  %v403_v32 = vmul.f32 %v4249_v40, %v400_v30  ;;  %v275_v17 = vsel %vm4444_vm15, %v4283_v38, %v271_v53  ;;  %vm386_vm0 = vweird.f32 %v4270_v22 }
 0x1a3   :  { %v610_v41 = vmul.f32 %v4388_v45, %v609_v19  ;;  %v505_v55 = vmul.f32 %v4435_v50, %v4375_v0  ;;  %3359 = vmatmul.msk.f32.gmra.mxu2 %vm95_vm2, %v7134_v42  ;;  %v4463_v12 = vpop.eup %3459  ;;  %v499_v49 = vmul.f32 %v4315_v16, %v498_v7  ;;  %v943_v30 = vmul.f32 0.5, %v942_v10  ;;  %v930_v18 = vpop.xlane.xlu2 %929  ;;  %vm4515_vm5 = vmor %vm386_vm0, %vm387_vm13 }
 0x1a4   :  { %3463 = vrsqrt.f32 %v4450_v31  ;;  %v594_v38 = vmul.f32 %v591_v3, %v3966_v2  ;;  %v384_v44 = vsub.f32 1.5, %v383_v33  ;;  %v277_v1 = vmul.f32 %v4463_v12, %v4392_v48 }
 0x1a5   :  { %v506_v19 = vmul.f32 %v4435_v50, %v505_v55  ;;  %v944_v47 = vsub.f32 1.5, %v943_v30  ;;  %v168_v42 = vmul.f32 %v165_v21, %v3989_v24  ;;  %v287_v7 = vmul.f32 %v275_v17, %v4013_v52 }
 0x1a6   :  { %v4472_v61 = vadd.f32 1e-05, %v594_v38  ;;  %v628_v10 = vmul.f32 %v607_v63, %v4010_v51  ;;  %v278_v55 = vmul.f32 %v4463_v12, %v277_v1  ;;  %v4487_v30 = vadd.f32 %v4263_v8, %v403_v32  ;;  %v1041_v1 = vpop.xlane.xlu1 %1040 }
 0x1a7   :  { %v507_v3 = vmul.f32 0.5, %v506_v19  ;;  %v503_v24 = vsel %vm4481_vm1, %v4315_v16, %v499_v49  ;;  %v611_v51 = vmul.f32 0.5, %v610_v41  ;;  %v174_v52 = vmul.f32 %v4249_v40, %v168_v42  ;;  %v813_v33 = vpop.xlane.xlu0 %812 }
 0x1a8   :  { %v4489_v38 = vpop.eup %3461  ;;  %3465 = vrsqrt.f32 %v4472_v61  ;;  %v385_v21 = vmul.f32 %v4337_v11, %v384_v44  ;;  %v945_v63 = vmul.f32 %v4405_v23, %v944_v47  ;;  %vm947_vm3 = vweird.f32 %v4405_v23 }
 0x1a9   :  { %v279_v32 = vmul.f32 0.5, %v278_v55  ;;  %v391_v19 = vmul.f32 %v4489_v38, %v4419_v46  ;;  %v4504_v16 = vadd.f32 %v4263_v8, %v174_v52  ;;  %v290_v41 = vmul.f32 %v4249_v40, %v287_v7 }
 0x1aa   :  { %v4499_v17 = vpop.eup %3463  ;;  %v7136_v42 = vmax.f32 %v4487_v30, 0.0  ;;  %v631_v49 = vmul.f32 %v4249_v40, %v628_v10  ;;  %v515_v44 = vmul.f32 %v503_v24, %v4028_v5  ;;  %vm946_vm4 = vweird.f32 %v4348_v43 }
 0x1ab   :  { %v508_v47 = vsub.f32 1.5, %v507_v3  ;;  %v612_v7 = vsub.f32 1.5, %v611_v51  ;;  %v713_v52 = vmul.f32 %v4499_v17, %v4450_v31  ;;  %v7135_v10 = vmax.f32 %v4504_v16, 0.0  ;;  %vm4534_vm7 = vmor %vm946_vm4, %vm947_vm3 }
 0x1ac   :  { %v4523_v5 = vadd.f32 %v4263_v8, %v290_v41  ;;  %3364 = vmatmul.msk.f32.vlgmr.msrb.gmra.mxu0 %vm95_vm2, %v7136_v42  ;;  %v389_v22 = vsel %vm4515_vm5, %v4337_v11, %v385_v21  ;;  %vm615_vm6 = vweird.f32 %v4388_v45  ;;  %vm510_vm8 = vweird.f32 %v4375_v0 }
 0x1ad   :  { %v280_v3 = vsub.f32 1.5, %v279_v32  ;;  %v935_v24 = vmul.f32 %v930_v18, %v3966_v2  ;;  %v949_v41 = vsel %vm4534_vm7, %v4405_v23, %v945_v63  ;;  %v392_v11 = vmul.f32 %v4489_v38, %v391_v19  ;;  %3360 = vmatmul.msk.f32.gmra.mxu2 %vm95_vm2, %v7135_v10  ;;  %v1127_v63 = vld [vmem:[%s7120_s5 + $0x38] sm:$0xff] }
 0x1ae   :  { %v4540_v51 = vpop.eup %3465  ;;  %v714_v21 = vmul.f32 %v4499_v17, %v713_v52  ;;  %v296_v55 = vmax.f32 %v4523_v5, 0.0  ;;  %vm614_vm9 = vweird.f32 %v4303_v36  ;;  %v509_v18 = vmul.f32 %v4435_v50, %v508_v47  ;;  %1155 = vmatpush.msrb.mxu1 %v1127_v63 }
 0x1af   :  { %vm511_vm10 = vweird.f32 %v4435_v50  ;;  %vm282_vm11 = vweird.f32 %v4392_v48  ;;  %v619_v23 = vmul.f32 %v4540_v51, %v4472_v61  ;;  %v4561_v32 = vmul.f32 %v4249_v40, %v515_v44  ;;  %vm4627_vm3 = vmor %vm614_vm9, %vm615_vm6 }
 0x1b0   :  { %v4564_v19 = vmul.f32 %v4388_v45, %v612_v7  ;;  %v7166_v52 = vmax.f32 %v4398_v25, 0.0  ;;  %v7167_v47 = vmax.f32 %v4289_v62, 0.0  ;;  %v715_v10 = vmul.f32 0.5, %v714_v21  ;;  %3362 = vmatmul.msk.f32.gmra.mxu3 %vm95_vm2, %v296_v55  ;;  %vm4580_vm13 = vmor %vm510_vm8, %vm511_vm10 }
 0x1b1   :  { %v970_v53 = vmul.f32 %v949_v41, %v4052_v27  ;;  %v281_v42 = vmul.f32 %v4463_v12, %v280_v3  ;;  %vm283_vm12 = vweird.f32 %v4463_v12  ;;  %v4576_v44 = vadd.f32 1e-05, %v935_v24  ;;  %v705_v27 = vpop.xlane.xlu2 %704 }
 0x1b2   :  { %v1096_v43 = vmax.f32 %v7167_v47, %v7166_v52  ;;  %v393_v62 = vmul.f32 0.5, %v392_v11  ;;  %v1048_v7 = vmul.f32 %v1041_v1, %v3966_v2  ;;  %v820_v21 = vmul.f32 %v813_v33, %v3966_v2  ;;  %vm4604_vm1 = vmor %vm282_vm11, %vm283_vm12  ;;  %v702_v11 = vpop.xlane.xlu1 %701 }
 0x1b3   :  { %v401_v63 = vmul.f32 %v389_v22, %v4031_v28  ;;  %v513_v3 = vsel %vm4580_vm13, %v4435_v50, %v509_v18  ;;  %v716_v24 = vsub.f32 1.5, %v715_v10  ;;  %vm718_vm14 = vweird.f32 %v4450_v31  ;;  %v816_v18 = vpop.xlane.xlu0 %815 }
 0x1b4   :  { %v620_v0 = vmul.f32 %v4540_v51, %v619_v23  ;;  %vm396_vm15 = vweird.f32 %v4419_v46  ;;  %vm719_vm0 = vweird.f32 %v4499_v17  ;;  %v4594_v41 = vadd.f32 1e-05, %v1048_v7 }
 0x1b5   :  { %v4596_v1 = vadd.f32 1e-05, %v820_v21  ;;  %v404_v28 = vmul.f32 %v4249_v40, %v401_v63  ;;  %v973_v33 = vmul.f32 %v4249_v40, %v970_v53  ;;  %3467 = vrsqrt.f32 %v4576_v44  ;;  %vm4665_vm6 = vmor %vm718_vm14, %vm719_vm0 }
 0x1b6   :  { %v4610_v10 = vadd.f32 %v4263_v8, %v631_v49  ;;  %v708_v22 = vmul.f32 %v705_v27, %v3966_v2  ;;  %v516_v23 = vmul.f32 %v513_v3, %v4049_v26  ;;  %v285_v53 = vsel %vm4604_vm1, %v4463_v12, %v281_v42 }
 0x1b7   :  { %v394_v48 = vsub.f32 1.5, %v393_v62  ;;  %3469 = vrsqrt.f32 %v4594_v41  ;;  %v717_v52 = vmul.f32 %v4499_v17, %v716_v24  ;;  %v621_v47 = vmul.f32 0.5, %v620_v0 }
 0x1b8   :  { %3471 = vrsqrt.f32 %v4596_v1  ;;  %v4621_v49 = vadd.f32 %v4263_v8, %v404_v28  ;;  %v637_v12 = vmax.f32 %v4610_v10, 0.0  ;;  %v4632_v42 = vadd.f32 1e-05, %v708_v22 }
 0x1b9   :  { %v707_v25 = vmul.f32 %v702_v11, %v3966_v2  ;;  %v821_v62 = vmul.f32 %v816_v18, %v3966_v2  ;;  %v617_v7 = vsel %vm4627_vm3, %v4388_v45, %v4564_v19  ;;  %v4641_v21 = vadd.f32 %v4263_v8, %v973_v33 }
 0x1ba   :  { %v410_v36 = vmax.f32 %v4621_v49, 0.0  ;;  %v288_v63 = vmul.f32 %v285_v53, %v4055_v29  ;;  %v4646_v27 = vmul.f32 %v4489_v38, %v394_v48  ;;  %vm397_vm4 = vweird.f32 %v4489_v38  ;;  %3370 = vmatmul.msk.f32.vlgmr.msra.gmra.mxu2 %vm95_vm2, %v637_v12  ;;  %v1047_v53 = vpop.xlane.xlu2 %1046 }
 0x1bb   :  { %vm624_vm5 = vweird.f32 %v4472_v61  ;;  %v7174_v3 = vmax.f32 %v4487_v30, 0.0  ;;  %3473 = vrsqrt.f32 %v4632_v42  ;;  %v4656_v45 = vpop.eup %3467  ;;  %v4659_v29 = vmul.f32 %v4249_v40, %v516_v23  ;;  %vm4691_vm8 = vmor %vm396_vm15, %vm397_vm4 }
 0x1bc   :  { %vm625_vm7 = vweird.f32 %v4540_v51  ;;  %3365 = vmatmul.msk.f32.gmra.mxu0 %vm95_vm2, %v410_v36  ;;  %v4673_v30 = vadd.f32 1e-05, %v707_v25  ;;  %v721_v31 = vsel %vm4665_vm6, %v4499_v17, %v717_v52  ;;  %v622_v28 = vsub.f32 1.5, %v621_v47 }
 0x1bd   :  { %v1099_v24 = vmax.f32 %v1096_v43, %v7174_v3  ;;  %v4675_v43 = vadd.f32 1e-05, %v821_v62  ;;  %v4677_v0 = vpop.eup %3469  ;;  %v291_v33 = vmul.f32 %v4249_v40, %v288_v63  ;;  %v629_v50 = vmul.f32 %v617_v7, %v4034_v9  ;;  %vm4749_vm11 = vmor %vm624_vm5, %vm625_vm7 }
 0x1be   :  { %v4684_v22 = vpop.eup %3471  ;;  %v979_v11 = vmax.f32 %v4641_v21, 0.0  ;;  %v7179_v17 = vmax.f32 %v4410_v6, 0.0  ;;  %v1055_v9 = vmul.f32 %v4677_v0, %v4594_v41  ;;  %3475 = vrsqrt.f32 %v4673_v30 }
 0x1bf   :  { %v399_v46 = vsel %vm4691_vm8, %v4489_v38, %v4646_v27  ;;  %v951_v48 = vmul.f32 %v4656_v45, %v4576_v44  ;;  %v827_v5 = vmul.f32 %v4684_v22, %v4596_v1  ;;  %3477 = vrsqrt.f32 %v4675_v43 }
 0x1c0   :  { %v4699_v23 = vmax.f32 %v7179_v17, %v296_v55  ;;  %v742_v6 = vmul.f32 %v721_v31, %v4070_v54  ;;  %v1056_v55 = vmul.f32 %v4677_v0, %v1055_v9  ;;  %v7180_v52 = vmax.f32 %v4415_v34, 0.0  ;;  %v1126_v54 = vld [vmem:[%s7120_s5 + $0x30] sm:$0xff] }
 0x1c1   :  { %v4718_v26 = vadd.f32 %v4263_v8, %v291_v33  ;;  %v4720_v25 = vpop.eup %3473  ;;  %v4723_v62 = vmul.f32 %v4540_v51, %v622_v28  ;;  %v828_v7 = vmul.f32 %v4684_v22, %v827_v5  ;;  %v632_v63 = vmul.f32 %v4249_v40, %v629_v50  ;;  %1156 = vmatpush.msrb.mxu1 %v1126_v54  ;;  %v1125_v54 = vld [vmem:[%s7120_s5 + $0x28] sm:$0xff] }
 0x1c2   :  { %v1102_v47 = vmax.f32 %v1099_v24, %v7180_v52  ;;  %v1050_v3 = vmul.f32 %v1047_v53, %v3966_v2  ;;  %v1057_v19 = vmul.f32 0.5, %v1056_v55  ;;  %vm1060_vm9 = vweird.f32 %v4594_v41 }
 0x1c3   :  { %v733_v24 = vmul.f32 %v4720_v25, %v4632_v42  ;;  %v297_v31 = vmax.f32 %v4718_v26, 0.0  ;;  %v952_v28 = vmul.f32 %v4656_v45, %v951_v48  ;;  %v829_v33 = vmul.f32 0.5, %v828_v7  ;;  %1157 = vmatpush.msrb.mxu1 %v1125_v54  ;;  %v819_v54 = vpop.xlane.xlu0 %818 }
 0x1c4   :  { %vm832_vm10 = vweird.f32 %v4596_v1  ;;  %v4738_v50 = vadd.f32 %v4263_v8, %v632_v63  ;;  %v4740_v17 = vpop.eup %3475  ;;  %v4743_v9 = vmul.f32 %v4249_v40, %v742_v6  ;;  %v1058_v48 = vsub.f32 1.5, %v1057_v19  ;;  %v1044_v63 = vpop.xlane.xlu1 %1043 }
 0x1c5   :  { %v734_v5 = vmul.f32 %v4720_v25, %v733_v24  ;;  %3363 = vmatmul.msk.f32.gmra.mxu3 %vm95_vm2, %v297_v31  ;;  %v4757_v55 = vadd.f32 1e-05, %v1050_v3  ;;  %v4759_v52 = vpop.eup %3477  ;;  %v627_v61 = vsel %vm4749_vm11, %v4540_v51, %v4723_v62  ;;  %v830_v6 = vsub.f32 1.5, %v829_v33 }
 0x1c6   :  { %vm833_vm12 = vweird.f32 %v4684_v22  ;;  %v723_v7 = vmul.f32 %v4740_v17, %v4673_v30  ;;  %v1059_v3 = vmul.f32 %v4677_v0, %v1058_v48  ;;  %vm1061_vm13 = vweird.f32 %v4677_v0  ;;  %v1124_v48 = vld [vmem:[%s7120_s5 + $0x20] sm:$0xff] }
 0x1c7   :  { %v837_v19 = vmul.f32 %v4759_v52, %v4675_v43  ;;  %v4777_v51 = vadd.f32 %v4263_v8, %v4561_v32  ;;  %v953_v62 = vmul.f32 0.5, %v952_v28  ;;  %vm957_vm14 = vweird.f32 %v4656_v45  ;;  %vm4790_vm15 = vmor %vm832_vm10, %vm833_vm12  ;;  %1158 = vmatpush.msrb.mxu1 %v1124_v48 }
 0x1c8   :  { %v831_v24 = vmul.f32 %v4684_v22, %v830_v6  ;;  %v724_v33 = vmul.f32 %v4740_v17, %v723_v7  ;;  %v638_v53 = vmax.f32 %v4738_v50, 0.0  ;;  %v4796_v28 = vmax.f32 %v1102_v47, %v637_v12  ;;  %vm4805_vm1 = vmor %vm1060_vm9, %vm1061_vm13 }
 0x1c9   :  { %v735_v6 = vmul.f32 0.5, %v734_v5  ;;  %v838_v7 = vmul.f32 %v4759_v52, %v837_v19  ;;  %3479 = vrsqrt.f32 %v4757_v55  ;;  %vm956_vm0 = vweird.f32 %v4576_v44  ;;  %1526 = vmatpush.msra.mxu1 %v4160_v4 }
 0x1ca   :  { %v835_v10 = vsel %vm4790_vm15, %v4684_v22, %v831_v24  ;;  %v4815_v12 = vmax.f32 %v4699_v23, %v410_v36  ;;  %v725_v47 = vmul.f32 0.5, %v724_v33  ;;  %vm728_vm3 = vweird.f32 %v4673_v30  ;;  %3371 = vmatmul.msk.f32.gmra.mxu2 %vm95_vm2, %v638_v53  ;;  %vm4883_vm10 = vmor %vm956_vm0, %vm957_vm14 }
 0x1cb   :  { %v1063_v41 = vsel %vm4805_vm1, %v4677_v0, %v1059_v3  ;;  %v856_v22 = vmul.f32 %v835_v10, %v4097_v15  ;;  %v839_v5 = vmul.f32 0.5, %v838_v7  ;;  %vm842_vm4 = vweird.f32 %v4675_v43  ;;  %1527 = vmatpush.msra.mxu1 %v4170_v58 }
 0x1cc   :  { %v524_v49 = vmax.f32 %v4777_v51, 0.0  ;;  %v954_v36 = vsub.f32 1.5, %v953_v62  ;;  %v726_v23 = vsub.f32 1.5, %v725_v47  ;;  %v1049_v19 = vmul.f32 %v1044_v63, %v3966_v2  ;;  %v3425_v51 = vld [vmem:[%s7121_s6] ss:$0 sm:$0xff] }
 0x1cd   :  { %v822_v24 = vmul.f32 %v819_v54, %v3966_v2  ;;  %v736_v4 = vsub.f32 1.5, %v735_v6  ;;  %vm738_vm5 = vweird.f32 %v4632_v42  ;;  %vm729_vm6 = vweird.f32 %v4740_v17  ;;  %1528 = vmatpush.msra.mxu1 %v4177_v20 }
 0x1ce   :  { %v840_v0 = vsub.f32 1.5, %v839_v5  ;;  %v402_v15 = vmul.f32 %v399_v46, %v4073_v57  ;;  %v1084_v3 = vmul.f32 %v1063_v41, %v4091_v13  ;;  %v727_v63 = vmul.f32 %v4740_v17, %v726_v23  ;;  %vm4859_vm8 = vmor %vm728_vm3, %vm729_vm6 }
 0x1cf   :  { %v4841_v62 = vadd.f32 1e-05, %v1049_v19  ;;  %v4843_v58 = vadd.f32 1e-05, %v822_v24  ;;  %v4846_v33 = vpop.eup %3479  ;;  %v859_v48 = vmul.f32 %v4249_v40, %v856_v22  ;;  %v630_v32 = vmul.f32 %v627_v61, %v4076_v59  ;;  %v933_v59 = vpop.xlane.xlu1 %932  ;;  %1529 = vmatpush.msra.mxu1 %v4187_v56 }
 0x1d0   :  { %v405_v18 = vmul.f32 %v4249_v40, %v402_v15  ;;  %v748_v57 = vadd.f32 %v4263_v8, %v4743_v9  ;;  %v955_v13 = vmul.f32 %v4656_v45, %v954_v36  ;;  %vm739_vm7 = vweird.f32 %v4720_v25 }
 0x1d1   :  { %v1075_v38 = vmul.f32 %v4846_v33, %v4757_v55  ;;  %3481 = vrsqrt.f32 %v4841_v62  ;;  %v731_v27 = vsel %vm4859_vm8, %v4740_v17, %v727_v63  ;;  %v841_v46 = vmul.f32 %v4759_v52, %v840_v0  ;;  %vm4916_vm12 = vmor %vm738_vm5, %vm739_vm7 }
 0x1d2   :  { %vm843_vm9 = vweird.f32 %v4759_v52  ;;  %3483 = vrsqrt.f32 %v4843_v58  ;;  %v1087_v30 = vmul.f32 %v4249_v40, %v1084_v3  ;;  %v4876_v61 = vadd.f32 %v4263_v8, %v405_v18 }
 0x1d3   :  { %v1076_v9 = vmul.f32 %v4846_v33, %v1075_v38  ;;  %v633_v6 = vmul.f32 %v4249_v40, %v630_v32  ;;  %v737_v17 = vmul.f32 %v4720_v25, %v736_v4  ;;  %v751_v7 = vmax.f32 %v748_v57, 0.0  ;;  %vm4892_vm11 = vmor %vm842_vm4, %vm843_vm9 }
 0x1d4   :  { %v936_v54 = vmul.f32 %v933_v59, %v3966_v2  ;;  %v862_v1 = vadd.f32 %v4263_v8, %v859_v48  ;;  %v411_v44 = vmax.f32 %v4876_v61, 0.0  ;;  %v743_v22 = vmul.f32 %v731_v27, %v4112_v35 }
 0x1d5   :  { %v1077_v47 = vmul.f32 0.5, %v1076_v9  ;;  %v4898_v41 = vadd.f32 %v4263_v8, %v633_v6  ;;  %v959_v5 = vsel %vm4883_vm10, %v4656_v45, %v955_v13  ;;  %v845_v43 = vsel %vm4892_vm11, %v4759_v52, %v841_v46  ;;  %3373 = vmatmul.msk.f32.vlgmr.msrb.gmra.mxu3 %vm95_vm2, %v751_v7 }
 0x1d6   :  { %v4908_v36 = vadd.f32 1e-05, %v936_v54  ;;  %v865_v23 = vmax.f32 %v862_v1, 0.0  ;;  %3366 = vmatmul.msk.f32.gmra.mxu0 %vm95_vm2, %v411_v44  ;;  %v1090_v24 = vadd.f32 %v4263_v8, %v1087_v30  ;;  %v746_v4 = vmul.f32 %v4249_v40, %v743_v22 }
 0x1d7   :  { %v4910_v19 = vpop.eup %3481  ;;  %v1078_v45 = vsub.f32 1.5, %v1077_v47  ;;  %v639_v52 = vmax.f32 %v4898_v41, 0.0  ;;  %v741_v42 = vsel %vm4916_vm12, %v4720_v25, %v737_v17  ;;  %v1108_v3 = vmax.f32 %v4796_v28, %v751_v7 }
 0x1d8   :  { %v4926_v0 = vpop.eup %3483  ;;  %v1065_v15 = vmul.f32 %v4910_v19, %v4841_v62  ;;  %3485 = vrsqrt.f32 %v4908_v36  ;;  %v971_v63 = vmul.f32 %v959_v5, %v4094_v14  ;;  %v1103_v48 = vmax.f32 %v4815_v12, %v524_v49 }
 0x1d9   :  { %vm1081_vm13 = vweird.f32 %v4846_v33  ;;  %v847_v18 = vmul.f32 %v4926_v0, %v4843_v58  ;;  %3372 = vmatmul.msk.f32.gmra.mxu2 %vm95_vm2, %v639_v52  ;;  %v1111_v28 = vmax.f32 %v1108_v3, %v865_v23  ;;  %v749_v32 = vadd.f32 %v4263_v8, %v746_v4 }
 0x1da   :  { %v1066_v25 = vmul.f32 %v4910_v19, %v1065_v15  ;;  %v857_v14 = vmul.f32 %v845_v43, %v4118_v37  ;;  %v1079_v57 = vmul.f32 %v4846_v33, %v1078_v45  ;;  %v1093_v13 = vmax.f32 %v1090_v24, 0.0 }
 0x1db   :  { %v848_v12 = vmul.f32 %v4926_v0, %v847_v18  ;;  %v744_v20 = vmul.f32 %v741_v42, %v4115_v39  ;;  %v1114_v59 = vmax.f32 %v1111_v28, %v979_v11  ;;  %v752_v27 = vmax.f32 %v749_v32, 0.0  ;;  %v3598_v32 = vld [vmem:[%s7120_s5] sm:$0xff] }
 0x1dc   :  { %v1067_v38 = vmul.f32 0.5, %v1066_v25  ;;  %v860_v46 = vmul.f32 %v4249_v40, %v857_v14  ;;  %v1106_v30 = vmax.f32 %v1103_v48, %v638_v53  ;;  %vm1080_vm14 = vweird.f32 %v4757_v55  ;;  %v3597_v48 = vld [vmem:[%s7120_s5 + $0x8] sm:$0xff] }
 0x1dd   :  { %v849_v37 = vmul.f32 0.5, %v848_v12  ;;  %v747_v9 = vmul.f32 %v4249_v40, %v744_v20  ;;  %vm1071_vm15 = vweird.f32 %v4910_v19  ;;  %v1117_v39 = vmax.f32 %v1114_v59, %v1093_v13  ;;  %3374 = vmatmul.msk.f32.gmra.mxu3 %vm95_vm2, %v752_v27  ;;  %vm4965_vm0 = vmor %vm1080_vm14, %vm1081_vm13 }
 0x1de   :  { %v4958_v6 = vpop.eup %3485  ;;  %v1068_v56 = vsub.f32 1.5, %v1067_v38  ;;  %v863_v17 = vadd.f32 %v4263_v8, %v860_v46  ;;  %vm853_vm1 = vweird.f32 %v4926_v0  ;;  %3376 = vmatmul.msk.f32.vlgmr.msra.gmra.mxu0 %vm95_vm2, %v865_v23  ;;  %v974_v7 = vmul.f32 %v4249_v40, %v971_v63  ;;  %v7200_v38 = vld [vmem:[#allocation7_spill] sm:$0xff] }
 0x1df   :  { %v850_v55 = vsub.f32 1.5, %v849_v37  ;;  %v961_v53 = vmul.f32 %v4958_v6, %v4908_v36  ;;  %v1083_v54 = vsel %vm4965_vm0, %v4846_v33, %v1079_v57  ;;  %vm1070_vm3 = vweird.f32 %v4841_v62  ;;  %3355 = vmatmul.msk.f32.vlgmr.msrb.gmra.mxu1 %vm95_vm2, %v1117_v39  ;;  %v3595_v62 = vld [vmem:[%s7120_s5 + $0x18] sm:$0xff] }
 0x1e0   :  { %v1069_v1 = vmul.f32 %v4910_v19, %v1068_v56  ;;  %v750_v10 = vadd.f32 %v4263_v8, %v747_v9  ;;  %vm1072_vm4 = vmor %vm1070_vm3, %vm1071_vm15  ;;  %vm852_vm5 = vweird.f32 %v4843_v58  ;;  %v1109_v33 = vmax.f32 %v1106_v30, %v752_v27  ;;  %1966 = vmatpush.msrb.mxu1 %v3595_v62 }
 0x1e1   :  { %v851_v47 = vmul.f32 %v4926_v0, %v850_v55  ;;  %v962_v22 = vmul.f32 %v4958_v6, %v961_v53  ;;  %3382 = vmatmul.msk.f32.vlgmr.msrb.gmra.mxu2 %vm95_vm2, %v1093_v13  ;;  %v7197_v5 = vmax.f32 %v4504_v16, 0.0  ;;  %vm854_vm6 = vmor %vm852_vm5, %vm853_vm1  ;;  %v522_v58 = vadd.f32 %v4263_v8, %v4659_v29  ;;  %v3596_v16 = vld [vmem:[%s7120_s5 + $0x10] sm:$0xff]  ;;  %v7199_v29 = vld [vmem:[#allocation5_spill] sm:$0xff] }
 0x1e2   :  { %v1073_v23 = vsel %vm1072_vm4, %v4910_v19, %v1069_v1  ;;  %v866_v35 = vmax.f32 %v863_v17, 0.0  ;;  %v977_v42 = vadd.f32 %v4263_v8, %v974_v7  ;;  %1967 = vmatpush.msrb.mxu1 %v3596_v16  ;;  %v7198_v19 = vld [vmem:[#allocation6_spill] sm:$0xff]  ;;  %v1086_v3 = vmul.f32 %v1083_v54, %v7199_v29 }
 0x1e3   :  { %v1098_v43 = vmax.f32 %v7197_v5, %v297_v31  ;;  %v855_v45 = vsel %vm854_vm6, %v4926_v0, %v851_v47  ;;  %v963_v24 = vmul.f32 0.5, %v962_v22  ;;  %v1085_v4 = vmul.f32 %v1073_v23, %v4133_v60 }
 0x1e4   :  { %v753_v31 = vmax.f32 %v750_v10, 0.0  ;;  %v858_v15 = vmul.f32 %v855_v45, %v7198_v19  ;;  %vm967_vm7 = vweird.f32 %v4958_v6  ;;  %v1112_v0 = vmax.f32 %v1109_v33, %v866_v35  ;;  %1968 = vmatpush.msrb.mxu1 %v3597_v48 }
 0x1e5   :  { %v1101_v26 = vmax.f32 %v1098_v43, %v411_v44  ;;  %v964_v63 = vsub.f32 1.5, %v963_v24  ;;  %v1088_v60 = vmul.f32 %v4249_v40, %v1085_v4  ;;  %v525_v18 = vmax.f32 %v522_v58, 0.0 }
 0x1e6   :  { %3375 = vmatmul.msk.f32.gmra.mxu3 %vm95_vm2, %v753_v31  ;;  %v861_v61 = vmul.f32 %v4249_v40, %v858_v15  ;;  %vm966_vm8 = vweird.f32 %v4908_v36  ;;  %3377 = vmatmul.msk.f32.gmra.mxu0 %vm95_vm2, %v866_v35  ;;  %v980_v28 = vmax.f32 %v977_v42, 0.0  ;;  %v1089_v20 = vmul.f32 %v4249_v40, %v1086_v3 }
 0x1e7   :  { %v965_v44 = vmul.f32 %v4958_v6, %v964_v63  ;;  %v1091_v25 = vadd.f32 %v4263_v8, %v1088_v60  ;;  %1969 = vmatpush.msrb.mxu1 %v3598_v32  ;;  %v1104_v14 = vmax.f32 %v1101_v26, %v525_v18  ;;  %vm968_vm9 = vmor %vm966_vm8, %vm967_vm7 }
 0x1e8   :  { %v864_v57 = vadd.f32 %v4263_v8, %v861_v61  ;;  %v1115_v36 = vmax.f32 %v1112_v0, %v980_v28  ;;  %v1092_v9 = vadd.f32 %v4263_v8, %v1089_v20 }
 0x1e9   :  { %v969_v12 = vsel %vm968_vm9, %v4958_v6, %v965_v44  ;;  %v1094_v13 = vmax.f32 %v1091_v25, 0.0  ;;  %v1107_v30 = vmax.f32 %v1104_v14, %v639_v52 }
 0x1ea   :  { %v972_v59 = vmul.f32 %v969_v12, %v7200_v38  ;;  %v867_v27 = vmax.f32 %v864_v57, 0.0  ;;  %v1095_v50 = vmax.f32 %v1092_v9, 0.0 }
 0x1eb   :  { %3383 = vmatmul.msk.f32.gmra.mxu2 %vm95_vm2, %v1094_v13  ;;  %v1118_v46 = vmax.f32 %v1115_v36, %v1094_v13  ;;  %v1110_v6 = vmax.f32 %v1107_v30, %v753_v31 }
 0x1ec   :  { %v975_v37 = vmul.f32 %v4249_v40, %v972_v59  ;;  %v7201_v40 = vmax.f32 %v4415_v34, 0.0 }
 0x1ed   :  { %3356 = vmatmul.msk.f32.gmra.mxu1 %vm95_vm2, %v1118_v46  ;;  %v1113_v39 = vmax.f32 %v1110_v6, %v867_v27 }
 0x1ee   :  { %v978_v56 = vadd.f32 %v4263_v8, %v975_v37  ;;  %3378 = vmatmul.msk.f32.gmra.mxu0 %vm95_vm2, %v867_v27 }
 0x1f0   :  { %v981_v17 = vmax.f32 %v978_v56, 0.0 }
 0x1f2   :  { %v1116_v55 = vmax.f32 %v1113_v39, %v981_v17 }
 0x1f3   :  { %3384 = vmatmul.msk.f32.gmra.mxu2 %vm95_vm2, %v1095_v50 }
 0x1f4   :  { %v1119_v53 = vmax.f32 %v1116_v55, %v1095_v50 }
 0x1f6   :  { %3357 = vmatmul.msk.f32.gmra.mxu1 %vm95_vm2, %v1119_v53 }
 0x1fe   :  { %3367 = vmatmul.msk.f32.vlgmr.msra.gmra.mxu1 %vm95_vm2, %v7201_v40 }
 0x206   :  { %3368 = vmatmul.msk.f32.gmra.mxu1 %vm95_vm2, %v524_v49 }
 0x20e   :  { %3369 = vmatmul.msk.f32.gmra.mxu1 %vm95_vm2, %v525_v18 }
 0x216   :  { %3379 = vmatmul.msk.f32.vlgmr.msrb.gmra.mxu1 %vm95_vm2, %v979_v11 }
 0x218   :  { %v1195_v8 = vpop.f32.mrf.mxu2 }
 0x21e   :  { %3380 = vmatmul.msk.f32.gmra.mxu1 %vm95_vm2, %v980_v28 }
 0x223   :  { %v1311_v7 = vpop.f32.mrf.mxu3 }
 0x226   :  { %3381 = vmatmul.msk.f32.gmra.mxu1 %vm95_vm2, %v981_v17  ;;  %v1198_v41 = vpop.f32.mrf.mxu2 }
 0x229   :  { %v1421_v52 = vpop.f32.mrf.mxu0 }
 0x230   :  { %v1201_v34 = vpop.f32.mrf.mxu2 }
 0x233   :  { %v1314_v49 = vpop.f32.mrf.mxu3 }
 0x239   :  { %v1424_v54 = vpop.f32.mrf.mxu0 }
 0x23d   :  { %v1641_v1 = vpop.f32.mrf.mxu2 }
 0x248   :  { %v1317_v58 = vpop.f32.mrf.mxu3 }
 0x24d   :  { %v1644_v62 = vpop.f32.mrf.mxu2 }
 0x253   :  { %v1427_v10 = vpop.f32.mrf.mxu0 }
 0x258   :  { %v1751_v19 = vpop.f32.mrf.mxu3 }
 0x25b   :  { %v1861_v35 = vpop.f32.mrf.mxu0 }
 0x25c   :  { %v1160_v21 = vpop.f32.mrf.mxu1  ;;  %v1647_v16 = vpop.f32.mrf.mxu2 }
 0x25d   :  { %v5054_v47 = vadd.f32 %v3425_v51, %v1160_v21 }
 0x25f   :  { %v5057_v11 = vadd.f32 %v1421_v52, %v5054_v47  ;;  %v5060_v22 = vadd.f32 %v1311_v7, %v5054_v47  ;;  %v5063_v33 = vadd.f32 %v1195_v8, %v5054_v47  ;;  %v5072_v45 = vadd.f32 %v1641_v1, %v5054_v47 }
 0x260   :  { %v5075_v24 = vadd.f32 %v1861_v35, %v5054_v47  ;;  %v5087_v29 = vadd.f32 %v1751_v19, %v5054_v47  ;;  %v1754_v36 = vpop.f32.mrf.mxu3 }
 0x261   :  { %v1430_v5 = vsel %vm95_vm2, %v5057_v11, 0.0  ;;  %v1320_v43 = vsel %vm95_vm2, %v5060_v22, 0.0  ;;  %v1204_v23 = vsel %vm95_vm2, %v5063_v33, 0.0  ;;  %v1650_v42 = vsel %vm95_vm2, %v5072_v45, 0.0 }
 0x262   :  { %1431 = vadd.xlane.f32.xlu2 %v1430_v5  ;;  %1321 = vadd.xlane.f32.xlu1 %v1320_v43  ;;  %v1870_v31 = vsel %vm95_vm2, %v5075_v24, 0.0  ;;  %v1760_v0 = vsel %vm95_vm2, %v5087_v29, 0.0 }
 0x263   :  { %1205 = vadd.xlane.f32.xlu0 %v1204_v23  ;;  %v1864_v20 = vpop.f32.mrf.mxu0 }
 0x264   :  { %v2081_v61 = vpop.f32.mrf.mxu2 }
 0x265   :  { %v5102_v44 = vadd.f32 %v2081_v61, %v5054_v47 }
 0x267   :  { %v2090_v14 = vsel %vm95_vm2, %v5102_v44, 0.0 }
 0x269   :  { %v1757_v50 = vpop.f32.mrf.mxu3 }
 0x26a   :  { %v1163_v4 = vpop.f32.mrf.mxu1  ;;  %1651 = vadd.xlane.f32.xlu1 %v1650_v42 }
 0x26b   :  { %v5079_v26 = vadd.f32 %v3425_v51, %v1163_v4  ;;  %1871 = vadd.xlane.f32.xlu0 %v1870_v31 }
 0x26d   :  { %v5084_v15 = vadd.f32 %v1198_v41, %v5079_v26  ;;  %v5092_v63 = vadd.f32 %v1314_v49, %v5079_v26  ;;  %v5099_v18 = vadd.f32 %v1424_v54, %v5079_v26  ;;  %v5107_v32 = vadd.f32 %v1644_v62, %v5079_v26 }
 0x26e   :  { %v5116_v38 = vadd.f32 %v1754_v36, %v5079_v26  ;;  %v5121_v27 = vadd.f32 %v1864_v20, %v5079_v26  ;;  %v2084_v30 = vpop.f32.mrf.mxu2 }
 0x26f   :  { %v1207_v3 = vsel %vm95_vm2, %v5084_v15, 0.0  ;;  %v1323_v60 = vsel %vm95_vm2, %v5092_v63, 0.0  ;;  %v1433_v28 = vsel %vm95_vm2, %v5099_v18, 0.0  ;;  %v1653_v57 = vsel %vm95_vm2, %v5107_v32, 0.0 }
 0x270   :  { %1208 = vadd.xlane.f32.xlu2 %v1207_v3  ;;  %v1763_v46 = vsel %vm95_vm2, %v5116_v38, 0.0  ;;  %v1873_v37 = vsel %vm95_vm2, %v5121_v27, 0.0  ;;  %v5130_v56 = vadd.f32 %v2084_v30, %v5079_v26 }
 0x272   :  { %1761 = vadd.xlane.f32.xlu1 %v1760_v0  ;;  %v2093_v55 = vsel %vm95_vm2, %v5130_v56, 0.0 }
 0x273   :  { %v1166_v48 = vpop.f32.mrf.mxu1  ;;  %1324 = vadd.xlane.f32.xlu0 %v1323_v60 }
 0x274   :  { %v1167_v25 = vadd.f32 %v3425_v51, %v1166_v48 }
 0x276   :  { %v5113_v13 = vadd.f32 %v1201_v34, %v1167_v25  ;;  %v5127_v6 = vadd.f32 %v1427_v10, %v1167_v25  ;;  %v5134_v17 = vadd.f32 %v1317_v58, %v1167_v25  ;;  %v5140_v8 = vadd.f32 %v1757_v50, %v1167_v25  ;;  %v2087_v7 = vpop.f32.mrf.mxu2  ;;  %v1867_v10 = vpop.f32.mrf.mxu0 }
 0x277   :  { %v5147_v34 = vadd.f32 %v1647_v16, %v1167_v25  ;;  %v5151_v1 = vadd.f32 %v2087_v7, %v1167_v25  ;;  %v5159_v5 = vadd.f32 %v1867_v10, %v1167_v25 }
 0x278   :  { %1434 = vadd.xlane.f32.xlu2 %v1433_v28  ;;  %v1210_v59 = vsel %vm95_vm2, %v5113_v13, 0.0  ;;  %v1436_v39 = vsel %vm95_vm2, %v5127_v6, 0.0  ;;  %v1326_v40 = vsel %vm95_vm2, %v5134_v17, 0.0  ;;  %v1766_v52 = vsel %vm95_vm2, %v5140_v8, 0.0 }
 0x279   :  { %v1656_v49 = vsel %vm95_vm2, %v5147_v34, 0.0  ;;  %v2096_v62 = vsel %vm95_vm2, %v5151_v1, 0.0  ;;  %v1876_v35 = vsel %vm95_vm2, %v5159_v5, 0.0 }
 0x27a   :  { %2091 = vadd.xlane.f32.xlu1 %v2090_v14 }
 0x27b   :  { %v1531_v12 = vpop.f32.mrf.mxu1  ;;  %1654 = vadd.xlane.f32.xlu0 %v1653_v57 }
 0x27c   :  { %v5169_v4 = vadd.f32 %v1531_v12, %v5054_v47 }
 0x27e   :  { %v1540_v19 = vsel %vm95_vm2, %v5169_v4, 0.0 }
 0x280   :  { %1211 = vadd.xlane.f32.xlu2 %v1210_v59 }
 0x282   :  { %1764 = vadd.xlane.f32.xlu1 %v1763_v46 }
 0x283   :  { %v1534_v9 = vpop.f32.mrf.mxu1  ;;  %1874 = vadd.xlane.f32.xlu0 %v1873_v37 }
 0x284   :  { %v5143_v41 = vadd.f32 %v1534_v9, %v5079_v26 }
 0x286   :  { %v1543_v54 = vsel %vm95_vm2, %v5143_v41, 0.0 }
 0x288   :  { %1437 = vadd.xlane.f32.xlu2 %v1436_v39 }
 0x28a   :  { %2094 = vadd.xlane.f32.xlu1 %v2093_v55 }
 0x28b   :  { %v1537_v53 = vpop.f32.mrf.mxu1  ;;  %1327 = vadd.xlane.f32.xlu0 %v1326_v40 }
 0x28c   :  { %v5155_v21 = vadd.f32 %v1537_v53, %v1167_v25 }
 0x28e   :  { %v1546_v43 = vsel %vm95_vm2, %v5155_v21, 0.0 }
 0x290   :  { %1767 = vadd.xlane.f32.xlu2 %v1766_v52 }
 0x292   :  { %1544 = vadd.xlane.f32.xlu1 %v1543_v54 }
 0x293   :  { %v1971_v51 = vpop.f32.mrf.mxu1  ;;  %1657 = vadd.xlane.f32.xlu0 %v1656_v49 }
 0x294   :  { %v5164_v23 = vadd.f32 %v1971_v51, %v5054_v47 }
 0x296   :  { %v1980_v42 = vsel %vm95_vm2, %v5164_v23, 0.0 }
 0x298   :  { %2097 = vadd.xlane.f32.xlu2 %v2096_v62 }
 0x29a   :  { %1547 = vadd.xlane.f32.xlu1 %v1546_v43 }
 0x29b   :  { %v1974_v58 = vpop.f32.mrf.mxu1  ;;  %1877 = vadd.xlane.f32.xlu0 %v1876_v35 }
 0x29c   :  { %v5174_v16 = vadd.f32 %v1974_v58, %v5079_v26 }
 0x29e   :  { %v1983_v47 = vsel %vm95_vm2, %v5174_v16, 0.0 }
 0x2a0   :  { %1981 = vadd.xlane.f32.xlu2 %v1980_v42 }
 0x2a3   :  { %v1977_v31 = vpop.f32.mrf.mxu1  ;;  %1541 = vadd.xlane.f32.xlu0 %v1540_v19 }
 0x2a4   :  { %v5178_v3 = vadd.f32 %v1977_v31, %v1167_v25 }
 0x2a6   :  { %v1986_v0 = vsel %vm95_vm2, %v5178_v3, 0.0 }
 0x2a7   :  { %1987 = vadd.xlane.f32.xlu1 %v1986_v0 }
 0x2a8   :  { %1984 = vadd.xlane.f32.xlu2 %v1983_v47 }
 0x2d5   :  { %v1432_v60 = vpop.xlane.xlu2 %1431  ;;  %v1322_v48 = vpop.xlane.xlu1 %1321 }
 0x2d6   :  { %v1439_v26 = vmul.f32 %v1432_v60, %v3966_v2  ;;  %v1329_v61 = vmul.f32 %v1322_v48, %v3966_v2  ;;  %v1206_v28 = vpop.xlane.xlu0 %1205 }
 0x2d7   :  { %v1213_v14 = vmul.f32 %v1206_v28, %v3966_v2 }
 0x2d8   :  { %v5188_v25 = vsub.f32 %v5057_v11, %v1439_v26  ;;  %v5191_v57 = vsub.f32 %v5060_v22, %v1329_v61 }
 0x2d9   :  { %v5194_v12 = vsub.f32 %v5063_v33, %v1213_v14 }
 0x2da   :  { %v1335_v36 = vmul.f32 %v5191_v57, %v5191_v57  ;;  %v1445_v20 = vmul.f32 %v5188_v25, %v5188_v25 }
 0x2db   :  { %v1219_v59 = vmul.f32 %v5194_v12, %v5194_v12 }
 0x2dc   :  { %v1338_v46 = vsel %vm95_vm2, %v1335_v36, 0.0  ;;  %v1448_v11 = vsel %vm95_vm2, %v1445_v20, 0.0 }
 0x2dd   :  { %v1652_v30 = vpop.xlane.xlu1 %1651  ;;  %1339 = vadd.xlane.f32.xlu1 %v1338_v46  ;;  %1449 = vadd.xlane.f32.xlu2 %v1448_v11  ;;  %v1222_v22 = vsel %vm95_vm2, %v1219_v59, 0.0 }
 0x2de   :  { %v1659_v33 = vmul.f32 %v1652_v30, %v3966_v2  ;;  %1223 = vadd.xlane.f32.xlu0 %v1222_v22  ;;  %v1872_v37 = vpop.xlane.xlu0 %1871 }
 0x2df   :  { %v1879_v9 = vmul.f32 %v1872_v37, %v3966_v2 }
 0x2e0   :  { %v5208_v39 = vsub.f32 %v5072_v45, %v1659_v33 }
 0x2e1   :  { %v5211_v50 = vsub.f32 %v5075_v24, %v1879_v9 }
 0x2e2   :  { %v1665_v53 = vmul.f32 %v5208_v39, %v5208_v39 }
 0x2e3   :  { %v1209_v55 = vpop.xlane.xlu2 %1208  ;;  %v1885_v52 = vmul.f32 %v5211_v50, %v5211_v50 }
 0x2e4   :  { %v1214_v40 = vmul.f32 %v1209_v55, %v3966_v2  ;;  %v1668_v7 = vsel %vm95_vm2, %v1665_v53, 0.0 }
 0x2e5   :  { %v1762_v51 = vpop.xlane.xlu1 %1761  ;;  %1669 = vadd.xlane.f32.xlu1 %v1668_v7  ;;  %v1888_v45 = vsel %vm95_vm2, %v1885_v52, 0.0 }
 0x2e6   :  { %v5220_v54 = vsub.f32 %v5084_v15, %v1214_v40  ;;  %v1769_v24 = vmul.f32 %v1762_v51, %v3966_v2  ;;  %1889 = vadd.xlane.f32.xlu0 %v1888_v45  ;;  %v1325_v49 = vpop.xlane.xlu0 %1324 }
 0x2e7   :  { %v1330_v10 = vmul.f32 %v1325_v49, %v3966_v2 }
 0x2e8   :  { %v1220_v62 = vmul.f32 %v5220_v54, %v5220_v54  ;;  %v5228_v43 = vsub.f32 %v5087_v29, %v1769_v24 }
 0x2e9   :  { %v5231_v58 = vsub.f32 %v5092_v63, %v1330_v10 }
 0x2ea   :  { %v1225_v15 = vsel %vm95_vm2, %v1220_v62, 0.0  ;;  %v1775_v42 = vmul.f32 %v5228_v43, %v5228_v43 }
 0x2eb   :  { %v1435_v35 = vpop.xlane.xlu2 %1434  ;;  %1226 = vadd.xlane.f32.xlu2 %v1225_v15  ;;  %v1336_v19 = vmul.f32 %v5231_v58, %v5231_v58 }
 0x2ec   :  { %v1440_v31 = vmul.f32 %v1435_v35, %v3966_v2  ;;  %v1778_v0 = vsel %vm95_vm2, %v1775_v42, 0.0 }
 0x2ed   :  { %v2092_v47 = vpop.xlane.xlu1 %2091  ;;  %1779 = vadd.xlane.f32.xlu1 %v1778_v0  ;;  %v1341_v63 = vsel %vm95_vm2, %v1336_v19, 0.0 }
 0x2ee   :  { %v5241_v29 = vsub.f32 %v5099_v18, %v1440_v31  ;;  %v2099_v60 = vmul.f32 %v2092_v47, %v3966_v2  ;;  %1342 = vadd.xlane.f32.xlu0 %v1341_v63  ;;  %v1655_v48 = vpop.xlane.xlu0 %1654 }
 0x2ef   :  { %v1660_v26 = vmul.f32 %v1655_v48, %v3966_v2 }
 0x2f0   :  { %v1446_v61 = vmul.f32 %v5241_v29, %v5241_v29  ;;  %v5249_v28 = vsub.f32 %v5102_v44, %v2099_v60 }
 0x2f1   :  { %v5252_v14 = vsub.f32 %v5107_v32, %v1660_v26 }
 0x2f2   :  { %v1451_v18 = vsel %vm95_vm2, %v1446_v61, 0.0  ;;  %v2105_v20 = vmul.f32 %v5249_v28, %v5249_v28 }
 0x2f3   :  { %1452 = vadd.xlane.f32.xlu2 %v1451_v18  ;;  %v1212_v36 = vpop.xlane.xlu2 %1211  ;;  %v1666_v46 = vmul.f32 %v5252_v14, %v5252_v14 }
 0x2f4   :  { %v1215_v59 = vmul.f32 %v1212_v36, %v3966_v2  ;;  %v2108_v11 = vsel %vm95_vm2, %v2105_v20, 0.0 }
 0x2f5   :  { %v1765_v30 = vpop.xlane.xlu1 %1764  ;;  %2109 = vadd.xlane.f32.xlu1 %v2108_v11  ;;  %v1671_v32 = vsel %vm95_vm2, %v1666_v46, 0.0 }
 0x2f6   :  { %v5262_v44 = vsub.f32 %v5113_v13, %v1215_v59  ;;  %v1770_v22 = vmul.f32 %v1765_v30, %v3966_v2  ;;  %1672 = vadd.xlane.f32.xlu0 %v1671_v32  ;;  %v1875_v33 = vpop.xlane.xlu0 %1874 }
 0x2f8   :  { %v1221_v37 = vmul.f32 %v5262_v44, %v5262_v44  ;;  %v5269_v9 = vsub.f32 %v5116_v38, %v1770_v22 }
 0x2fa   :  { %v1228_v55 = vsel %vm95_vm2, %v1221_v37, 0.0  ;;  %v1776_v13 = vmul.f32 %v5269_v9, %v5269_v9 }
 0x2fb   :  { %1229 = vadd.xlane.f32.xlu2 %v1228_v55  ;;  %v1438_v53 = vpop.xlane.xlu2 %1437 }
 0x2fc   :  { %v1441_v40 = vmul.f32 %v1438_v53, %v3966_v2  ;;  %v1781_v52 = vsel %vm95_vm2, %v1776_v13, 0.0 }
 0x2fd   :  { %v2095_v51 = vpop.xlane.xlu1 %2094  ;;  %1782 = vadd.xlane.f32.xlu1 %v1781_v52 }
 0x2fe   :  { %v5277_v7 = vsub.f32 %v5127_v6, %v1441_v40  ;;  %v2100_v45 = vmul.f32 %v2095_v51, %v3966_v2  ;;  %v1328_v38 = vpop.xlane.xlu0 %1327 }
 0x2ff   :  { %v1331_v24 = vmul.f32 %v1328_v38, %v3966_v2 }
 0x300   :  { %v1447_v49 = vmul.f32 %v5277_v7, %v5277_v7  ;;  %v5284_v10 = vsub.f32 %v5130_v56, %v2100_v45 }
 0x301   :  { %v5287_v62 = vsub.f32 %v5134_v17, %v1331_v24 }
 0x302   :  { %v1454_v15 = vsel %vm95_vm2, %v1447_v49, 0.0  ;;  %v2106_v35 = vmul.f32 %v5284_v10, %v5284_v10 }
 0x303   :  { %1455 = vadd.xlane.f32.xlu2 %v1454_v15  ;;  %v1768_v6 = vpop.xlane.xlu2 %1767  ;;  %v1337_v42 = vmul.f32 %v5287_v62, %v5287_v62 }
 0x304   :  { %v2111_v31 = vsel %vm95_vm2, %v2106_v35, 0.0 }
 0x305   :  { %v1545_v19 = vpop.xlane.xlu1 %1544  ;;  %2112 = vadd.xlane.f32.xlu1 %v2111_v31  ;;  %v1344_v56 = vsel %vm95_vm2, %v1337_v42, 0.0 }
 0x306   :  { %v1550_v0 = vmul.f32 %v1545_v19, %v3966_v2  ;;  %1345 = vadd.xlane.f32.xlu0 %v1344_v56  ;;  %v1658_v17 = vpop.xlane.xlu0 %1657 }
 0x308   :  { %v5298_v47 = vsub.f32 %v5143_v41, %v1550_v0 }
 0x30a   :  { %v1556_v60 = vmul.f32 %v5298_v47, %v5298_v47 }
 0x30b   :  { %v2098_v63 = vpop.xlane.xlu2 %2097 }
 0x30c   :  { %v1561_v48 = vsel %vm95_vm2, %v1556_v60, 0.0  ;;  %v2101_v42 = vmul.f32 %v2098_v63, %v3966_v2 }
 0x30d   :  { %1562 = vadd.xlane.f32.xlu1 %v1561_v48  ;;  %v1548_v26 = vpop.xlane.xlu1 %1547 }
 0x30e   :  { %v1551_v61 = vmul.f32 %v1548_v26, %v3966_v2  ;;  %v1878_v18 = vpop.xlane.xlu0 %1877  ;;  %v5357_v19 = vsub.f32 %v5151_v1, %v2101_v42 }
 0x30f   :  { %v1881_v56 = vmul.f32 %v1878_v18, %v3966_v2 }
 0x310   :  { %v5305_v36 = vsub.f32 %v5155_v21, %v1551_v61  ;;  %v1880_v21 = vmul.f32 %v1875_v33, %v3966_v2  ;;  %7204 = vst [vmem:[#allocation7_spill] sm:$0xff] %v5357_v19  ;;  %v2107_v60 = vmul.f32 %v5357_v19, %v5357_v19 }
 0x312   :  { %v1557_v59 = vmul.f32 %v5305_v36, %v5305_v36  ;;  %v5330_v33 = vsub.f32 %v5121_v27, %v1880_v21  ;;  %v1661_v27 = vmul.f32 %v1658_v17, %v3966_v2  ;;  %v2114_v1 = vsel %vm95_vm2, %v2107_v60, 0.0  ;;  %v5393_v21 = vld [vmem:[%s7124_s9 + $0x10] sm:$0xff] }
 0x313   :  { %v1982_v20 = vpop.xlane.xlu2 %1981 }
 0x314   :  { %v1989_v41 = vmul.f32 %v1982_v20, %v3966_v2  ;;  %v1564_v46 = vsel %vm95_vm2, %v1557_v59, 0.0  ;;  %v5350_v35 = vsub.f32 %v5147_v34, %v1661_v27  ;;  %v5364_v34 = vsub.f32 %v5159_v5, %v1881_v56 }
 0x315   :  { %1565 = vadd.xlane.f32.xlu1 %v1564_v46  ;;  %v5379_v46 = vld [vmem:[%s7124_s9 + $0x18] sm:$0xff] }
 0x316   :  { %v5312_v11 = vsub.f32 %v5164_v23, %v1989_v41  ;;  %v1542_v30 = vpop.xlane.xlu0 %1541  ;;  %7203 = vst [vmem:[#allocation5_spill] sm:$0xff] %v5350_v35  ;;  %v1667_v17 = vmul.f32 %v5350_v35, %v5350_v35  ;;  %v1887_v48 = vmul.f32 %v5364_v34, %v5364_v34  ;;  %2259 = vmatpush.msrb.mxu0 %v5379_v46 }
 0x317   :  { %v1549_v32 = vmul.f32 %v1542_v30, %v3966_v2  ;;  %7205 = vst [vmem:[#allocation8_spill] sm:$0xff] %v5364_v34  ;;  %2375 = vmatpush.msra.mxu1 %v5379_v46  ;;  %2485 = vmatpush.msra.mxu2 %v5379_v46 }
 0x318   :  { %v1995_v22 = vmul.f32 %v5312_v11, %v5312_v11  ;;  %v1674_v63 = vsel %vm95_vm2, %v1667_v17, 0.0  ;;  %v1894_v26 = vsel %vm95_vm2, %v1887_v48, 0.0  ;;  %2260 = vmatpush.msrb.mxu0 %v5393_v21 }
 0x319   :  { %v5319_v37 = vsub.f32 %v5169_v4, %v1549_v32  ;;  %v1771_v4 = vmul.f32 %v1768_v6, %v3966_v2  ;;  %v1886_v6 = vmul.f32 %v5330_v33, %v5330_v33  ;;  %2376 = vmatpush.msra.mxu1 %v5393_v21  ;;  %2486 = vmatpush.msra.mxu2 %v5393_v21 }
 0x31a   :  { %v1988_v55 = vpop.xlane.xlu1 %1987  ;;  %v1998_v53 = vsel %vm95_vm2, %v1995_v22, 0.0 }
 0x31b   :  { %v1991_v13 = vmul.f32 %v1988_v55, %v3966_v2  ;;  %1999 = vadd.xlane.f32.xlu2 %v1998_v53  ;;  %v1985_v23 = vpop.xlane.xlu2 %1984  ;;  %v1555_v52 = vmul.f32 %v5319_v37, %v5319_v37  ;;  %v5343_v15 = vsub.f32 %v5140_v8, %v1771_v4  ;;  %v1891_v31 = vsel %vm95_vm2, %v1886_v6, 0.0  ;;  %v5403_v55 = vld [vmem:[%s7124_s9 + $0x8] sm:$0xff] }
 0x31c   :  { %v1990_v40 = vmul.f32 %v1985_v23, %v3966_v2  ;;  %2261 = vmatpush.msrb.mxu0 %v5403_v55  ;;  %2377 = vmatpush.msra.mxu1 %v5403_v55 }
 0x31d   :  { %v5327_v51 = vsub.f32 %v5178_v3, %v1991_v13  ;;  %v1558_v38 = vsel %vm95_vm2, %v1555_v52, 0.0  ;;  %v1777_v8 = vmul.f32 %v5343_v15, %v5343_v15  ;;  %2487 = vmatpush.msra.mxu2 %v5403_v55  ;;  %v5412_v13 = vld [vmem:[%s7124_s9] sm:$0xff] }
 0x31e   :  { %v5334_v45 = vsub.f32 %v5174_v16, %v1990_v40  ;;  %1559 = vadd.xlane.f32.xlu0 %v1558_v38  ;;  %2262 = vmatpush.msrb.mxu0 %v5412_v13 }
 0x31f   :  { %7202 = vst [vmem:[#allocation6_spill] sm:$0xff] %v5327_v51  ;;  %v1997_v24 = vmul.f32 %v5327_v51, %v5327_v51  ;;  %v1784_v0 = vsel %vm95_vm2, %v1777_v8, 0.0  ;;  %2378 = vmatpush.msra.mxu1 %v5412_v13  ;;  %2488 = vmatpush.msra.mxu2 %v5412_v13 }
 0x320   :  { %v1996_v49 = vmul.f32 %v5334_v45, %v5334_v45  ;;  %2705 = vmatpush.msra.mxu0 %v5379_v46 }
 0x321   :  { %v2004_v3 = vsel %vm95_vm2, %v1997_v24, 0.0  ;;  %2925 = vmatpush.msrb.mxu2 %v5379_v46  ;;  %2815 = vmatpush.msrb.mxu1 %v5379_v46 }
 0x322   :  { %2005 = vadd.xlane.f32.xlu1 %v2004_v3  ;;  %v2001_v16 = vsel %vm95_vm2, %v1996_v49, 0.0  ;;  %2706 = vmatpush.msra.mxu0 %v5393_v21 }
 0x323   :  { %2002 = vadd.xlane.f32.xlu2 %v2001_v16  ;;  %2926 = vmatpush.msrb.mxu2 %v5393_v21 }
 0x324   :  { %2816 = vmatpush.msrb.mxu1 %v5393_v21  ;;  %2707 = vmatpush.msra.mxu0 %v5403_v55 }
 0x325   :  { %2927 = vmatpush.msrb.mxu2 %v5403_v55 }
 0x326   :  { %1892 = vadd.xlane.f32.xlu0 %v1891_v31  ;;  %2817 = vmatpush.msrb.mxu1 %v5403_v55 }
 0x327   :  { %2708 = vmatpush.msra.mxu0 %v5412_v13  ;;  %2928 = vmatpush.msrb.mxu2 %v5412_v13 }
 0x328   :  { %2818 = vmatpush.msrb.mxu1 %v5412_v13 }
 0x32b   :  { %1785 = vadd.xlane.f32.xlu2 %v1784_v0 }
 0x32e   :  { %1675 = vadd.xlane.f32.xlu0 %v1674_v63 }
 0x333   :  { %2115 = vadd.xlane.f32.xlu2 %v2114_v1 }
 0x336   :  { %1895 = vadd.xlane.f32.xlu0 %v1894_v26 }
 0x350   :  { %v1340_v61 = vpop.xlane.xlu1 %1339  ;;  %v1450_v18 = vpop.xlane.xlu2 %1449 }
 0x351   :  { %v1347_v5 = vmul.f32 %v1340_v61, %v3966_v2  ;;  %v1457_v20 = vmul.f32 %v1450_v18, %v3966_v2  ;;  %v1224_v59 = vpop.xlane.xlu0 %1223 }
 0x352   :  { %v1231_v41 = vmul.f32 %v1224_v59, %v3966_v2 }
 0x353   :  { %v5381_v30 = vadd.f32 1e-05, %v1347_v5  ;;  %v5383_v32 = vadd.f32 1e-05, %v1457_v20 }
 0x354   :  { %v5387_v22 = vadd.f32 1e-05, %v1231_v41 }
 0x355   :  { %3487 = vrsqrt.f32 %v5381_v30  ;;  %vm1359_vm12 = vweird.f32 %v5381_v30  ;;  %vm1469_vm1 = vweird.f32 %v5383_v32 }
 0x356   :  { %3489 = vrsqrt.f32 %v5383_v32  ;;  %vm1243_vm14 = vweird.f32 %v5387_v22 }
 0x357   :  { %3491 = vrsqrt.f32 %v5387_v22 }
 0x358   :  { %v1670_v53 = vpop.xlane.xlu1 %1669 }
 0x359   :  { %v1677_v23 = vmul.f32 %v1670_v53, %v3966_v2  ;;  %v1890_v40 = vpop.xlane.xlu0 %1889 }
 0x35a   :  { %v1897_v52 = vmul.f32 %v1890_v40, %v3966_v2 }
 0x35b   :  { %v5420_v4 = vpop.eup %3487  ;;  %v5422_v38 = vadd.f32 1e-05, %v1677_v23 }
 0x35c   :  { %v5426_v24 = vpop.eup %3489  ;;  %v1354_v49 = vmul.f32 %v5420_v4, %v5381_v30  ;;  %v5430_v3 = vadd.f32 1e-05, %v1897_v52  ;;  %vm1360_vm10 = vweird.f32 %v5420_v4 }
 0x35d   :  { %v5433_v27 = vpop.eup %3491  ;;  %v1464_v16 = vmul.f32 %v5426_v24, %v5383_v32  ;;  %3493 = vrsqrt.f32 %v5422_v38  ;;  %vm5469_vm13 = vmor %vm1359_vm12, %vm1360_vm10  ;;  %vm1470_vm15 = vweird.f32 %v5426_v24  ;;  %vm1689_vm4 = vweird.f32 %v5422_v38 }
 0x35e   :  { %v1227_v6 = vpop.xlane.xlu2 %1226  ;;  %v1355_v42 = vmul.f32 %v5420_v4, %v1354_v49  ;;  %v1238_v31 = vmul.f32 %v5433_v27, %v5387_v22  ;;  %3495 = vrsqrt.f32 %v5430_v3  ;;  %vm1244_vm11 = vweird.f32 %v5433_v27  ;;  %vm1471_vm3 = vmor %vm1469_vm1, %vm1470_vm15 }
 0x35f   :  { %v1465_v8 = vmul.f32 %v5426_v24, %v1464_v16  ;;  %v1232_v56 = vmul.f32 %v1227_v6, %v3966_v2  ;;  %vm5482_vm0 = vmor %vm1243_vm14, %vm1244_vm11  ;;  %vm1909_vm7 = vweird.f32 %v5430_v3 }
 0x360   :  { %v1356_v0 = vmul.f32 0.5, %v1355_v42  ;;  %v1239_v17 = vmul.f32 %v5433_v27, %v1238_v31  ;;  %v1780_v63 = vpop.xlane.xlu1 %1779 }
 0x361   :  { %v1466_v60 = vmul.f32 0.5, %v1465_v8  ;;  %v5451_v1 = vadd.f32 1e-05, %v1232_v56  ;;  %v1787_v48 = vmul.f32 %v1780_v63, %v3966_v2  ;;  %v1343_v26 = vpop.xlane.xlu0 %1342  ;;  %v5501_v63 = vld [vmem:[%s7122_s7] ss:$0 sm:$0xff]  ;;  %s3632_s7 = smov 128  }
 0x362   :  { %v1357_v61 = vsub.f32 1.5, %v1356_v0  ;;  %v1240_v18 = vmul.f32 0.5, %v1239_v17  ;;  %v1348_v41 = vmul.f32 %v1343_v26, %v3966_v2 }
 0x363   :  { %v5457_v5 = vpop.eup %3493  ;;  %v1467_v20 = vsub.f32 1.5, %v1466_v60  ;;  %3497 = vrsqrt.f32 %v5451_v1  ;;  %v5460_v59 = vadd.f32 1e-05, %v1787_v48  ;;  %vm1253_vm6 = vweird.f32 %v5451_v1 }
 0x364   :  { %v1358_v53 = vmul.f32 %v5420_v4, %v1357_v61  ;;  %v1241_v23 = vsub.f32 1.5, %v1240_v18  ;;  %v5467_v52 = vpop.eup %3495  ;;  %v1684_v6 = vmul.f32 %v5457_v5, %v5422_v38  ;;  %v5486_v8 = vadd.f32 1e-05, %v1348_v41 }
 0x365   :  { %3499 = vrsqrt.f32 %v5460_v59  ;;  %v1468_v42 = vmul.f32 %v5426_v24, %v1467_v20  ;;  %vm1690_vm5 = vweird.f32 %v5457_v5  ;;  %vm1910_vm8 = vweird.f32 %v5467_v52 }
 0x366   :  { %v1453_v40 = vpop.xlane.xlu2 %1452  ;;  %v1242_v16 = vmul.f32 %v5433_v27, %v1241_v23  ;;  %v1362_v30 = vsel %vm5469_vm13, %v5420_v4, %v1358_v53  ;;  %v1904_v4 = vmul.f32 %v5467_v52, %v5430_v3  ;;  %3501 = vrsqrt.f32 %v5486_v8  ;;  %vm5579_vm12 = vmor %vm1689_vm4, %vm1690_vm5 }
 0x367   :  { %v1458_v56 = vmul.f32 %v1453_v40, %v3966_v2  ;;  %v1383_v60 = vmul.f32 %v1362_v30, %v5191_v57  ;;  %v1472_v32 = vsel %vm1471_vm3, %v5426_v24, %v1468_v42  ;;  %v5528_v42 = vld [vmem:[%s7123_s8] ss:$0 sm:$0xff]  ;;  %vm1799_vm10 = vweird.f32 %v5460_v59  ;;  %vm5625_vm1 = vmor %vm1909_vm7, %vm1910_vm8 }
 0x368   :  { %v1246_v22 = vsel %vm5482_vm0, %v5433_v27, %v1242_v16  ;;  %v2110_v0 = vpop.xlane.xlu1 %2109  ;;  %v1685_v27 = vmul.f32 %v5457_v5, %v1684_v6  ;;  %v1905_v53 = vmul.f32 %v5467_v52, %v1904_v4  ;;  %v1493_v24 = vmul.f32 %v1472_v32, %v5188_v25 }
 0x369   :  { %v5492_v17 = vpop.eup %3497  ;;  %v1267_v61 = vmul.f32 %v1246_v22, %v5194_v12  ;;  %v5511_v18 = vadd.f32 1e-05, %v1458_v56  ;;  %v1673_v57 = vpop.xlane.xlu0 %1672  ;;  %v2117_v23 = vmul.f32 %v2110_v0, %v3966_v2  ;;  %v1386_v49 = vmul.f32 %v5501_v63, %v1383_v60 }
 0x36a   :  { %v1248_v48 = vmul.f32 %v5492_v17, %v5451_v1  ;;  %v1686_v12 = vmul.f32 0.5, %v1685_v27  ;;  %v1678_v22 = vmul.f32 %v1673_v57, %v3966_v2  ;;  %v1906_v60 = vmul.f32 0.5, %v1905_v53 }
 0x36b   :  { %v5507_v26 = vpop.eup %3499  ;;  %3503 = vrsqrt.f32 %v5511_v18  ;;  %v1273_v30 = vmul.f32 %v5501_v63, %v1267_v61  ;;  %v5530_v31 = vadd.f32 1e-05, %v2117_v23  ;;  %v1496_v27 = vmul.f32 %v5501_v63, %v1493_v24 }
 0x36c   :  { %v1249_v20 = vmul.f32 %v5492_v17, %v1248_v48  ;;  %v1794_v41 = vmul.f32 %v5507_v26, %v5460_v59  ;;  %v5522_v6 = vpop.eup %3501  ;;  %v1687_v48 = vsub.f32 1.5, %v1686_v12  ;;  %v5553_v23 = vadd.f32 %v5528_v42, %v1386_v49 }
 0x36d   :  { %v1364_v25 = vmul.f32 %v5522_v6, %v5486_v8  ;;  %3505 = vrsqrt.f32 %v5530_v31  ;;  %v5550_v53 = vadd.f32 %v5528_v42, %v1273_v30  ;;  %vm1254_vm9 = vweird.f32 %v5492_v17 }
 0x36e   :  { %v1230_v40 = vpop.xlane.xlu2 %1229  ;;  %v1795_v16 = vmul.f32 %v5507_v26, %v1794_v41  ;;  %v1250_v0 = vmul.f32 0.5, %v1249_v20  ;;  %v5545_v41 = vadd.f32 1e-05, %v1678_v22  ;;  %v1688_v30 = vmul.f32 %v5457_v5, %v1687_v48  ;;  %vm5607_vm15 = vmor %vm1253_vm6, %vm1254_vm9 }
 0x36f   :  { %v1233_v56 = vmul.f32 %v1230_v40, %v3966_v2  ;;  %v1365_v61 = vmul.f32 %v5522_v6, %v1364_v25  ;;  %vm1369_vm11 = vweird.f32 %v5486_v8  ;;  %v7141_v25 = vmax.f32 %v5553_v23, 0.0 }
 0x370   :  { %v1783_v4 = vpop.xlane.xlu1 %1782  ;;  %v1796_v32 = vmul.f32 0.5, %v1795_v16  ;;  %v1251_v40 = vsub.f32 1.5, %v1250_v0  ;;  %v1907_v16 = vsub.f32 1.5, %v1906_v60  ;;  %3507 = vrsqrt.f32 %v5545_v41 }
 0x371   :  { %v5542_v20 = vpop.eup %3503  ;;  %v5547_v57 = vadd.f32 1e-05, %v1233_v56  ;;  %v1366_v24 = vmul.f32 0.5, %v1365_v61  ;;  %v5570_v60 = vadd.f32 %v5528_v42, %v1496_v27  ;;  %vm1800_vm13 = vweird.f32 %v5507_v26  ;;  %3391 = vmatmul.msk.f32.vlgmr.msra.gmra.mxu1 %vm95_vm2, %v7141_v25 }
 0x372   :  { %v1474_v12 = vmul.f32 %v5542_v20, %v5511_v18  ;;  %v1797_v22 = vsub.f32 1.5, %v1796_v32  ;;  %v1252_v34 = vmul.f32 %v5492_v17, %v1251_v40  ;;  %v1908_v27 = vmul.f32 %v5467_v52, %v1907_v16  ;;  %vm5642_vm3 = vmor %vm1799_vm10, %vm1800_vm13 }
 0x373   :  { %3509 = vrsqrt.f32 %v5547_v57  ;;  %v5564_v56 = vpop.eup %3505  ;;  %v1367_v48 = vsub.f32 1.5, %v1366_v24  ;;  %v7212_v40 = vmax.f32 %v5550_v53, 0.0  ;;  %v7142_v24 = vmax.f32 %v5570_v60, 0.0 }
 0x374   :  { %v1475_v49 = vmul.f32 %v5542_v20, %v1474_v12  ;;  %v2124_v12 = vmul.f32 %v5564_v56, %v5530_v31  ;;  %v1788_v38 = vmul.f32 %v1783_v4, %v3966_v2  ;;  %v1692_v51 = vsel %vm5579_vm12, %v5457_v5, %v1688_v30 }
 0x375   :  { %3388 = vmatmul.msk.f32.vlgmr.msrb.gmra.mxu0 %vm95_vm2, %v7212_v40  ;;  %v1798_v16 = vmul.f32 %v5507_v26, %v1797_v22  ;;  %vm1479_vm14 = vweird.f32 %v5511_v18  ;;  %vm1370_vm0 = vweird.f32 %v5522_v6  ;;  %3394 = vmatmul.msk.f32.vlgmr.msra.gmra.mxu2 %vm95_vm2, %v7142_v24  ;;  %v1912_v3 = vsel %vm5625_vm1, %v5467_v52, %v1908_v27 }
 0x376   :  { %v1456_v61 = vpop.xlane.xlu2 %1455  ;;  %v1476_v32 = vmul.f32 0.5, %v1475_v49  ;;  %v2125_v35 = vmul.f32 %v5564_v56, %v2124_v12  ;;  %3145 = vmatpush.msrb.mxu0 %v5379_v46  ;;  %v5601_v25 = vpop.eup %3507  ;;  %v5615_v5 = vadd.f32 1e-05, %v1788_v38  ;;  %v1368_v12 = vmul.f32 %v5522_v6, %v1367_v48  ;;  %vm5662_vm5 = vmor %vm1369_vm11, %vm1370_vm0 }
 0x377   :  { %v1459_v40 = vmul.f32 %v1456_v61, %v3966_v2  ;;  %v1256_v61 = vsel %vm5607_vm15, %v5492_v17, %v1252_v34  ;;  %vm1480_vm4 = vweird.f32 %v5542_v20  ;;  %vm2130_vm7 = vweird.f32 %v5564_v56 }
 0x378   :  { %v2113_v19 = vpop.xlane.xlu1 %2112  ;;  %v1477_v38 = vsub.f32 1.5, %v1476_v32  ;;  %3146 = vmatpush.msrb.mxu0 %v5393_v21  ;;  %3511 = vrsqrt.f32 %v5615_v5  ;;  %v1268_v48 = vmul.f32 %v1256_v61, %v5220_v54  ;;  %v1372_v32 = vsel %vm5662_vm5, %v5522_v6, %v1368_v12  ;;  %vm5691_vm6 = vmor %vm1479_vm14, %vm1480_vm4 }
 0x379   :  { %v1346_v49 = vpop.xlane.xlu0 %1345  ;;  %v2118_v30 = vmul.f32 %v2113_v19, %v3966_v2  ;;  %v5619_v0 = vpop.eup %3509  ;;  %v2126_v19 = vmul.f32 0.5, %v2125_v35  ;;  %v5655_v34 = vadd.f32 1e-05, %v1459_v40  ;;  %v1933_v40 = vmul.f32 %v1912_v3, %v5211_v50 }
 0x37a   :  { %v1349_v22 = vmul.f32 %v1346_v49, %v3966_v2  ;;  %v1713_v49 = vmul.f32 %v1692_v51, %v5208_v39  ;;  %v1258_v35 = vmul.f32 %v5619_v0, %v5547_v57  ;;  %v1802_v39 = vsel %vm5642_vm3, %v5507_v26, %v1798_v16  ;;  %3147 = vmatpush.msrb.mxu0 %v5403_v55 }
 0x37b   :  { %v1694_v51 = vmul.f32 %v5601_v25, %v5545_v41  ;;  %v5667_v17 = vadd.f32 1e-05, %v2118_v30  ;;  %v1478_v27 = vmul.f32 %v5542_v20, %v1477_v38  ;;  %v2127_v24 = vsub.f32 1.5, %v2126_v19 }
 0x37c   :  { %v1259_v52 = vmul.f32 %v5619_v0, %v1258_v35  ;;  %v5669_v26 = vadd.f32 1e-05, %v1349_v22  ;;  %3513 = vrsqrt.f32 %v5655_v34  ;;  %3148 = vmatpush.msrb.mxu0 %v5412_v13  ;;  %v5679_v16 = vmul.f32 %v5501_v63, %v1713_v49 }
 0x37d   :  { %3515 = vrsqrt.f32 %v5667_v17  ;;  %v1823_v54 = vmul.f32 %v1802_v39, %v5228_v43  ;;  %v1695_v6 = vmul.f32 %v5601_v25, %v1694_v51  ;;  %v1274_v30 = vmul.f32 %v5501_v63, %v1268_v48 }
 0x37e   :  { %v1260_v4 = vmul.f32 0.5, %v1259_v52  ;;  %3517 = vrsqrt.f32 %v5669_v26  ;;  %v1384_v1 = vmul.f32 %v1372_v32, %v5231_v58  ;;  %v5698_v61 = vpop.eup %3511  ;;  %v1482_v12 = vsel %vm5691_vm6, %v5542_v20, %v1478_v27 }
 0x37f   :  { %v2128_v38 = vmul.f32 %v5564_v56, %v2127_v24  ;;  %v7223_v18 = vmax.f32 %v5553_v23, 0.0  ;;  %v7224_v19 = vmax.f32 %v5550_v53, 0.0  ;;  %v5709_v3 = vadd.f32 %v5528_v42, %v1274_v30 }
 0x380   :  { %v1563_v8 = vpop.xlane.xlu1 %1562  ;;  %v1261_v50 = vsub.f32 1.5, %v1260_v4  ;;  %vm1264_vm8 = vweird.f32 %v5619_v0  ;;  %v1387_v35 = vmul.f32 %v5501_v63, %v1384_v1  ;;  %v5719_v20 = vmul.f32 %v5501_v63, %v1933_v40 }
 0x381   :  { %v1568_v43 = vmul.f32 %v1563_v8, %v3966_v2  ;;  %v2165_v49 = vmax.f32 %v7224_v19, %v7223_v18  ;;  %vm2129_vm9 = vweird.f32 %v5530_v31  ;;  %v1696_v53 = vmul.f32 0.5, %v1695_v6 }
 0x382   :  { %v1262_v58 = vmul.f32 %v5619_v0, %v1261_v50  ;;  %v5716_v51 = vpop.eup %3513  ;;  %v1283_v23 = vmax.f32 %v5709_v3, 0.0  ;;  %v5726_v52 = vmul.f32 %v5501_v63, %v1823_v54  ;;  %vm5730_vm10 = vmor %vm2129_vm9, %vm2130_vm7  ;;  %vm1263_vm11 = vweird.f32 %v5547_v57 }
 0x383   :  { %v5714_v39 = vadd.f32 1e-05, %v1568_v43  ;;  %v5723_v59 = vpop.eup %3515  ;;  %v1484_v32 = vmul.f32 %v5716_v51, %v5655_v34  ;;  %v1494_v31 = vmul.f32 %v1482_v12, %v5241_v29  ;;  %v2132_v24 = vsel %vm5730_vm10, %v5564_v56, %v2128_v38  ;;  %vm5745_vm12 = vmor %vm1263_vm11, %vm1264_vm8 }
 0x384   :  { %v5738_v27 = vpop.eup %3517  ;;  %v7229_v40 = vmax.f32 %v5570_v60, 0.0  ;;  %v1804_v4 = vmul.f32 %v5698_v61, %v5615_v5  ;;  %3389 = vmatmul.msk.f32.gmra.mxu0 %vm95_vm2, %v1283_v23  ;;  %v5759_v29 = vadd.f32 %v5528_v42, %v1387_v35  ;;  %v1266_v54 = vsel %vm5745_vm12, %v5619_v0, %v1262_v58 }
 0x385   :  { %v1485_v6 = vmul.f32 %v5716_v51, %v1484_v32  ;;  %v1374_v60 = vmul.f32 %v5738_v27, %v5669_v26  ;;  %3519 = vrsqrt.f32 %v5714_v39  ;;  %v1697_v30 = vsub.f32 1.5, %v1696_v53 }
 0x386   :  { %v5751_v57 = vmax.f32 %v2165_v49, %v7229_v40  ;;  %vm1699_vm13 = vweird.f32 %v5545_v41  ;;  %vm1489_vm14 = vweird.f32 %v5655_v34  ;;  %v2134_v22 = vmul.f32 %v5723_v59, %v5667_v17 }
 0x387   :  { %v1393_v50 = vmax.f32 %v5759_v29, 0.0  ;;  %v1486_v1 = vmul.f32 0.5, %v1485_v6  ;;  %v1375_v0 = vmul.f32 %v5738_v27, %v1374_v60  ;;  %v1497_v43 = vmul.f32 %v5501_v63, %v1494_v31 }
 0x388   :  { %v1566_v56 = vpop.xlane.xlu1 %1565  ;;  %v2153_v38 = vmul.f32 %v2132_v24, %v5249_v28  ;;  %v1805_v18 = vmul.f32 %v5698_v61, %v1804_v4  ;;  %vm1490_vm15 = vweird.f32 %v5716_v51  ;;  %v1269_v19 = vmul.f32 %v1266_v54, %v5262_v44 }
 0x389   :  { %v1569_v12 = vmul.f32 %v1566_v56, %v3966_v2  ;;  %3392 = vmatmul.msk.f32.gmra.mxu1 %vm95_vm2, %v1393_v50  ;;  %v1487_v49 = vsub.f32 1.5, %v1486_v1  ;;  %v1376_v58 = vmul.f32 0.5, %v1375_v0  ;;  %v5784_v35 = vadd.f32 %v5528_v42, %v1497_v43  ;;  %vm5803_vm3 = vmor %vm1489_vm14, %vm1490_vm15 }
 0x38a   :  { %v2135_v28 = vmul.f32 %v5723_v59, %v2134_v22  ;;  %vm1380_vm0 = vweird.f32 %v5738_v27  ;;  %v1275_v32 = vmul.f32 %v5501_v63, %v1269_v19  ;;  %v1698_v4 = vmul.f32 %v5601_v25, %v1697_v30 }
 0x38b   :  { %v5786_v53 = vadd.f32 1e-05, %v1569_v12  ;;  %v5792_v24 = vpop.eup %3519  ;;  %v1488_v44 = vmul.f32 %v5716_v51, %v1487_v49  ;;  %v1377_v8 = vsub.f32 1.5, %v1376_v58  ;;  %v1503_v40 = vmax.f32 %v5784_v35, 0.0 }
 0x38c   :  { %vm1700_vm1 = vweird.f32 %v5601_v25  ;;  %vm1379_vm4 = vweird.f32 %v5669_v26  ;;  %v1584_v54 = vmul.f32 %v5792_v24, %v5714_v39  ;;  %v1806_v6 = vmul.f32 0.5, %v1805_v18 }
 0x38d   :  { %3521 = vrsqrt.f32 %v5786_v53  ;;  %v1492_v60 = vsel %vm5803_vm3, %v5716_v51, %v1488_v44  ;;  %v1378_v30 = vmul.f32 %v5738_v27, %v1377_v8  ;;  %3395 = vmatmul.msk.f32.gmra.mxu2 %vm95_vm2, %v1503_v40  ;;  %v5818_v34 = vadd.f32 %v5528_v42, %v1275_v32  ;;  %vm5823_vm6 = vmor %vm1379_vm4, %vm1380_vm0 }
 0x38e   :  { %v2000_v48 = vpop.xlane.xlu2 %1999  ;;  %vm1810_vm5 = vweird.f32 %v5698_v61  ;;  %v2136_v26 = vmul.f32 0.5, %v2135_v28  ;;  %v1585_v51 = vmul.f32 %v5792_v24, %v1584_v54  ;;  %v2156_v12 = vmul.f32 %v5501_v63, %v2153_v38  ;;  %vm5836_vm7 = vmor %vm1699_vm13, %vm1700_vm1 }
 0x38f   :  { %v2007_v31 = vmul.f32 %v2000_v48, %v3966_v2  ;;  %v1382_v19 = vsel %vm5823_vm6, %v5738_v27, %v1378_v30  ;;  %v1284_v49 = vmax.f32 %v5818_v34, 0.0  ;;  %v1495_v58 = vmul.f32 %v1492_v60, %v5277_v7 }
 0x390   :  { %v1702_v38 = vsel %vm5836_vm7, %v5601_v25, %v1698_v4  ;;  %vm1809_vm8 = vweird.f32 %v5615_v5  ;;  %v1586_v48 = vmul.f32 0.5, %v1585_v51  ;;  %v1385_v44 = vmul.f32 %v1382_v19, %v5287_v62 }
 0x391   :  { %v1560_v22 = vpop.xlane.xlu0 %1559  ;;  %v5828_v0 = vadd.f32 1e-05, %v2007_v31  ;;  %v1807_v31 = vsub.f32 1.5, %v1806_v6  ;;  %3390 = vmatmul.msk.f32.gmra.mxu0 %vm95_vm2, %v1284_v49  ;;  %v1498_v7 = vmul.f32 %v5501_v63, %v1495_v58  ;;  %v2137_v8 = vsub.f32 1.5, %v2136_v26  ;;  %vm5921_vm14 = vmor %vm1809_vm8, %vm1810_vm5 }
 0x392   :  { %v1567_v43 = vmul.f32 %v1560_v22, %v3966_v2  ;;  %vm2139_vm9 = vweird.f32 %v5667_v17  ;;  %v1587_v4 = vsub.f32 1.5, %v1586_v48  ;;  %vm1590_vm10 = vweird.f32 %v5792_v24 }
 0x393   :  { %3523 = vrsqrt.f32 %v5828_v0  ;;  %v5852_v32 = vpop.eup %3521  ;;  %v5866_v54 = vadd.f32 %v5528_v42, %v1498_v7  ;;  %v5870_v6 = vadd.f32 %v5528_v42, %v5679_v16  ;;  %v1388_v26 = vmul.f32 %v5501_v63, %v1385_v44 }
 0x394   :  { %v5850_v41 = vadd.f32 1e-05, %v1567_v43  ;;  %v1594_v56 = vmul.f32 %v5852_v32, %v5786_v53  ;;  %v1588_v62 = vmul.f32 %v5792_v24, %v1587_v4  ;;  %vm2140_vm11 = vweird.f32 %v5723_v59 }
 0x395   :  { %v2006_v28 = vpop.xlane.xlu1 %2005  ;;  %vm1589_vm12 = vweird.f32 %v5714_v39  ;;  %v1504_v1 = vmax.f32 %v5866_v54, 0.0  ;;  %v5885_v43 = vmul.f32 %v5698_v61, %v1807_v31  ;;  %v5896_v39 = vadd.f32 %v5528_v42, %v1388_v26  ;;  %vm5952_vm15 = vmor %vm2139_vm9, %vm2140_vm11 }
 0x396   :  { %v2009_v27 = vmul.f32 %v2006_v28, %v3966_v2  ;;  %v2003_v25 = vpop.xlane.xlu2 %2002  ;;  %3525 = vrsqrt.f32 %v5850_v41  ;;  %v1595_v30 = vmul.f32 %v5852_v32, %v1594_v56  ;;  %vm5889_vm13 = vmor %vm1589_vm12, %vm1590_vm10  ;;  %v1714_v58 = vmul.f32 %v1702_v38, %v5252_v14 }
 0x397   :  { %v2008_v22 = vmul.f32 %v2003_v25, %v3966_v2  ;;  %v1592_v48 = vsel %vm5889_vm13, %v5792_v24, %v1588_v62  ;;  %3396 = vmatmul.msk.f32.gmra.mxu2 %vm95_vm2, %v1504_v1  ;;  %v1722_v31 = vmax.f32 %v5870_v6, 0.0  ;;  %v2138_v25 = vmul.f32 %v5723_v59, %v2137_v8 }
 0x398   :  { %v5872_v60 = vadd.f32 1e-05, %v2009_v27  ;;  %v1596_v14 = vmul.f32 0.5, %v1595_v30  ;;  %v1394_v24 = vmax.f32 %v5896_v39, 0.0  ;;  %v5915_v38 = vadd.f32 %v5528_v42, %v2156_v12 }
 0x399   :  { %v1893_v16 = vpop.xlane.xlu0 %1892  ;;  %v5882_v51 = vpop.eup %3523  ;;  %v5893_v19 = vadd.f32 1e-05, %v2008_v22  ;;  %v2166_v8 = vmax.f32 %v1283_v23, %v1393_v50  ;;  %3400 = vmatmul.msk.f32.vlgmr.msra.gmra.mxu0 %vm95_vm2, %v1722_v31  ;;  %v1812_v5 = vsel %vm5921_vm14, %v5698_v61, %v5885_v43  ;;  %v1604_v12 = vmul.f32 %v1592_v48, %v5298_v47  ;;  %v2196_v22 = vld [vmem:[%s7124_s9 + $0x38] sm:$0xff] }
 0x39a   :  { %3527 = vrsqrt.f32 %v5872_v60  ;;  %v2014_v28 = vmul.f32 %v5882_v51, %v5828_v0  ;;  %v1898_v7 = vmul.f32 %v1893_v16, %v3966_v2  ;;  %3393 = vmatmul.msk.f32.gmra.mxu1 %vm95_vm2, %v1394_v24  ;;  %v1717_v23 = vmul.f32 %v5501_v63, %v1714_v58  ;;  %2224 = vmatpush.msra.mxu3 %v2196_v22 }
 0x39b   :  { %3529 = vrsqrt.f32 %v5893_v19  ;;  %v5958_v47 = vmax.f32 %v2166_v8, %v1503_v40  ;;  %vm1599_vm0 = vweird.f32 %v5786_v53  ;;  %v2142_v17 = vsel %vm5952_vm15, %v5723_v59, %v2138_v25 }
 0x39c   :  { %v5909_v27 = vpop.eup %3525  ;;  %v2015_v4 = vmul.f32 %v5882_v51, %v2014_v28  ;;  %v5943_v3 = vadd.f32 1e-05, %v1898_v7  ;;  %v1597_v26 = vsub.f32 1.5, %v1596_v14  ;;  %vm2020_vm1 = vweird.f32 %v5882_v51 }
 0x39d   :  { %v1574_v56 = vmul.f32 %v5909_v27, %v5850_v41  ;;  %v5974_v58 = vadd.f32 %v5528_v42, %v5719_v20  ;;  %v1607_v59 = vmul.f32 %v5501_v63, %v1604_v12  ;;  %vm2019_vm3 = vweird.f32 %v5828_v0  ;;  %v2195_v12 = vld [vmem:[%s7124_s9 + $0x30] sm:$0xff] }
 0x39e   :  { %v2016_v62 = vmul.f32 0.5, %v2015_v4  ;;  %v1786_v40 = vpop.xlane.xlu2 %1785  ;;  %3531 = vrsqrt.f32 %v5943_v3  ;;  %vm1580_vm4 = vweird.f32 %v5909_v27  ;;  %v5982_v7 = vadd.f32 %v5528_v42, %v1717_v23  ;;  %vm5994_vm6 = vmor %vm2019_vm3, %vm2020_vm1  ;;  %v2194_v23 = vld [vmem:[%s7124_s9 + $0x28] sm:$0xff]  ;;  %2225 = vmatpush.msra.mxu3 %v2195_v12 }
 0x39f   :  { %v1575_v30 = vmul.f32 %v5909_v27, %v1574_v56  ;;  %v5989_v4 = vmul.f32 %v5852_v32, %v1597_v26  ;;  %vm1600_vm5 = vweird.f32 %v5852_v32  ;;  %vm1579_vm7 = vweird.f32 %v5850_v41 }
 0x3a0   :  { %v5946_v29 = vpop.eup %3527  ;;  %v2017_v16 = vsub.f32 1.5, %v2016_v62  ;;  %v1723_v56 = vmax.f32 %v5982_v7, 0.0  ;;  %v1942_v41 = vmax.f32 %v5974_v58, 0.0  ;;  %v6013_v22 = vmul.f32 %v2142_v17, %v5284_v10  ;;  %vm1581_vm8 = vmor %vm1579_vm7, %vm1580_vm4  ;;  %2226 = vmatpush.msra.mxu3 %v2194_v23 }
 0x3a1   :  { %v2034_v35 = vmul.f32 %v5946_v29, %v5872_v60  ;;  %v1576_v18 = vmul.f32 0.5, %v1575_v30  ;;  %v1676_v48 = vpop.xlane.xlu0 %1675  ;;  %v5976_v28 = vpop.eup %3529  ;;  %vm2029_vm9 = vweird.f32 %v5893_v19  ;;  %v6019_v26 = vadd.f32 %v5528_v42, %v1607_v59  ;;  %vm6042_vm10 = vmor %vm1599_vm0, %vm1600_vm5 }
 0x3a2   :  { %v2018_v25 = vmul.f32 %v5882_v51, %v2017_v16  ;;  %v2024_v20 = vmul.f32 %v5976_v28, %v5893_v19  ;;  %3401 = vmatmul.msk.f32.gmra.mxu0 %vm95_vm2, %v1723_v56  ;;  %3406 = vmatmul.msk.f32.vlgmr.msrb.gmra.mxu2 %vm95_vm2, %v1942_v41  ;;  %v6036_v59 = vadd.f32 %v5528_v42, %v5726_v52  ;;  %vm2040_vm11 = vweird.f32 %v5946_v29 }
 0x3a3   :  { %v1577_v14 = vsub.f32 1.5, %v1576_v18  ;;  %v2035_v8 = vmul.f32 %v5946_v29, %v2034_v35  ;;  %v2193_v35 = vld [vmem:[%s7124_s9 + $0x20] sm:$0xff]  ;;  %v1602_v52 = vsel %vm6042_vm10, %v5852_v32, %v5989_v4  ;;  %vm2030_vm12 = vweird.f32 %v5976_v28 }
 0x3a4   :  { %v2022_v50 = vsel %vm5994_vm6, %v5882_v51, %v2018_v25  ;;  %v2025_v30 = vmul.f32 %v5976_v28, %v2024_v20  ;;  %v1789_v51 = vmul.f32 %v1786_v40, %v3966_v2  ;;  %v6028_v10 = vpop.eup %3531  ;;  %v1832_v0 = vmax.f32 %v6036_v59, 0.0  ;;  %2227 = vmatpush.msra.mxu3 %v2193_v35  ;;  %vm6078_vm13 = vmor %vm2029_vm9, %vm2030_vm12 }
 0x3a5   :  { %v1578_v62 = vmul.f32 %v5909_v27, %v1577_v14  ;;  %v2036_v16 = vmul.f32 0.5, %v2035_v8  ;;  %v1914_v14 = vmul.f32 %v6028_v10, %v5943_v3  ;;  %v1679_v8 = vmul.f32 %v1676_v48, %v3966_v2 }
 0x3a6   :  { %v2026_v18 = vmul.f32 0.5, %v2025_v30  ;;  %v6055_v53 = vadd.f32 1e-05, %v1789_v51  ;;  %v2116_v48 = vpop.xlane.xlu2 %2115  ;;  %2595 = vmatpush.msrb.mxu3 %v5379_v46  ;;  %v1613_v4 = vmax.f32 %v6019_v26, 0.0  ;;  %3403 = vmatmul.msk.f32.vlgmr.msrb.gmra.mxu1 %vm95_vm2, %v1832_v0  ;;  %vm1920_vm15 = vweird.f32 %v6028_v10 }
 0x3a7   :  { %v1582_v17 = vsel %vm1581_vm8, %v5909_v27, %v1578_v62  ;;  %v2043_v27 = vmul.f32 %v2022_v50, %v5312_v11  ;;  %v2037_v23 = vsub.f32 1.5, %v2036_v16  ;;  %v6071_v51 = vadd.f32 1e-05, %v1679_v8 }
 0x3a8   :  { %v1603_v25 = vmul.f32 %v1582_v17, %v5319_v37  ;;  %v2027_v20 = vsub.f32 1.5, %v2026_v18  ;;  %v1915_v37 = vmul.f32 %v6028_v10, %v1914_v14  ;;  %3533 = vrsqrt.f32 %v6055_v53  ;;  %2596 = vmatpush.msrb.mxu3 %v5393_v21 }
 0x3a9   :  { %v1896_v12 = vpop.xlane.xlu0 %1895  ;;  %v2046_v50 = vmul.f32 %v5501_v63, %v2043_v27  ;;  %v2119_v35 = vmul.f32 %v2116_v48, %v3966_v2  ;;  %v1824_v17 = vmul.f32 %v1812_v5, %v5269_v9  ;;  %3535 = vrsqrt.f32 %v6071_v51 }
 0x3aa   :  { %v1606_v11 = vmul.f32 %v5501_v63, %v1603_v25  ;;  %v2028_v32 = vmul.f32 %v5976_v28, %v2027_v20  ;;  %v1916_v30 = vmul.f32 0.5, %v1915_v37  ;;  %v1899_v21 = vmul.f32 %v1896_v12, %v3966_v2  ;;  %2597 = vmatpush.msrb.mxu3 %v5403_v55 }
 0x3ab   :  { %v1605_v59 = vmul.f32 %v1602_v52, %v5305_v36  ;;  %v6098_v44 = vadd.f32 1e-05, %v2119_v35  ;;  %v1827_v61 = vmul.f32 %v5501_v63, %v1824_v17  ;;  %vm1919_vm14 = vweird.f32 %v5943_v3 }
 0x3ac   :  { %v6069_v62 = vadd.f32 %v5528_v42, %v1606_v11  ;;  %v2032_v19 = vsel %vm6078_vm13, %v5976_v28, %v2028_v32  ;;  %v1917_v18 = vsub.f32 1.5, %v1916_v30  ;;  %v6101_v9 = vadd.f32 1e-05, %v1899_v21  ;;  %2598 = vmatpush.msrb.mxu3 %v5412_v13  ;;  %vm1921_vm0 = vmor %vm1919_vm14, %vm1920_vm15 }
 0x3ad   :  { %v2172_v55 = vmax.f32 %v5958_v47, %v1613_v4  ;;  %v6113_v28 = vmul.f32 %v5946_v29, %v2037_v23  ;;  %v2044_v40 = vmul.f32 %v2032_v19, %v5334_v45  ;;  %3537 = vrsqrt.f32 %v6098_v44 }
 0x3ae   :  { %v1612_v16 = vmax.f32 %v6069_v62, 0.0  ;;  %v1918_v5 = vmul.f32 %v6028_v10, %v1917_v18  ;;  %v3534_v36 = vpop.eup %3533  ;;  %v6121_v3 = vadd.f32 %v5528_v42, %v2046_v50  ;;  %vm2039_vm1 = vweird.f32 %v5872_v60 }
 0x3af   :  { %v1814_v27 = vmul.f32 %v3534_v36, %v6055_v53  ;;  %3539 = vrsqrt.f32 %v6101_v9  ;;  %v6130_v14 = vpop.eup %3535  ;;  %v1608_v8 = vmul.f32 %v5501_v63, %v1605_v59  ;;  %v6137_v6 = vmax.f32 %v1284_v49, %v1394_v24  ;;  %vm6141_vm3 = vmor %vm2039_vm1, %vm2040_vm11 }
 0x3b0   :  { %v2171_v43 = vmax.f32 %v5751_v57, %v1612_v16  ;;  %v1830_v57 = vadd.f32 %v5528_v42, %v1827_v61  ;;  %v1922_v13 = vsel %vm1921_vm0, %v6028_v10, %v1918_v5  ;;  %v1704_v52 = vmul.f32 %v6130_v14, %v6071_v51 }
 0x3b1   :  { %v1934_v25 = vmul.f32 %v1922_v13, %v5330_v33  ;;  %v2175_v33 = vmax.f32 %v2172_v55, %v1723_v56  ;;  %v2047_v49 = vmul.f32 %v5501_v63, %v2044_v40  ;;  %v2052_v39 = vmax.f32 %v6121_v3, 0.0 }
 0x3b2   :  { %v2174_v47 = vmax.f32 %v2171_v43, %v1722_v31  ;;  %v1833_v45 = vmax.f32 %v1830_v57, 0.0  ;;  %v1815_v31 = vmul.f32 %v3534_v36, %v1814_v27  ;;  %v2042_v24 = vsel %vm6141_vm3, %v5946_v29, %v6113_v28 }
 0x3b3   :  { %v1937_v34 = vmul.f32 %v5501_v63, %v1934_v25  ;;  %v3538_v56 = vpop.eup %3537  ;;  %vm1820_vm4 = vweird.f32 %v3534_v36  ;;  %v2162_v37 = vmax.f32 %v5915_v38, 0.0  ;;  %v2157_v29 = vmul.f32 %v5501_v63, %v6013_v22  ;;  %v3428_v38 = vld [vmem:[%s7125_s10] ss:$0 sm:$0xff] }
 0x3b4   :  { %v2177_v10 = vmax.f32 %v2174_v47, %v1832_v0  ;;  %3404 = vmatmul.msk.f32.gmra.mxu1 %vm95_vm2, %v1833_v45  ;;  %v1816_v20 = vmul.f32 0.5, %v1815_v31  ;;  %v1705_v0 = vmul.f32 %v6130_v14, %v1704_v52  ;;  %v2144_v12 = vmul.f32 %v3538_v56, %v6098_v44  ;;  %v7251_v31 = vld [vmem:[#allocation6_spill] sm:$0xff] }
 0x3b5   :  { %v1940_v11 = vadd.f32 %v5528_v42, %v1937_v34  ;;  %v6167_v32 = vpop.eup %3539  ;;  %v6170_v30 = vadd.f32 %v5528_v42, %v2047_v49  ;;  %vm1819_vm5 = vweird.f32 %v6055_v53  ;;  %vm1710_vm7 = vweird.f32 %v6130_v14  ;;  %v3601_v49 = vld [vmem:[%s7124_s9 + $0x8] sm:$0xff] }
 0x3b6   :  { %v2180_v7 = vmax.f32 %v2177_v10, %v1942_v41  ;;  %v1817_v48 = vsub.f32 1.5, %v1816_v20  ;;  %v1706_v58 = vmul.f32 0.5, %v1705_v0  ;;  %v2178_v41 = vmax.f32 %v2175_v33, %v1833_v45  ;;  %vm1821_vm6 = vmor %vm1819_vm5, %vm1820_vm4  ;;  %v7250_v45 = vld [vmem:[#allocation5_spill] sm:$0xff]  ;;  %v7252_v20 = vld [vmem:[#allocation7_spill] sm:$0xff] }
 0x3b7   :  { %v1943_v50 = vmax.f32 %v1940_v11, 0.0  ;;  %v2145_v35 = vmul.f32 %v3538_v56, %v2144_v12  ;;  %v1924_v17 = vmul.f32 %v6167_v32, %v6101_v9  ;;  %vm1709_vm8 = vweird.f32 %v6071_v51  ;;  %v3599_v51 = vld [vmem:[%s7124_s9 + $0x18] sm:$0xff]  ;;  %v7253_v12 = vld [vmem:[#allocation8_spill] sm:$0xff] }
 0x3b8   :  { %v2183_v23 = vmax.f32 %v2180_v7, %v2052_v39  ;;  %v1818_v46 = vmul.f32 %v3534_v36, %v1817_v48  ;;  %v1707_v21 = vsub.f32 1.5, %v1706_v58  ;;  %v2053_v5 = vmax.f32 %v6170_v30, 0.0  ;;  %vm1711_vm9 = vmor %vm1709_vm8, %vm1710_vm7  ;;  %v3602_v48 = vld [vmem:[%s7124_s9] sm:$0xff] }
 0x3b9   :  { %v2181_v22 = vmax.f32 %v2178_v41, %v1943_v50  ;;  %3407 = vmatmul.msk.f32.gmra.mxu2 %vm95_vm2, %v1943_v50  ;;  %v2146_v59 = vmul.f32 0.5, %v2145_v35  ;;  %v1925_v53 = vmul.f32 %v6167_v32, %v1924_v17  ;;  %v2160_v55 = vadd.f32 %v5528_v42, %v2157_v29 }
 0x3ba   :  { %v2186_v19 = vmax.f32 %v2183_v23, %v2162_v37  ;;  %v1822_v18 = vsel %vm1821_vm6, %v3534_v36, %v1818_v46  ;;  %v1708_v61 = vmul.f32 %v6130_v14, %v1707_v21  ;;  %vm2150_vm10 = vweird.f32 %v3538_v56 }
 0x3bb   :  { %v1825_v43 = vmul.f32 %v1822_v18, %v5343_v15  ;;  %v2147_v28 = vsub.f32 1.5, %v2146_v59  ;;  %v1926_v40 = vmul.f32 0.5, %v1925_v53  ;;  %v1611_v36 = vadd.f32 %v5528_v42, %v1608_v8  ;;  %v3600_v8 = vld [vmem:[%s7124_s9 + $0x10] sm:$0xff] }
 0x3bc   :  { %3385 = vmatmul.msk.f32.vlgmr.msra.gmra.mxu3 %vm95_vm2, %v2186_v19  ;;  %v1712_v57 = vsel %vm1711_vm9, %v6130_v14, %v1708_v61  ;;  %vm2149_vm11 = vweird.f32 %v6098_v44  ;;  %v2184_v47 = vmax.f32 %v2181_v22, %v2053_v5  ;;  %vm1930_vm12 = vweird.f32 %v6167_v32 }
 0x3bd   :  { %3035 = vmatpush.msra.mxu3 %v3599_v51  ;;  %v1828_v15 = vmul.f32 %v5501_v63, %v1825_v43  ;;  %v2148_v13 = vmul.f32 %v3538_v56, %v2147_v28  ;;  %v1927_v27 = vsub.f32 1.5, %v1926_v40  ;;  %v1715_v25 = vmul.f32 %v1712_v57, %v7250_v45  ;;  %vm2151_vm13 = vmor %vm2149_vm11, %vm2150_vm10 }
 0x3be   :  { %v2045_v14 = vmul.f32 %v2042_v24, %v7251_v31  ;;  %vm1929_vm15 = vweird.f32 %v6101_v9  ;;  %v2163_v10 = vmax.f32 %v2160_v55, 0.0  ;;  %v1614_v52 = vmax.f32 %v1611_v36, 0.0 }
 0x3bf   :  { %3036 = vmatpush.msra.mxu3 %v3600_v8  ;;  %v1831_v44 = vadd.f32 %v5528_v42, %v1828_v15  ;;  %v2152_v60 = vsel %vm2151_vm13, %v3538_v56, %v2148_v13  ;;  %v1928_v33 = vmul.f32 %v6167_v32, %v1927_v27  ;;  %v1718_v34 = vmul.f32 %v5501_v63, %v1715_v25  ;;  %vm1931_vm14 = vmor %vm1929_vm15, %vm1930_vm12 }
 0x3c0   :  { %v2155_v24 = vmul.f32 %v2152_v60, %v7252_v20  ;;  %v2187_v7 = vmax.f32 %v2184_v47, %v2163_v10  ;;  %v2170_v56 = vmax.f32 %v6137_v6, %v1504_v1  ;;  %v2048_v29 = vmul.f32 %v5501_v63, %v2045_v14 }
 0x3c1   :  { %3037 = vmatpush.msra.mxu3 %v3601_v49  ;;  %v1834_v9 = vmax.f32 %v1831_v44, 0.0  ;;  %v1932_v0 = vsel %vm1931_vm14, %v6167_v32, %v1928_v33  ;;  %v1721_v11 = vadd.f32 %v5528_v42, %v1718_v34 }
 0x3c2   :  { %v1935_v23 = vmul.f32 %v1932_v0, %v7253_v12  ;;  %v2173_v58 = vmax.f32 %v2170_v56, %v1614_v52  ;;  %v2158_v6 = vmul.f32 %v5501_v63, %v2155_v24  ;;  %v2051_v50 = vadd.f32 %v5528_v42, %v2048_v29 }
 0x3c3   :  { %3038 = vmatpush.msra.mxu3 %v3602_v48  ;;  %3405 = vmatmul.msk.f32.gmra.mxu1 %vm95_vm2, %v1834_v9  ;;  %v1724_v54 = vmax.f32 %v1721_v11, 0.0 }
 0x3c4   :  { %3386 = vmatmul.msk.f32.gmra.mxu3 %vm95_vm2, %v2187_v7  ;;  %v1938_v1 = vmul.f32 %v5501_v63, %v1935_v23  ;;  %v2161_v17 = vadd.f32 %v5528_v42, %v2158_v6  ;;  %v2054_v22 = vmax.f32 %v2051_v50, 0.0 }
 0x3c5   :  { %v2176_v32 = vmax.f32 %v2173_v58, %v1724_v54  ;;  %3402 = vmatmul.msk.f32.gmra.mxu0 %vm95_vm2, %v1724_v54 }
 0x3c6   :  { %v1941_v41 = vadd.f32 %v5528_v42, %v1938_v1  ;;  %v2164_v19 = vmax.f32 %v2161_v17, 0.0 }
 0x3c7   :  { %v2179_v35 = vmax.f32 %v2176_v32, %v1834_v9 }
 0x3c8   :  { %v1944_v46 = vmax.f32 %v1941_v41, 0.0 }
 0x3ca   :  { %v2182_v21 = vmax.f32 %v2179_v35, %v1944_v46  ;;  %3408 = vmatmul.msk.f32.gmra.mxu2 %vm95_vm2, %v1944_v46 }
 0x3cc   :  { %v2185_v18 = vmax.f32 %v2182_v21, %v2054_v22 }
 0x3cd   :  { %3412 = vmatmul.msk.f32.vlgmr.msrb.gmra.mxu0 %vm95_vm2, %v2162_v37 }
 0x3ce   :  { %v2188_v63 = vmax.f32 %v2185_v18, %v2164_v19 }
 0x3d0   :  { %3387 = vmatmul.msk.f32.gmra.mxu3 %vm95_vm2, %v2188_v63 }
 0x3d5   :  { %3413 = vmatmul.msk.f32.gmra.mxu0 %vm95_vm2, %v2163_v10 }
 0x3d8   :  { %3397 = vmatmul.msk.f32.vlgmr.msrb.gmra.mxu3 %vm95_vm2, %v1612_v16 }
 0x3dd   :  { %3414 = vmatmul.msk.f32.gmra.mxu0 %vm95_vm2, %v2164_v19 }
 0x3e0   :  { %3398 = vmatmul.msk.f32.gmra.mxu3 %vm95_vm2, %v1613_v4 }
 0x3e8   :  { %3399 = vmatmul.msk.f32.gmra.mxu3 %vm95_vm2, %v1614_v52 }
 0x3ee   :  { %v2380_v3 = vpop.f32.mrf.mxu1 }
 0x3f0   :  { %3409 = vmatmul.msk.f32.vlgmr.msra.gmra.mxu3 %vm95_vm2, %v2052_v39 }
 0x3f2   :  { %v2264_v42 = vpop.f32.mrf.mxu0 }
 0x3f8   :  { %3410 = vmatmul.msk.f32.gmra.mxu3 %vm95_vm2, %v2053_v5  ;;  %v2490_v5 = vpop.f32.mrf.mxu2 }
 0x400   :  { %3411 = vmatmul.msk.f32.gmra.mxu3 %vm95_vm2, %v2054_v22 }
 0x401   :  { %v2267_v26 = vpop.f32.mrf.mxu0 }
 0x406   :  { %v2383_v43 = vpop.f32.mrf.mxu1 }
 0x40e   :  { %v2270_v37 = vpop.f32.mrf.mxu0 }
 0x410   :  { %v2493_v15 = vpop.f32.mrf.mxu2 }
 0x416   :  { %v2710_v40 = vpop.f32.mrf.mxu0 }
 0x417   :  { %v2386_v57 = vpop.f32.mrf.mxu1 }
 0x41a   :  { %v2496_v10 = vpop.f32.mrf.mxu2 }
 0x41f   :  { %v2713_v14 = vpop.f32.mrf.mxu0 }
 0x423   :  { %v2820_v52 = vpop.f32.mrf.mxu1 }
 0x425   :  { %v2930_v11 = vpop.f32.mrf.mxu2 }
 0x431   :  { %v2823_v12 = vpop.f32.mrf.mxu1 }
 0x43c   :  { %v2933_v50 = vpop.f32.mrf.mxu2 }
 0x43f   :  { %v2229_v62 = vpop.f32.mrf.mxu3 }
 0x440   :  { %v6255_v4 = vadd.f32 %v3428_v38, %v2229_v62  ;;  %v2826_v18 = vpop.f32.mrf.mxu1 }
 0x442   :  { %v6258_v16 = vadd.f32 %v2264_v42, %v6255_v4  ;;  %v6265_v53 = vadd.f32 %v2380_v3, %v6255_v4  ;;  %v6275_v36 = vadd.f32 %v2490_v5, %v6255_v4  ;;  %v6290_v8 = vadd.f32 %v2710_v40, %v6255_v4  ;;  %v2716_v9 = vpop.f32.mrf.mxu0 }
 0x443   :  { %v6305_v20 = vadd.f32 %v2820_v52, %v6255_v4  ;;  %v6320_v29 = vadd.f32 %v2930_v11, %v6255_v4 }
 0x444   :  { %v2273_v39 = vsel %vm95_vm2, %v6258_v16, 0.0  ;;  %v2389_v55 = vsel %vm95_vm2, %v6265_v53, 0.0  ;;  %v2499_v47 = vsel %vm95_vm2, %v6275_v36, 0.0  ;;  %v2719_v60 = vsel %vm95_vm2, %v6290_v8, 0.0 }
 0x445   :  { %2274 = vadd.xlane.f32.xlu0 %v2273_v39  ;;  %v2829_v56 = vsel %vm95_vm2, %v6305_v20, 0.0  ;;  %v2939_v6 = vsel %vm95_vm2, %v6320_v29, 0.0 }
 0x447   :  { %v2232_v30 = vpop.f32.mrf.mxu3 }
 0x448   :  { %v6262_v59 = vadd.f32 %v3428_v38, %v2232_v30 }
 0x44a   :  { %v6268_v61 = vadd.f32 %v2267_v26, %v6262_v59  ;;  %v6278_v51 = vadd.f32 %v2383_v43, %v6262_v59  ;;  %v6293_v31 = vadd.f32 %v2493_v15, %v6262_v59  ;;  %v6308_v24 = vadd.f32 %v2713_v14, %v6262_v59  ;;  %v3150_v1 = vpop.f32.mrf.mxu0 }
 0x44b   :  { %v6323_v54 = vadd.f32 %v2823_v12, %v6262_v59  ;;  %v6335_v46 = vadd.f32 %v3150_v1, %v6255_v4  ;;  %v6338_v35 = vadd.f32 %v2933_v50, %v6262_v59 }
 0x44c   :  { %v2276_v28 = vsel %vm95_vm2, %v6268_v61, 0.0  ;;  %v2392_v13 = vsel %vm95_vm2, %v6278_v51, 0.0  ;;  %v2502_v33 = vsel %vm95_vm2, %v6293_v31, 0.0  ;;  %v2722_v0 = vsel %vm95_vm2, %v6308_v24, 0.0 }
 0x44d   :  { %2390 = vadd.xlane.f32.xlu0 %v2389_v55  ;;  %2277 = vadd.xlane.f32.xlu1 %v2276_v28  ;;  %v2832_v32 = vsel %vm95_vm2, %v6323_v54, 0.0  ;;  %v2942_v22 = vsel %vm95_vm2, %v6338_v35, 0.0  ;;  %v3159_v19 = vsel %vm95_vm2, %v6335_v46, 0.0  ;;  %v2936_v30 = vpop.f32.mrf.mxu2 }
 0x452   :  { %v3153_v63 = vpop.f32.mrf.mxu0 }
 0x453   :  { %v2235_v27 = vpop.f32.mrf.mxu3 }
 0x454   :  { %v6284_v45 = vadd.f32 %v3428_v38, %v2235_v27  ;;  %v6350_v38 = vadd.f32 %v3153_v63, %v6262_v59 }
 0x455   :  { %2500 = vadd.xlane.f32.xlu0 %v2499_v47  ;;  %2393 = vadd.xlane.f32.xlu1 %v2392_v13 }
 0x456   :  { %v6287_v25 = vadd.f32 %v2270_v37, %v6284_v45  ;;  %v6302_v49 = vadd.f32 %v2386_v57, %v6284_v45  ;;  %v6317_v48 = vadd.f32 %v2496_v10, %v6284_v45  ;;  %v6332_v41 = vadd.f32 %v2716_v9, %v6284_v45 }
 0x457   :  { %v6347_v42 = vadd.f32 %v2826_v18, %v6284_v45  ;;  %v3162_v39 = vsel %vm95_vm2, %v6350_v38, 0.0  ;;  %v6362_v43 = vadd.f32 %v2936_v30, %v6284_v45 }
 0x458   :  { %v2279_v44 = vsel %vm95_vm2, %v6287_v25, 0.0  ;;  %v2395_v7 = vsel %vm95_vm2, %v6302_v49, 0.0  ;;  %v2505_v58 = vsel %vm95_vm2, %v6317_v48, 0.0  ;;  %v2725_v21 = vsel %vm95_vm2, %v6332_v41, 0.0 }
 0x459   :  { %2280 = vadd.xlane.f32.xlu2 %v2279_v44  ;;  %v2835_v62 = vsel %vm95_vm2, %v6347_v42, 0.0  ;;  %v2945_v28 = vsel %vm95_vm2, %v6362_v43, 0.0 }
 0x45a   :  { %v3156_v40 = vpop.f32.mrf.mxu0 }
 0x45b   :  { %v2600_v34 = vpop.f32.mrf.mxu3  ;;  %v6377_v13 = vadd.f32 %v3156_v40, %v6284_v45 }
 0x45c   :  { %v6353_v26 = vadd.f32 %v2600_v34, %v6255_v4 }
 0x45d   :  { %2720 = vadd.xlane.f32.xlu0 %v2719_v60  ;;  %2503 = vadd.xlane.f32.xlu1 %v2502_v33  ;;  %v3165_v27 = vsel %vm95_vm2, %v6377_v13, 0.0 }
 0x45e   :  { %v2609_v37 = vsel %vm95_vm2, %v6353_v26, 0.0 }
 0x461   :  { %2396 = vadd.xlane.f32.xlu2 %v2395_v7 }
 0x463   :  { %v2603_v23 = vpop.f32.mrf.mxu3 }
 0x464   :  { %v6365_v5 = vadd.f32 %v2603_v23, %v6262_v59 }
 0x465   :  { %2830 = vadd.xlane.f32.xlu0 %v2829_v56  ;;  %2723 = vadd.xlane.f32.xlu1 %v2722_v0 }
 0x466   :  { %v2612_v57 = vsel %vm95_vm2, %v6365_v5, 0.0 }
 0x469   :  { %2506 = vadd.xlane.f32.xlu2 %v2505_v58 }
 0x46b   :  { %v2606_v17 = vpop.f32.mrf.mxu3 }
 0x46c   :  { %v6387_v44 = vadd.f32 %v2606_v17, %v6284_v45 }
 0x46d   :  { %2940 = vadd.xlane.f32.xlu0 %v2939_v6  ;;  %2833 = vadd.xlane.f32.xlu1 %v2832_v32 }
 0x46e   :  { %v2615_v10 = vsel %vm95_vm2, %v6387_v44, 0.0 }
 0x471   :  { %2726 = vadd.xlane.f32.xlu2 %v2725_v21 }
 0x473   :  { %v3040_v3 = vpop.f32.mrf.mxu3 }
 0x474   :  { %v6368_v55 = vadd.f32 %v3040_v3, %v6255_v4 }
 0x475   :  { %2943 = vadd.xlane.f32.xlu1 %v2942_v22  ;;  %3160 = vadd.xlane.f32.xlu0 %v3159_v19 }
 0x476   :  { %v3049_v15 = vsel %vm95_vm2, %v6368_v55, 0.0 }
 0x479   :  { %2836 = vadd.xlane.f32.xlu2 %v2835_v62 }
 0x47b   :  { %v3043_v47 = vpop.f32.mrf.mxu3 }
 0x47c   :  { %v6380_v4 = vadd.f32 %v3043_v47, %v6262_v59 }
 0x47d   :  { %3163 = vadd.xlane.f32.xlu1 %v3162_v39  ;;  %2610 = vadd.xlane.f32.xlu0 %v2609_v37 }
 0x47e   :  { %v3052_v14 = vsel %vm95_vm2, %v6380_v4, 0.0 }
 0x481   :  { %2946 = vadd.xlane.f32.xlu2 %v2945_v28 }
 0x483   :  { %v3046_v60 = vpop.f32.mrf.mxu3 }
 0x484   :  { %v6392_v33 = vadd.f32 %v3046_v60, %v6284_v45 }
 0x485   :  { %2613 = vadd.xlane.f32.xlu1 %v2612_v57  ;;  %3050 = vadd.xlane.f32.xlu0 %v3049_v15 }
 0x486   :  { %v3055_v59 = vsel %vm95_vm2, %v6392_v33, 0.0 }
 0x489   :  { %3166 = vadd.xlane.f32.xlu2 %v3165_v27 }
 0x48d   :  { %3053 = vadd.xlane.f32.xlu1 %v3052_v14 }
 0x491   :  { %2616 = vadd.xlane.f32.xlu2 %v2615_v10 }
 0x499   :  { %3056 = vadd.xlane.f32.xlu2 %v3055_v59 }
 0x4b8   :  { %v2275_v52 = vpop.xlane.xlu0 %2274 }
 0x4b9   :  { %v2282_v34 = vmul.f32 %v2275_v52, %v3966_v2 }
 0x4bb   :  { %v6398_v9 = vsub.f32 %v6258_v16, %v2282_v34 }
 0x4bd   :  { %v2288_v7 = vmul.f32 %v6398_v9, %v6398_v9 }
 0x4bf   :  { %v2291_v56 = vsel %vm95_vm2, %v2288_v7, 0.0 }
 0x4c0   :  { %v2278_v0 = vpop.xlane.xlu1 %2277  ;;  %2292 = vadd.xlane.f32.xlu0 %v2291_v56  ;;  %v2391_v11 = vpop.xlane.xlu0 %2390 }
 0x4c1   :  { %v2283_v45 = vmul.f32 %v2278_v0, %v3966_v2  ;;  %v2398_v12 = vmul.f32 %v2391_v11, %v3966_v2 }
 0x4c3   :  { %v6406_v23 = vsub.f32 %v6268_v61, %v2283_v45  ;;  %v6409_v58 = vsub.f32 %v6265_v53, %v2398_v12 }
 0x4c5   :  { %v2289_v16 = vmul.f32 %v6406_v23, %v6406_v23  ;;  %v2404_v1 = vmul.f32 %v6409_v58, %v6409_v58 }
 0x4c7   :  { %v2294_v6 = vsel %vm95_vm2, %v2289_v16, 0.0  ;;  %v2407_v32 = vsel %vm95_vm2, %v2404_v1, 0.0 }
 0x4c8   :  { %v2394_v50 = vpop.xlane.xlu1 %2393  ;;  %2295 = vadd.xlane.f32.xlu1 %v2294_v6  ;;  %2408 = vadd.xlane.f32.xlu0 %v2407_v32  ;;  %v2501_v17 = vpop.xlane.xlu0 %2500 }
 0x4c9   :  { %v2399_v61 = vmul.f32 %v2394_v50, %v3966_v2  ;;  %v2508_v21 = vmul.f32 %v2501_v17, %v3966_v2 }
 0x4cb   :  { %v6420_v53 = vsub.f32 %v6278_v51, %v2399_v61  ;;  %v6423_v22 = vsub.f32 %v6275_v36, %v2508_v21 }
 0x4cc   :  { %v2281_v63 = vpop.xlane.xlu2 %2280 }
 0x4cd   :  { %v2405_v19 = vmul.f32 %v6420_v53, %v6420_v53  ;;  %v2514_v18 = vmul.f32 %v6423_v22, %v6423_v22  ;;  %v2284_v62 = vmul.f32 %v2281_v63, %v3966_v2 }
 0x4cf   :  { %v2410_v3 = vsel %vm95_vm2, %v2405_v19, 0.0  ;;  %v2517_v39 = vsel %vm95_vm2, %v2514_v18, 0.0  ;;  %v6433_v36 = vsub.f32 %v6287_v25, %v2284_v62 }
 0x4d0   :  { %v2504_v37 = vpop.xlane.xlu1 %2503  ;;  %2411 = vadd.xlane.f32.xlu1 %v2410_v3  ;;  %2518 = vadd.xlane.f32.xlu0 %v2517_v39  ;;  %v2721_v51 = vpop.xlane.xlu0 %2720 }
 0x4d1   :  { %v2509_v30 = vmul.f32 %v2504_v37, %v3966_v2  ;;  %v2728_v28 = vmul.f32 %v2721_v51, %v3966_v2  ;;  %v2290_v15 = vmul.f32 %v6433_v36, %v6433_v36 }
 0x4d3   :  { %v6438_v40 = vsub.f32 %v6293_v31, %v2509_v30  ;;  %v6441_v57 = vsub.f32 %v6290_v8, %v2728_v28  ;;  %v2297_v47 = vsel %vm95_vm2, %v2290_v15, 0.0 }
 0x4d4   :  { %2298 = vadd.xlane.f32.xlu2 %v2297_v47  ;;  %v2397_v14 = vpop.xlane.xlu2 %2396 }
 0x4d5   :  { %v2515_v27 = vmul.f32 %v6438_v40, %v6438_v40  ;;  %v2734_v25 = vmul.f32 %v6441_v57, %v6441_v57  ;;  %v2400_v10 = vmul.f32 %v2397_v14, %v3966_v2 }
 0x4d7   :  { %v2520_v31 = vsel %vm95_vm2, %v2515_v27, 0.0  ;;  %v2737_v8 = vsel %vm95_vm2, %v2734_v25, 0.0  ;;  %v6454_v52 = vsub.f32 %v6302_v49, %v2400_v10 }
 0x4d8   :  { %v2724_v60 = vpop.xlane.xlu1 %2723  ;;  %2521 = vadd.xlane.f32.xlu1 %v2520_v31  ;;  %2738 = vadd.xlane.f32.xlu0 %v2737_v8  ;;  %v2831_v59 = vpop.xlane.xlu0 %2830 }
 0x4d9   :  { %v2729_v34 = vmul.f32 %v2724_v60, %v3966_v2  ;;  %v2838_v7 = vmul.f32 %v2831_v59, %v3966_v2  ;;  %v2406_v11 = vmul.f32 %v6454_v52, %v6454_v52 }
 0x4db   :  { %v6459_v56 = vsub.f32 %v6308_v24, %v2729_v34  ;;  %v6462_v0 = vsub.f32 %v6305_v20, %v2838_v7  ;;  %v2413_v45 = vsel %vm95_vm2, %v2406_v11, 0.0 }
 0x4dc   :  { %2414 = vadd.xlane.f32.xlu2 %v2413_v45  ;;  %v2507_v16 = vpop.xlane.xlu2 %2506 }
 0x4dd   :  { %v2735_v12 = vmul.f32 %v6459_v56, %v6459_v56  ;;  %v2844_v49 = vmul.f32 %v6462_v0, %v6462_v0  ;;  %v2510_v1 = vmul.f32 %v2507_v16, %v3966_v2 }
 0x4df   :  { %v2740_v24 = vsel %vm95_vm2, %v2735_v12, 0.0  ;;  %v2847_v20 = vsel %vm95_vm2, %v2844_v49, 0.0  ;;  %v6475_v50 = vsub.f32 %v6317_v48, %v2510_v1 }
 0x4e0   :  { %v2834_v6 = vpop.xlane.xlu1 %2833  ;;  %2741 = vadd.xlane.f32.xlu1 %v2740_v24  ;;  %2848 = vadd.xlane.f32.xlu0 %v2847_v20  ;;  %v2941_v32 = vpop.xlane.xlu0 %2940 }
 0x4e1   :  { %v2839_v17 = vmul.f32 %v2834_v6, %v3966_v2  ;;  %v2948_v61 = vmul.f32 %v2941_v32, %v3966_v2  ;;  %v2516_v18 = vmul.f32 %v6475_v50, %v6475_v50 }
 0x4e3   :  { %v6480_v21 = vsub.f32 %v6323_v54, %v2839_v17  ;;  %v6483_v19 = vsub.f32 %v6320_v29, %v2948_v61  ;;  %v2523_v63 = vsel %vm95_vm2, %v2516_v18, 0.0 }
 0x4e4   :  { %2524 = vadd.xlane.f32.xlu2 %v2523_v63  ;;  %v2727_v3 = vpop.xlane.xlu2 %2726 }
 0x4e5   :  { %v2845_v62 = vmul.f32 %v6480_v21, %v6480_v21  ;;  %v2954_v48 = vmul.f32 %v6483_v19, %v6483_v19  ;;  %v2730_v39 = vmul.f32 %v2727_v3, %v3966_v2 }
 0x4e7   :  { %v2850_v54 = vsel %vm95_vm2, %v2845_v62, 0.0  ;;  %v2957_v29 = vsel %vm95_vm2, %v2954_v48, 0.0  ;;  %v6496_v30 = vsub.f32 %v6332_v41, %v2730_v39 }
 0x4e8   :  { %v2944_v37 = vpop.xlane.xlu1 %2943  ;;  %2851 = vadd.xlane.f32.xlu1 %v2850_v54  ;;  %2958 = vadd.xlane.f32.xlu0 %v2957_v29  ;;  %v3161_v51 = vpop.xlane.xlu0 %3160 }
 0x4e9   :  { %v2949_v28 = vmul.f32 %v2944_v37, %v3966_v2  ;;  %v2736_v47 = vmul.f32 %v6496_v30, %v6496_v30  ;;  %v3168_v20 = vmul.f32 %v3161_v51, %v3966_v2 }
 0x4eb   :  { %v6500_v15 = vsub.f32 %v6338_v35, %v2949_v28  ;;  %v2743_v27 = vsel %vm95_vm2, %v2736_v47, 0.0  ;;  %v6543_v62 = vsub.f32 %v6335_v46, %v3168_v20 }
 0x4ec   :  { %2744 = vadd.xlane.f32.xlu2 %v2743_v27  ;;  %v2837_v14 = vpop.xlane.xlu2 %2836 }
 0x4ed   :  { %v2955_v25 = vmul.f32 %v6500_v15, %v6500_v15  ;;  %v2840_v10 = vmul.f32 %v2837_v14, %v3966_v2  ;;  %v3174_v29 = vmul.f32 %v6543_v62, %v6543_v62 }
 0x4ef   :  { %v2960_v41 = vsel %vm95_vm2, %v2955_v25, 0.0  ;;  %v6510_v35 = vsub.f32 %v6347_v42, %v2840_v10  ;;  %v3177_v27 = vsel %vm95_vm2, %v3174_v29, 0.0 }
 0x4f0   :  { %v3164_v31 = vpop.xlane.xlu1 %3163  ;;  %2961 = vadd.xlane.f32.xlu1 %v2960_v41  ;;  %v2611_v8 = vpop.xlane.xlu0 %2610 }
 0x4f1   :  { %v2618_v60 = vmul.f32 %v2611_v8, %v3966_v2  ;;  %v2846_v34 = vmul.f32 %v6510_v35, %v6510_v35  ;;  %v3169_v39 = vmul.f32 %v3164_v31, %v3966_v2 }
 0x4f3   :  { %v6514_v59 = vsub.f32 %v6353_v26, %v2618_v60  ;;  %v2853_v7 = vsel %vm95_vm2, %v2846_v34, 0.0  ;;  %v6557_v51 = vsub.f32 %v6350_v38, %v3169_v39 }
 0x4f4   :  { %2854 = vadd.xlane.f32.xlu2 %v2853_v7  ;;  %v2947_v45 = vpop.xlane.xlu2 %2946 }
 0x4f5   :  { %v2624_v11 = vmul.f32 %v6514_v59, %v6514_v59  ;;  %v2950_v12 = vmul.f32 %v2947_v45, %v3966_v2  ;;  %v3175_v14 = vmul.f32 %v6557_v51, %v6557_v51 }
 0x4f7   :  { %v2627_v42 = vsel %vm95_vm2, %v2624_v11, 0.0  ;;  %v6524_v26 = vsub.f32 %v6362_v43, %v2950_v12  ;;  %v3180_v31 = vsel %vm95_vm2, %v3175_v14, 0.0 }
 0x4f8   :  { %v2614_v49 = vpop.xlane.xlu1 %2613  ;;  %2628 = vadd.xlane.f32.xlu0 %v2627_v42  ;;  %v3051_v16 = vpop.xlane.xlu0 %3050 }
 0x4f9   :  { %v2619_v1 = vmul.f32 %v2614_v49, %v3966_v2  ;;  %v3058_v24 = vmul.f32 %v3051_v16, %v3966_v2  ;;  %v2956_v17 = vmul.f32 %v6524_v26, %v6524_v26 }
 0x4fb   :  { %v6530_v6 = vsub.f32 %v6365_v5, %v2619_v1  ;;  %v6533_v32 = vsub.f32 %v6368_v55, %v3058_v24  ;;  %v2963_v61 = vsel %vm95_vm2, %v2956_v17, 0.0 }
 0x4fc   :  { %2964 = vadd.xlane.f32.xlu2 %v2963_v61  ;;  %v3167_v63 = vpop.xlane.xlu2 %3166 }
 0x4fd   :  { %v2625_v43 = vmul.f32 %v6530_v6, %v6530_v6  ;;  %v3064_v18 = vmul.f32 %v6533_v32, %v6533_v32  ;;  %v3170_v8 = vmul.f32 %v3167_v63, %v3966_v2 }
 0x4ff   :  { %v2630_v5 = vsel %vm95_vm2, %v2625_v43, 0.0  ;;  %v3067_v55 = vsel %vm95_vm2, %v3064_v18, 0.0  ;;  %v6579_v34 = vsub.f32 %v6377_v13, %v3170_v8 }
 0x500   :  { %2631 = vadd.xlane.f32.xlu1 %v2630_v5  ;;  %v3054_v48 = vpop.xlane.xlu1 %3053  ;;  %3068 = vadd.xlane.f32.xlu0 %v3067_v55 }
 0x501   :  { %v3059_v3 = vmul.f32 %v3054_v48, %v3966_v2  ;;  %v3176_v11 = vmul.f32 %v6579_v34, %v6579_v34 }
 0x503   :  { %v6550_v54 = vsub.f32 %v6380_v4, %v3059_v3  ;;  %v3183_v45 = vsel %vm95_vm2, %v3176_v11, 0.0 }
 0x504   :  { %v2617_v37 = vpop.xlane.xlu2 %2616 }
 0x505   :  { %v3065_v46 = vmul.f32 %v6550_v54, %v6550_v54  ;;  %v2620_v28 = vmul.f32 %v2617_v37, %v3966_v2 }
 0x507   :  { %v3070_v47 = vsel %vm95_vm2, %v3065_v46, 0.0  ;;  %v6563_v4 = vsub.f32 %v6387_v44, %v2620_v28 }
 0x508   :  { %3071 = vadd.xlane.f32.xlu1 %v3070_v47  ;;  %3178 = vadd.xlane.f32.xlu0 %v3177_v27 }
 0x509   :  { %v2626_v25 = vmul.f32 %v6563_v4, %v6563_v4 }
 0x50b   :  { %v2633_v38 = vsel %vm95_vm2, %v2626_v25, 0.0 }
 0x50c   :  { %2634 = vadd.xlane.f32.xlu2 %v2633_v38  ;;  %v3057_v10 = vpop.xlane.xlu2 %3056 }
 0x50d   :  { %v3060_v41 = vmul.f32 %v3057_v10, %v3966_v2 }
 0x50f   :  { %v6574_v44 = vsub.f32 %v6392_v33, %v3060_v41 }
 0x510   :  { %3181 = vadd.xlane.f32.xlu1 %v3180_v31 }
 0x511   :  { %v3066_v60 = vmul.f32 %v6574_v44, %v6574_v44 }
 0x513   :  { %v3073_v7 = vsel %vm95_vm2, %v3066_v60, 0.0 }
 0x514   :  { %3074 = vadd.xlane.f32.xlu2 %v3073_v7 }
 0x51c   :  { %3184 = vadd.xlane.f32.xlu2 %v3183_v45 }
 0x533   :  { %v2293_v12 = vpop.xlane.xlu0 %2292 }
 0x534   :  { %v2300_v42 = vmul.f32 %v2293_v12, %v3966_v2 }
 0x536   :  { %v2303_v33 = vadd.f32 1e-05, %v2300_v42 }
 0x538   :  { %3541 = vrsqrt.f32 %v2303_v33  ;;  %vm2312_vm1 = vweird.f32 %v2303_v33 }
 0x53b   :  { %v2296_v49 = vpop.xlane.xlu1 %2295  ;;  %v2409_v16 = vpop.xlane.xlu0 %2408 }
 0x53c   :  { %v2301_v1 = vmul.f32 %v2296_v49, %v3966_v2  ;;  %v2416_v13 = vmul.f32 %v2409_v16, %v3966_v2 }
 0x53e   :  { %v3542_v24 = vpop.eup %3541  ;;  %v2304_v20 = vadd.f32 1e-05, %v2301_v1  ;;  %v2419_v17 = vadd.f32 1e-05, %v2416_v13 }
 0x53f   :  { %v2307_v61 = vmul.f32 %v3542_v24, %v2303_v33  ;;  %vm2313_vm0 = vweird.f32 %v3542_v24 }
 0x540   :  { %3543 = vrsqrt.f32 %v2304_v20  ;;  %vm6606_vm3 = vmor %vm2312_vm1, %vm2313_vm0  ;;  %vm2428_vm5 = vweird.f32 %v2419_v17  ;;  %vm2322_vm7 = vweird.f32 %v2304_v20 }
 0x541   :  { %v2308_v43 = vmul.f32 %v3542_v24, %v2307_v61  ;;  %3545 = vrsqrt.f32 %v2419_v17 }
 0x543   :  { %v2309_v18 = vmul.f32 0.5, %v2308_v43  ;;  %v2412_v63 = vpop.xlane.xlu1 %2411  ;;  %v2519_v5 = vpop.xlane.xlu0 %2518 }
 0x544   :  { %v2417_v55 = vmul.f32 %v2412_v63, %v3966_v2  ;;  %v2526_v48 = vmul.f32 %v2519_v5, %v3966_v2 }
 0x545   :  { %v2310_v37 = vsub.f32 1.5, %v2309_v18 }
 0x546   :  { %v6590_v3 = vpop.eup %3543  ;;  %v6592_v39 = vadd.f32 1e-05, %v2417_v55  ;;  %v6594_v29 = vadd.f32 1e-05, %v2526_v48 }
 0x547   :  { %v3546_v46 = vpop.eup %3545  ;;  %v2317_v28 = vmul.f32 %v6590_v3, %v2304_v20  ;;  %v2299_v25 = vpop.xlane.xlu2 %2298  ;;  %v2311_v10 = vmul.f32 %v3542_v24, %v2310_v37  ;;  %vm2323_vm6 = vweird.f32 %v6590_v3 }
 0x548   :  { %v2423_v47 = vmul.f32 %v3546_v46, %v2419_v17  ;;  %3547 = vrsqrt.f32 %v6592_v39  ;;  %v2302_v38 = vmul.f32 %v2299_v25, %v3966_v2  ;;  %vm2429_vm4 = vweird.f32 %v3546_v46  ;;  %v6629_v17 = vld [vmem:[%s7126_s11] ss:$0 sm:$0xff]  ;;  %vm6635_vm9 = vmor %vm2322_vm7, %vm2323_vm6 }
 0x549   :  { %v2318_v27 = vmul.f32 %v6590_v3, %v2317_v28  ;;  %3549 = vrsqrt.f32 %v6594_v29  ;;  %v2315_v13 = vsel %vm6606_vm3, %v3542_v24, %v2311_v10  ;;  %vm2430_vm8 = vmor %vm2428_vm5, %vm2429_vm4  ;;  %vm2438_vm10 = vweird.f32 %v6592_v39 }
 0x54a   :  { %v2424_v14 = vmul.f32 %v3546_v46, %v2423_v47  ;;  %v6601_v7 = vadd.f32 1e-05, %v2302_v38  ;;  %v2336_v55 = vmul.f32 %v2315_v13, %v6398_v9  ;;  %vm2538_vm15 = vweird.f32 %v6594_v29 }
 0x54b   :  { %v2319_v41 = vmul.f32 0.5, %v2318_v27  ;;  %v2522_v31 = vpop.xlane.xlu1 %2521  ;;  %v2739_v8 = vpop.xlane.xlu0 %2738 }
 0x54c   :  { %v2425_v60 = vmul.f32 0.5, %v2424_v14  ;;  %v2527_v11 = vmul.f32 %v2522_v31, %v3966_v2  ;;  %3551 = vrsqrt.f32 %v6601_v7  ;;  %v2746_v16 = vmul.f32 %v2739_v8, %v3966_v2  ;;  %v6653_v31 = vld [vmem:[%s7127_s12] ss:$0 sm:$0xff]  ;;  %s3630_s12 = smov 32  }
 0x54d   :  { %v2320_v45 = vsub.f32 1.5, %v2319_v41  ;;  %v2342_v8 = vmul.f32 %v6629_v17, %v2336_v55  ;;  %vm2332_vm3 = vweird.f32 %v6601_v7 }
 0x54e   :  { %v6604_v12 = vpop.eup %3547  ;;  %v2426_v49 = vsub.f32 1.5, %v2425_v60  ;;  %v6618_v61 = vadd.f32 1e-05, %v2527_v11  ;;  %v6633_v28 = vadd.f32 1e-05, %v2746_v16 }
 0x54f   :  { %v6612_v1 = vpop.eup %3549  ;;  %v2433_v33 = vmul.f32 %v6604_v12, %v6592_v39  ;;  %v2321_v43 = vmul.f32 %v6590_v3, %v2320_v45  ;;  %v2415_v24 = vpop.xlane.xlu2 %2414  ;;  %vm2439_vm11 = vweird.f32 %v6604_v12 }
 0x550   :  { %v2427_v18 = vmul.f32 %v3546_v46, %v2426_v49  ;;  %v2533_v63 = vmul.f32 %v6612_v1, %v6594_v29  ;;  %3553 = vrsqrt.f32 %v6618_v61  ;;  %v2418_v27 = vmul.f32 %v2415_v24, %v3966_v2  ;;  %vm6669_vm13 = vmor %vm2438_vm10, %vm2439_vm11 }
 0x551   :  { %v2434_v5 = vmul.f32 %v6604_v12, %v2433_v33  ;;  %v2325_v14 = vsel %vm6635_vm9, %v6590_v3, %v2321_v43  ;;  %3555 = vrsqrt.f32 %v6633_v28  ;;  %vm2539_vm12 = vweird.f32 %v6612_v1 }
 0x552   :  { %v2431_v48 = vsel %vm2430_vm8, %v3546_v46, %v2427_v18  ;;  %v2534_v37 = vmul.f32 %v6612_v1, %v2533_v63  ;;  %v6640_v25 = vpop.eup %3551  ;;  %v6657_v3 = vadd.f32 1e-05, %v2418_v27  ;;  %v2337_v45 = vmul.f32 %v2325_v14, %v6406_v23  ;;  %vm2540_vm14 = vmor %vm2538_vm15, %vm2539_vm12 }
 0x553   :  { %v2435_v47 = vmul.f32 0.5, %v2434_v5  ;;  %v2452_v9 = vmul.f32 %v2431_v48, %v6409_v58  ;;  %v2327_v10 = vmul.f32 %v6640_v25, %v6601_v7  ;;  %v2742_v41 = vpop.xlane.xlu1 %2741  ;;  %v2849_v60 = vpop.xlane.xlu0 %2848  ;;  %v2348_v24 = vadd.f32 %v6653_v31, %v2342_v8 }
 0x554   :  { %v2535_v46 = vmul.f32 0.5, %v2534_v37  ;;  %v2747_v43 = vmul.f32 %v2742_v41, %v3966_v2  ;;  %3557 = vrsqrt.f32 %v6657_v3  ;;  %v2856_v63 = vmul.f32 %v2849_v60, %v3966_v2 }
 0x555   :  { %v2436_v38 = vsub.f32 1.5, %v2435_v47  ;;  %v2328_v49 = vmul.f32 %v6640_v25, %v2327_v10  ;;  %v2455_v16 = vmul.f32 %v6629_v17, %v2452_v9  ;;  %v2343_v37 = vmul.f32 %v6629_v17, %v2337_v45 }
 0x556   :  { %v2536_v58 = vsub.f32 1.5, %v2535_v46  ;;  %v3554_v11 = vpop.eup %3553  ;;  %vm2333_vm0 = vweird.f32 %v6640_v25  ;;  %v6688_v9 = vadd.f32 1e-05, %v2747_v43  ;;  %vm2548_vm5 = vweird.f32 %v6618_v61 }
 0x557   :  { %v2437_v42 = vmul.f32 %v6604_v12, %v2436_v38  ;;  %v2543_v33 = vmul.f32 %v3554_v11, %v6618_v61  ;;  %v2329_v23 = vmul.f32 0.5, %v2328_v49  ;;  %v6676_v5 = vpop.eup %3555  ;;  %v2525_v48 = vpop.xlane.xlu2 %2524  ;;  %v2458_v27 = vadd.f32 %v6653_v31, %v2455_v16  ;;  %vm6704_vm4 = vmor %vm2332_vm3, %vm2333_vm0 }
 0x558   :  { %v2537_v13 = vmul.f32 %v6612_v1, %v2536_v58  ;;  %v2753_v47 = vmul.f32 %v6676_v5, %v6633_v28  ;;  %vm2549_vm1 = vweird.f32 %v3554_v11  ;;  %v6692_v38 = vadd.f32 1e-05, %v2856_v63 }
 0x559   :  { %v2441_v55 = vsel %vm6669_vm13, %v6604_v12, %v2437_v42  ;;  %v2544_v39 = vmul.f32 %v3554_v11, %v2543_v33  ;;  %v2330_v20 = vsub.f32 1.5, %v2329_v23  ;;  %3559 = vrsqrt.f32 %v6688_v9  ;;  %vm2550_vm6 = vmor %vm2548_vm5, %vm2549_vm1 }
 0x55a   :  { %v2541_v29 = vsel %vm2540_vm14, %v6612_v1, %v2537_v13  ;;  %v2453_v12 = vmul.f32 %v2441_v55, %v6420_v53  ;;  %v2754_v46 = vmul.f32 %v6676_v5, %v2753_v47  ;;  %v3558_v8 = vpop.eup %3557  ;;  %v2351_v58 = vmax.f32 %v2348_v24, 0.0 }
 0x55b   :  { %v2545_v14 = vmul.f32 0.5, %v2544_v39  ;;  %v2562_v1 = vmul.f32 %v2541_v29, %v6423_v22  ;;  %v2331_v10 = vmul.f32 %v6640_v25, %v2330_v20  ;;  %3561 = vrsqrt.f32 %v6692_v38  ;;  %v2852_v24 = vpop.xlane.xlu1 %2851 }
 0x55c   :  { %v2755_v60 = vmul.f32 0.5, %v2754_v46  ;;  %v6700_v53 = vadd.f32 %v6653_v31, %v2343_v37  ;;  %v2443_v42 = vmul.f32 %v3558_v8, %v6657_v3  ;;  %v2461_v49 = vmax.f32 %v2458_v27, 0.0  ;;  %v2959_v27 = vpop.xlane.xlu0 %2958 }
 0x55d   :  { %v2546_v41 = vsub.f32 1.5, %v2545_v14  ;;  %v2456_v7 = vmul.f32 %v6629_v17, %v2453_v12  ;;  %vm2758_vm7 = vweird.f32 %v6633_v28  ;;  %v2565_v13 = vmul.f32 %v6629_v17, %v2562_v1 }
 0x55e   :  { %v2756_v16 = vsub.f32 1.5, %v2755_v60  ;;  %v2335_v33 = vsel %vm6704_vm4, %v6640_v25, %v2331_v10  ;;  %v2444_v18 = vmul.f32 %v3558_v8, %v2443_v42  ;;  %vm2759_vm8 = vweird.f32 %v6676_v5 }
 0x55f   :  { %v2547_v22 = vmul.f32 %v3554_v11, %v2546_v41  ;;  %v2528_v63 = vmul.f32 %v2525_v48, %v3966_v2  ;;  %v6721_v55 = vpop.eup %3559  ;;  %v2352_v39 = vmax.f32 %v6700_v53, 0.0  ;;  %vm2448_vm9 = vweird.f32 %v6657_v3  ;;  %vm6737_vm10 = vmor %vm2758_vm7, %vm2759_vm8 }
 0x560   :  { %v2757_v23 = vmul.f32 %v6676_v5, %v2756_v16  ;;  %v2445_v37 = vmul.f32 0.5, %v2444_v18  ;;  %v2857_v25 = vmul.f32 %v2852_v24, %v3966_v2  ;;  %v2459_v20 = vadd.f32 %v6653_v31, %v2456_v7 }
 0x561   :  { %v2551_v43 = vsel %vm2550_vm6, %v3554_v11, %v2547_v22  ;;  %v2745_v11 = vpop.xlane.xlu2 %2744  ;;  %v6726_v29 = vpop.eup %3561  ;;  %v2338_v47 = vmul.f32 %v2335_v33, %v6433_v36  ;;  %v2763_v48 = vmul.f32 %v6721_v55, %v6688_v9  ;;  %v2568_v14 = vadd.f32 %v6653_v31, %v2565_v13 }
 0x562   :  { %v2563_v61 = vmul.f32 %v2551_v43, %v6438_v40  ;;  %v3234_v40 = vmax.f32 %v2351_v58, %v2461_v49  ;;  %v2446_v46 = vsub.f32 1.5, %v2445_v37  ;;  %vm2449_vm11 = vweird.f32 %v3558_v8 }
 0x563   :  { %v2863_v1 = vmul.f32 %v6726_v29, %v6692_v38  ;;  %v2761_v10 = vsel %vm6737_vm10, %v6676_v5, %v2757_v23  ;;  %v2764_v41 = vmul.f32 %v6721_v55, %v2763_v48  ;;  %vm2768_vm12 = vweird.f32 %v6688_v9  ;;  %vm2450_vm13 = vmor %vm2448_vm9, %vm2449_vm11 }
 0x564   :  { %v2566_v36 = vmul.f32 %v6629_v17, %v2563_v61  ;;  %v6749_v28 = vadd.f32 1e-05, %v2528_v63  ;;  %v2447_v58 = vmul.f32 %v3558_v8, %v2446_v46  ;;  %v6752_v53 = vadd.f32 1e-05, %v2857_v25  ;;  %v2962_v61 = vpop.xlane.xlu1 %2961 }
 0x565   :  { %v2864_v60 = vmul.f32 %v6726_v29, %v2863_v1  ;;  %v2966_v45 = vmul.f32 %v2959_v27, %v3966_v2  ;;  %v2462_v22 = vmax.f32 %v2459_v20, 0.0  ;;  %v2344_v42 = vmul.f32 %v6629_v17, %v2338_v47 }
 0x566   :  { %v2765_v5 = vmul.f32 0.5, %v2764_v41  ;;  %3563 = vrsqrt.f32 %v6749_v28  ;;  %v2782_v49 = vmul.f32 %v2761_v10, %v6441_v57  ;;  %v2451_v7 = vsel %vm2450_vm13, %v3558_v8, %v2447_v58 }
 0x567   :  { %v2865_v16 = vmul.f32 0.5, %v2864_v60  ;;  %3565 = vrsqrt.f32 %v6752_v53  ;;  %v2571_v13 = vmax.f32 %v2568_v14, 0.0  ;;  %v2569_v33 = vadd.f32 %v6653_v31, %v2566_v36 }
 0x568   :  { %v2454_v43 = vmul.f32 %v2451_v7, %v6454_v52  ;;  %v2766_v18 = vsub.f32 1.5, %v2765_v5  ;;  %vm2769_vm15 = vweird.f32 %v6721_v55  ;;  %v6764_v23 = vadd.f32 1e-05, %v2966_v45 }
 0x569   :  { %v2866_v3 = vsub.f32 1.5, %v2865_v16  ;;  %v2748_v63 = vmul.f32 %v2745_v11, %v3966_v2  ;;  %v2855_v24 = vpop.xlane.xlu2 %2854  ;;  %v2967_v37 = vmul.f32 %v2962_v61, %v3966_v2  ;;  %v2350_v52 = vadd.f32 %v6653_v31, %v2344_v42  ;;  %vm6787_vm0 = vmor %vm2768_vm12, %vm2769_vm15 }
 0x56a   :  { %v2457_v57 = vmul.f32 %v6629_v17, %v2454_v43  ;;  %v2767_v8 = vmul.f32 %v6721_v55, %v2766_v18  ;;  %v2858_v25 = vmul.f32 %v2855_v24, %v3966_v2  ;;  %v2785_v20 = vmul.f32 %v6629_v17, %v2782_v49 }
 0x56b   :  { %3567 = vrsqrt.f32 %v6764_v23  ;;  %v6774_v47 = vadd.f32 1e-05, %v2748_v63  ;;  %v3235_v11 = vmax.f32 %v2352_v39, %v2462_v22  ;;  %v2572_v27 = vmax.f32 %v2569_v33, 0.0 }
 0x56c   :  { %v6776_v48 = vpop.eup %3563  ;;  %vm2868_vm14 = vweird.f32 %v6692_v38  ;;  %v6779_v14 = vadd.f32 1e-05, %v2967_v37  ;;  %v6781_v46 = vmax.f32 %v3234_v40, %v2571_v13  ;;  %vm2869_vm1 = vweird.f32 %v6726_v29 }
 0x56d   :  { %v3566_v12 = vpop.eup %3565  ;;  %v2553_v39 = vmul.f32 %v6776_v48, %v6749_v28  ;;  %v6794_v36 = vadd.f32 1e-05, %v2858_v25  ;;  %v2460_v10 = vadd.f32 %v6653_v31, %v2457_v57  ;;  %v2771_v40 = vsel %vm6787_vm0, %v6721_v55, %v2767_v8  ;;  %v2629_v55 = vpop.xlane.xlu0 %2628  ;;  %vm6818_vm4 = vmor %vm2868_vm14, %vm2869_vm1 }
 0x56e   :  { %v2867_v41 = vmul.f32 %v6726_v29, %v2866_v3  ;;  %v2873_v9 = vmul.f32 %v3566_v12, %v6752_v53  ;;  %v2353_v58 = vmax.f32 %v2350_v52, 0.0  ;;  %v6803_v60 = vadd.f32 %v6653_v31, %v2785_v20 }
 0x56f   :  { %v2554_v45 = vmul.f32 %v6776_v48, %v2553_v39  ;;  %3569 = vrsqrt.f32 %v6774_v47  ;;  %v6807_v22 = vmax.f32 %v3235_v11, %v2572_v27  ;;  %vm2558_vm3 = vweird.f32 %v6749_v28 }
 0x570   :  { %v2874_v42 = vmul.f32 %v3566_v12, %v2873_v9  ;;  %3571 = vrsqrt.f32 %v6779_v14  ;;  %v2783_v49 = vmul.f32 %v2771_v40, %v6459_v56  ;;  %vm2878_vm5 = vweird.f32 %v6752_v53 }
 0x571   :  { %v6811_v5 = vpop.eup %3567  ;;  %v2555_v16 = vmul.f32 0.5, %v2554_v45  ;;  %3573 = vrsqrt.f32 %v6794_v36  ;;  %v2463_v13 = vmax.f32 %v2460_v10, 0.0  ;;  %v2871_v33 = vsel %vm6818_vm4, %v6726_v29, %v2867_v41  ;;  %v2965_v24 = vpop.xlane.xlu2 %2964 }
 0x572   :  { %v2875_v43 = vmul.f32 0.5, %v2874_v42  ;;  %v2973_v56 = vmul.f32 %v6811_v5, %v6764_v23  ;;  %v2791_v38 = vmax.f32 %v6803_v60, 0.0  ;;  %vm2559_vm6 = vweird.f32 %v6776_v48 }
 0x573   :  { %v2556_v18 = vsub.f32 1.5, %v2555_v16  ;;  %v2636_v61 = vmul.f32 %v2629_v55, %v3966_v2  ;;  %vm2879_vm7 = vweird.f32 %v3566_v12  ;;  %vm2978_vm8 = vweird.f32 %v6764_v23  ;;  %vm2560_vm9 = vmor %vm2558_vm3, %vm2559_vm6  ;;  %v2632_v39 = vpop.xlane.xlu1 %2631 }
 0x574   :  { %v2876_v3 = vsub.f32 1.5, %v2875_v43  ;;  %v2974_v63 = vmul.f32 %v6811_v5, %v2973_v56  ;;  %v2786_v29 = vmul.f32 %v6629_v17, %v2783_v49  ;;  %v2892_v8 = vmul.f32 %v2871_v33, %v6462_v0  ;;  %vm2880_vm11 = vmor %vm2878_vm5, %vm2879_vm7 }
 0x575   :  { %v6834_v57 = vpop.eup %3569  ;;  %v2557_v37 = vmul.f32 %v6776_v48, %v2556_v18  ;;  %v6839_v25 = vadd.f32 1e-05, %v2636_v61  ;;  %v6843_v20 = vmax.f32 %v2353_v58, %v2463_v13  ;;  %vm2778_vm10 = vweird.f32 %v6774_v47 }
 0x576   :  { %v6841_v52 = vpop.eup %3571  ;;  %v2877_v11 = vmul.f32 %v3566_v12, %v2876_v3  ;;  %v2975_v27 = vmul.f32 0.5, %v2974_v63  ;;  %v2773_v1 = vmul.f32 %v6834_v57, %v6774_v47  ;;  %v2968_v40 = vmul.f32 %v2965_v24, %v3966_v2 }
 0x577   :  { %v6850_v0 = vpop.eup %3573  ;;  %v2561_v10 = vsel %vm2560_vm9, %v6776_v48, %v2557_v37  ;;  %v2983_v28 = vmul.f32 %v6841_v52, %v6779_v14  ;;  %3575 = vrsqrt.f32 %v6839_v25  ;;  %vm2979_vm12 = vweird.f32 %v6811_v5  ;;  %v3069_v37 = vpop.xlane.xlu0 %3068 }
 0x578   :  { %v2564_v41 = vmul.f32 %v2561_v10, %v6475_v50  ;;  %v2881_v9 = vsel %vm2880_vm11, %v3566_v12, %v2877_v11  ;;  %v2976_v58 = vsub.f32 1.5, %v2975_v27  ;;  %v2774_v45 = vmul.f32 %v6834_v57, %v2773_v1  ;;  %vm6877_vm15 = vmor %vm2978_vm8, %vm2979_vm12 }
 0x579   :  { %v2893_v42 = vmul.f32 %v2881_v9, %v6480_v21  ;;  %v2984_v53 = vmul.f32 %v6841_v52, %v2983_v28  ;;  %v2883_v48 = vmul.f32 %v6850_v0, %v6794_v36  ;;  %v6868_v55 = vadd.f32 %v6653_v31, %v2786_v29 }
 0x57a   :  { %v2895_v49 = vmul.f32 %v6629_v17, %v2892_v8  ;;  %v2977_v50 = vmul.f32 %v6811_v5, %v2976_v58  ;;  %v2775_v12 = vmul.f32 0.5, %v2774_v45  ;;  %v2567_v7 = vmul.f32 %v6629_v17, %v2564_v41 }
 0x57b   :  { %v2985_v16 = vmul.f32 0.5, %v2984_v53  ;;  %vm2988_vm13 = vweird.f32 %v6779_v14  ;;  %v2884_v21 = vmul.f32 %v6850_v0, %v2883_v48  ;;  %vm2779_vm14 = vweird.f32 %v6834_v57  ;;  %v3072_v11 = vpop.xlane.xlu1 %3071 }
 0x57c   :  { %v2776_v33 = vsub.f32 1.5, %v2775_v12  ;;  %vm2989_vm0 = vweird.f32 %v6841_v52  ;;  %v6883_v43 = vadd.f32 1e-05, %v2968_v40  ;;  %v2896_v18 = vmul.f32 %v6629_v17, %v2893_v42  ;;  %vm2780_vm1 = vmor %vm2778_vm10, %vm2779_vm14 }
 0x57d   :  { %v3576_v56 = vpop.eup %3575  ;;  %v2981_v61 = vsel %vm6877_vm15, %v6811_v5, %v2977_v50  ;;  %v2986_v3 = vsub.f32 1.5, %v2985_v16  ;;  %v2885_v23 = vmul.f32 0.5, %v2884_v21  ;;  %v6890_v63 = vadd.f32 %v6653_v31, %v2895_v49  ;;  %vm6908_vm3 = vmor %vm2988_vm13, %vm2989_vm0 }
 0x57e   :  { %v2777_v24 = vmul.f32 %v6834_v57, %v2776_v33  ;;  %v2643_v29 = vmul.f32 %v3576_v56, %v6839_v25  ;;  %v2637_v8 = vmul.f32 %v2632_v39, %v3966_v2  ;;  %v2792_v27 = vmax.f32 %v6868_v55, 0.0 }
 0x57f   :  { %v2570_v1 = vadd.f32 %v6653_v31, %v2567_v7  ;;  %v2987_v5 = vmul.f32 %v6841_v52, %v2986_v3  ;;  %v2886_v10 = vsub.f32 1.5, %v2885_v23  ;;  %v3002_v28 = vmul.f32 %v2981_v61, %v6483_v19  ;;  %v2635_v45 = vpop.xlane.xlu2 %2634 }
 0x580   :  { %v2781_v40 = vsel %vm2780_vm1, %v6834_v57, %v2777_v24  ;;  %v2644_v41 = vmul.f32 %v3576_v56, %v2643_v29  ;;  %3577 = vrsqrt.f32 %v6883_v43  ;;  %v6914_v47 = vadd.f32 %v6653_v31, %v2896_v18 }
 0x581   :  { %v2991_v19 = vsel %vm6908_vm3, %v6841_v52, %v2987_v5  ;;  %vm2888_vm4 = vweird.f32 %v6794_v36  ;;  %vm2889_vm5 = vweird.f32 %v6850_v0  ;;  %v2784_v14 = vmul.f32 %v2781_v40, %v6496_v30  ;;  %v3179_v36 = vpop.xlane.xlu0 %3178 }
 0x582   :  { %v2887_v57 = vmul.f32 %v6850_v0, %v2886_v10  ;;  %v2645_v9 = vmul.f32 0.5, %v2644_v41  ;;  %v6923_v58 = vadd.f32 1e-05, %v2637_v8  ;;  %v2573_v42 = vmax.f32 %v2570_v1, 0.0  ;;  %vm6935_vm7 = vmor %vm2888_vm4, %vm2889_vm5 }
 0x583   :  { %vm2649_vm6 = vweird.f32 %v3576_v56  ;;  %v3076_v53 = vmul.f32 %v3069_v37, %v3966_v2  ;;  %v3077_v48 = vmul.f32 %v3072_v11, %v3966_v2  ;;  %v3005_v52 = vmul.f32 %v6629_v17, %v3002_v28  ;;  %v3182_v23 = vpop.xlane.xlu1 %3181 }
 0x584   :  { %v3003_v49 = vmul.f32 %v2991_v19, %v6500_v15  ;;  %v2646_v50 = vsub.f32 1.5, %v2645_v9  ;;  %3579 = vrsqrt.f32 %v6923_v58  ;;  %v2901_v30 = vmax.f32 %v6890_v63, 0.0 }
 0x585   :  { %vm2648_vm8 = vweird.f32 %v6839_v25  ;;  %v6940_v7 = vadd.f32 1e-05, %v3076_v53  ;;  %v6942_v16 = vadd.f32 1e-05, %v3077_v48  ;;  %v2787_v21 = vmul.f32 %v6629_v17, %v2784_v14 }
 0x586   :  { %v6944_v15 = vpop.eup %3577  ;;  %v2891_v13 = vsel %vm6935_vm7, %v6850_v0, %v2887_v57  ;;  %v2647_v33 = vmul.f32 %v3576_v56, %v2646_v50  ;;  %v2638_v18 = vmul.f32 %v2635_v45, %v3966_v2  ;;  %v6952_v61 = vmax.f32 %v6843_v20, %v2573_v42  ;;  %vm2650_vm9 = vmor %vm2648_vm8, %vm2649_vm6 }
 0x587   :  { %v2902_v25 = vmax.f32 %v6914_v47, 0.0  ;;  %v2993_v3 = vmul.f32 %v6944_v15, %v6883_v43  ;;  %3581 = vrsqrt.f32 %v6940_v7  ;;  %v6960_v24 = vadd.f32 %v6653_v31, %v3005_v52 }
 0x588   :  { %v3006_v0 = vmul.f32 %v6629_v17, %v3003_v49  ;;  %v2651_v29 = vsel %vm2650_vm9, %v3576_v56, %v2647_v33  ;;  %3583 = vrsqrt.f32 %v6942_v16  ;;  %v2894_v20 = vmul.f32 %v2891_v13, %v6510_v35 }
 0x589   :  { %v2672_v8 = vmul.f32 %v2651_v29, %v6514_v59  ;;  %v2994_v37 = vmul.f32 %v6944_v15, %v2993_v3  ;;  %v3186_v11 = vmul.f32 %v3179_v36, %v3966_v2  ;;  %v6969_v5 = vadd.f32 %v6653_v31, %v2787_v21  ;;  %v3075_v59 = vpop.xlane.xlu2 %3074 }
 0x58a   :  { %v3580_v1 = vpop.eup %3579  ;;  %vm2998_vm10 = vweird.f32 %v6883_v43  ;;  %v6972_v10 = vadd.f32 1e-05, %v2638_v18  ;;  %v3187_v56 = vmul.f32 %v3182_v23, %v3966_v2  ;;  %vm2658_vm11 = vweird.f32 %v6923_v58 }
 0x58b   :  { %v2675_v28 = vmul.f32 %v6629_v17, %v2672_v8  ;;  %v2995_v40 = vmul.f32 0.5, %v2994_v37  ;;  %v2653_v35 = vmul.f32 %v3580_v1, %v6923_v58  ;;  %v6979_v39 = vadd.f32 %v6653_v31, %v3006_v0 }
 0x58c   :  { %v6981_v41 = vadd.f32 1e-05, %v3186_v11  ;;  %3585 = vrsqrt.f32 %v6972_v10  ;;  %v6984_v19 = vadd.f32 1e-05, %v3187_v56  ;;  %v6987_v57 = vmul.f32 %v6629_v17, %v2894_v20 }
 0x58d   :  { %v3582_v14 = vpop.eup %3581  ;;  %v2678_v9 = vadd.f32 %v6653_v31, %v2675_v28  ;;  %v2996_v45 = vsub.f32 1.5, %v2995_v40  ;;  %v2654_v42 = vmul.f32 %v3580_v1, %v2653_v35  ;;  %vm2999_vm12 = vweird.f32 %v6944_v15 }
 0x58e   :  { %v6990_v53 = vpop.eup %3583  ;;  %v3083_v48 = vmul.f32 %v3582_v14, %v6940_v7  ;;  %3587 = vrsqrt.f32 %v6981_v41  ;;  %v3078_v52 = vmul.f32 %v3075_v59, %v3966_v2  ;;  %v2793_v49 = vmax.f32 %v6969_v5, 0.0  ;;  %vm7004_vm15 = vmor %vm2998_vm10, %vm2999_vm12 }
 0x58f   :  { %v2997_v50 = vmul.f32 %v6944_v15, %v2996_v45  ;;  %v2655_v12 = vmul.f32 0.5, %v2654_v42  ;;  %v3093_v21 = vmul.f32 %v6990_v53, %v6942_v16  ;;  %v2681_v13 = vmax.f32 %v2678_v9, 0.0 }
 0x590   :  { %v3084_v33 = vmul.f32 %v3582_v14, %v3083_v48  ;;  %vm3088_vm13 = vweird.f32 %v6940_v7  ;;  %3589 = vrsqrt.f32 %v6984_v19  ;;  %vm2659_vm14 = vweird.f32 %v3580_v1 }
 0x591   :  { %v2656_v18 = vsub.f32 1.5, %v2655_v12  ;;  %v3094_v3 = vmul.f32 %v6990_v53, %v3093_v21  ;;  %vm3098_vm0 = vweird.f32 %v6942_v16  ;;  %v3001_v0 = vsel %vm7004_vm15, %v6944_v15, %v2997_v50  ;;  %vm2660_vm3 = vmor %vm2658_vm11, %vm2659_vm14 }
 0x592   :  { %v7010_v23 = vpop.eup %3585  ;;  %v3085_v29 = vmul.f32 0.5, %v3084_v33  ;;  %v7015_v20 = vadd.f32 1e-05, %v3078_v52  ;;  %v3011_v43 = vmax.f32 %v6960_v24, 0.0  ;;  %vm3089_vm1 = vweird.f32 %v3582_v14 }
 0x593   :  { %v2657_v8 = vmul.f32 %v3580_v1, %v2656_v18  ;;  %v3095_v37 = vmul.f32 0.5, %v3094_v3  ;;  %v2663_v11 = vmul.f32 %v7010_v23, %v6972_v10  ;;  %v3240_v28 = vmax.f32 %v6781_v46, %v2681_v13  ;;  %v3185_v46 = vpop.xlane.xlu2 %3184  ;;  %vm3090_vm8 = vmor %vm3088_vm13, %vm3089_vm1 }
 0x594   :  { %v3588_v56 = vpop.eup %3587  ;;  %v3086_v40 = vsub.f32 1.5, %v3085_v29  ;;  %vm3099_vm4 = vweird.f32 %v6990_v53  ;;  %vm2668_vm5 = vweird.f32 %v6972_v10  ;;  %3591 = vrsqrt.f32 %v7015_v20 }
 0x595   :  { %v7027_v15 = vmul.f32 %v3001_v0, %v6524_v26  ;;  %v2661_v35 = vsel %vm2660_vm3, %v3580_v1, %v2657_v8  ;;  %v3096_v59 = vsub.f32 1.5, %v3095_v37  ;;  %v3193_v9 = vmul.f32 %v3588_v56, %v6981_v41  ;;  %vm3100_vm11 = vmor %vm3098_vm0, %vm3099_vm4 }
 0x596   :  { %vm3198_vm6 = vweird.f32 %v6981_v41  ;;  %v3590_v45 = vpop.eup %3589  ;;  %v2673_v58 = vmul.f32 %v2661_v35, %v6530_v6  ;;  %v3087_v42 = vmul.f32 %v3582_v14, %v3086_v40  ;;  %v2664_v48 = vmul.f32 %v7010_v23, %v2663_v11 }
 0x597   :  { %vm2669_vm7 = vweird.f32 %v7010_v23  ;;  %v3097_v26 = vmul.f32 %v6990_v53, %v3096_v59  ;;  %v3194_v1 = vmul.f32 %v3588_v56, %v3193_v9  ;;  %vm3199_vm9 = vweird.f32 %v3588_v56 }
 0x598   :  { %v3203_v52 = vmul.f32 %v3590_v45, %v6984_v19  ;;  %vm3208_vm10 = vweird.f32 %v6984_v19  ;;  %v2676_v50 = vmul.f32 %v6629_v17, %v2673_v58  ;;  %v3091_v6 = vsel %vm3090_vm8, %v3582_v14, %v3087_v42  ;;  %vm2670_vm13 = vmor %vm2668_vm5, %vm2669_vm7 }
 0x599   :  { %v2665_v12 = vmul.f32 0.5, %v2664_v48  ;;  %v3188_v7 = vmul.f32 %v3185_v46, %v3966_v2  ;;  %v3112_v21 = vmul.f32 %v3091_v6, %v6533_v32  ;;  %v3101_v13 = vsel %vm3100_vm11, %v6990_v53, %v3097_v26  ;;  %vm3200_vm15 = vmor %vm3198_vm6, %vm3199_vm9 }
 0x59a   :  { %v3195_v33 = vmul.f32 0.5, %v3194_v1  ;;  %v3204_v36 = vmul.f32 %v3590_v45, %v3203_v52  ;;  %v3592_v18 = vpop.eup %3591  ;;  %v2679_v3 = vadd.f32 %v6653_v31, %v2676_v50  ;;  %v3113_v0 = vmul.f32 %v3101_v13, %v6550_v54 }
 0x59b   :  { %v2666_v14 = vsub.f32 1.5, %v2665_v12  ;;  %v7050_v29 = vadd.f32 1e-05, %v3188_v7  ;;  %v3115_v16 = vmul.f32 %v6629_v17, %v3112_v21  ;;  %v3103_v2 = vmul.f32 %v3592_v18, %v7015_v20 }
 0x59c   :  { %v3196_v8 = vsub.f32 1.5, %v3195_v33  ;;  %v3205_v37 = vmul.f32 0.5, %v3204_v36  ;;  %v2682_v11 = vmax.f32 %v2679_v3, 0.0  ;;  %v3116_v32 = vmul.f32 %v6629_v17, %v3113_v0 }
 0x59d   :  { %v2667_v53 = vmul.f32 %v7010_v23, %v2666_v14  ;;  %vm3209_vm12 = vweird.f32 %v3590_v45  ;;  %v3104_v35 = vmul.f32 %v3592_v18, %v3103_v2  ;;  %3593 = vrsqrt.f32 %v7050_v29 }
 0x59e   :  { %v3197_v40 = vmul.f32 %v3588_v56, %v3196_v8  ;;  %v3206_v54 = vsub.f32 1.5, %v3205_v37  ;;  %v3241_v59 = vmax.f32 %v6807_v22, %v2682_v11  ;;  %v3118_v46 = vadd.f32 %v6653_v31, %v3115_v16  ;;  %vm3210_vm14 = vmor %vm3208_vm10, %vm3209_vm12 }
 0x59f   :  { %v2671_v9 = vsel %vm2670_vm13, %v7010_v23, %v2667_v53  ;;  %v3012_v58 = vmax.f32 %v6979_v39, 0.0  ;;  %v3105_v26 = vmul.f32 0.5, %v3104_v35  ;;  %vm3109_vm0 = vweird.f32 %v3592_v18 }
 0x5a0   :  { %v3201_v42 = vsel %vm3200_vm15, %v3588_v56, %v3197_v40  ;;  %v2674_v10 = vmul.f32 %v2671_v9, %v6563_v4  ;;  %v3207_v48 = vmul.f32 %v3590_v45, %v3206_v54  ;;  %v3243_v22 = vmax.f32 %v3240_v28, %v2791_v38 }
 0x5a1   :  { %v3222_v1 = vmul.f32 %v3201_v42, %v6543_v62  ;;  %v3119_v41 = vadd.f32 %v6653_v31, %v3116_v32  ;;  %v3106_v56 = vsub.f32 1.5, %v3105_v26  ;;  %v3244_v4 = vmax.f32 %v3241_v59, %v2792_v27 }
 0x5a2   :  { %v2677_v23 = vmul.f32 %v6629_v17, %v2674_v10  ;;  %v3211_v39 = vsel %vm3210_vm14, %v3590_v45, %v3207_v48  ;;  %vm3108_vm1 = vweird.f32 %v7015_v20  ;;  %v3246_v19 = vmax.f32 %v3243_v22, %v2901_v30 }
 0x5a3   :  { %v3225_v52 = vmul.f32 %v6629_v17, %v3222_v1  ;;  %v3223_v62 = vmul.f32 %v3211_v39, %v6557_v51  ;;  %v3594_v60 = vpop.eup %3593  ;;  %v3107_v28 = vmul.f32 %v3592_v18, %v3106_v56  ;;  %v3121_v50 = vmax.f32 %v3118_v46, 0.0  ;;  %vm3110_vm3 = vmor %vm3108_vm1, %vm3109_vm0 }
 0x5a4   :  { %v2680_v38 = vadd.f32 %v6653_v31, %v2677_v23  ;;  %v3247_v45 = vmax.f32 %v3244_v4, %v2902_v25  ;;  %v3213_v27 = vmul.f32 %v3594_v60, %v7050_v29  ;;  %v3122_v20 = vmax.f32 %v3119_v41, 0.0 }
 0x5a5   :  { %v3226_v55 = vmul.f32 %v6629_v17, %v3223_v62  ;;  %v3228_v51 = vadd.f32 %v6653_v31, %v3225_v52  ;;  %v3111_v63 = vsel %vm3110_vm3, %v3592_v18, %v3107_v28  ;;  %v3249_v30 = vmax.f32 %v3246_v19, %v3011_v43 }
 0x5a6   :  { %v2683_v6 = vmax.f32 %v2680_v38, 0.0  ;;  %v3250_v12 = vmax.f32 %v3247_v45, %v3012_v58  ;;  %v3114_v7 = vmul.f32 %v3111_v63, %v6574_v44  ;;  %v3214_v21 = vmul.f32 %v3594_v60, %v3213_v27 }
 0x5a7   :  { %v3231_v47 = vmax.f32 %v3228_v51, 0.0  ;;  %v3229_v25 = vadd.f32 %v6653_v31, %v3226_v55  ;;  %v2900_v13 = vadd.f32 %v6653_v31, %v6987_v57  ;;  %v3007_v33 = vmul.f32 %v6629_v17, %v7027_v15 }
 0x5a8   :  { %v3242_v36 = vmax.f32 %v6952_v61, %v2683_v6  ;;  %v3252_v3 = vmax.f32 %v3249_v30, %v3121_v50  ;;  %v3215_v18 = vmul.f32 0.5, %v3214_v21  ;;  %v3253_v24 = vmax.f32 %v3250_v12, %v3122_v20 }
 0x5a9   :  { %v3232_v0 = vmax.f32 %v3229_v25, 0.0  ;;  %v3117_v43 = vmul.f32 %v6629_v17, %v3114_v7  ;;  %vm3219_vm4 = vweird.f32 %v3594_v60  ;;  %v2903_v37 = vmax.f32 %v2900_v13, 0.0 }
 0x5aa   :  { %v3255_v14 = vmax.f32 %v3252_v3, %v3231_v47  ;;  %v3245_v44 = vmax.f32 %v3242_v36, %v2793_v49  ;;  %v3216_v16 = vsub.f32 1.5, %v3215_v18  ;;  %v3010_v57 = vadd.f32 %v6653_v31, %v3007_v33 }
 0x5ab   :  { %v3256_v8 = vmax.f32 %v3253_v24, %v3232_v0  ;;  %vm3218_vm5 = vweird.f32 %v7050_v29  ;;  %v3120_v61 = vadd.f32 %v6653_v31, %v3117_v43  ;;  %vm3273_vm7 = vcmask 523264  }
 0x5ac   :  { %3261 = vrot.lane.b32.xlu0 %v3255_v14, %s3630_s12  ;;  %v3217_v15 = vmul.f32 %v3594_v60, %v3216_v16  ;;  %vm3220_vm6 = vmor %vm3218_vm5, %vm3219_vm4  ;;  %v3248_v2 = vmax.f32 %v3245_v44, %v2903_v37  ;;  %v3013_v49 = vmax.f32 %v3010_v57, 0.0 }
 0x5ad   :  { %3263 = vrot.lane.b32.xlu1 %v3256_v8, %s3630_s12  ;;  %v3123_v53 = vmax.f32 %v3120_v61, 0.0 }
 0x5ae   :  { %v3221_v11 = vsel %vm3220_vm6, %v3594_v60, %v3217_v15  ;;  %v3251_v40 = vmax.f32 %v3248_v2, %v3013_v49 }
 0x5af   :  { %v3224_v5 = vmul.f32 %v3221_v11, %v6579_v34 }
 0x5b0   :  { %v3254_v59 = vmax.f32 %v3251_v40, %v3123_v53 }
 0x5b1   :  { %v3227_v32 = vmul.f32 %v6629_v17, %v3224_v5 }
 0x5b3   :  { %v3230_v54 = vadd.f32 %v6653_v31, %v3227_v32 }
 0x5b5   :  { %v3233_v35 = vmax.f32 %v3230_v54, 0.0 }
 0x5b7   :  { %v3257_v9 = vmax.f32 %v3254_v59, %v3233_v35 }
 0x5b9   :  { %3265 = vrot.lane.b32.xlu2 %v3257_v9, %s3630_s12 }
 0x613   :  { %v3266_v29 = vpop.permute.xlu2 %3265 }
 0x614   :  { %v3272_v46 = vsel %vm95_vm2, %v3257_v9, %v3266_v29 }
 0x615   :  { %3276 = vst.msk [vmem:[#allocation2 + $0x10] sm:$0xff] %vm3273_vm7, %v3272_v46 }
 0x61e   :  { %v3262_v34 = vpop.permute.xlu0 %3261 }
 0x61f   :  { %v3270_v17 = vsel %vm95_vm2, %v3255_v14, %v3262_v34  ;;  %v3264_v31 = vpop.permute.xlu1 %3263 }
 0x620   :  { %3274 = vst.msk [vmem:[#allocation2] sm:$0xff] %vm3273_vm7, %v3270_v17  ;;  %v3271_v58 = vsel %vm95_vm2, %v3256_v8, %v3264_v31 }
 0x621   :  { %3275 = vst.msk [vmem:[#allocation2 + $0x8] sm:$0xff] %vm3273_vm7, %v3271_v58 }
 0x622   :  { %3289 = dma.vmem_to_hbm [thread:$0]  %s3282_s4, 384, %s3284_s22, [#allocation3], %s3632_s7, %s3632_s7, %s3633_s23  }
 0x623   :  { %3627 = dma.done.wait [#allocation3], 384  }
 0x624   :  { %3628 = vsyncadd [#allocation3], 4294966912 }
 0x625   :  { %3294 = vsyncpa [#allocation3], 1 }

</bundles_post_ra>
